<compile_context>
chip_gen: v7x
topology: tpu7x:2x2x1
jax: 0.10.0
libtpu: 0.0.40
codegen_flags: <defaults>
</compile_context>

<pallas_src>
import functools

import numpy as np
import jax
import jax.numpy as jnp
from jax import lax
from jax.experimental import pallas as pl
from jax.experimental.pallas import tpu as pltpu

KSIZE = 7
PAD = KSIZE // 2


def _spatial_attn_kernel(x_ref, m_ref, w_ref, o_ref, *, H, W, bt):
    """One grid step: `bt` batch elements in lane-dense (C, H*W) layout.

    x_ref : VMEM (bt, C, HW)      input activations (HW on the lane axis)
    m_ref : VMEM (2*KSIZE, HW)    f32 row/col validity masks (precomputed)
    w_ref : SMEM (2*KSIZE*KSIZE,) f32 flattened conv weight, [c, kh, kw] order
    o_ref : VMEM (bt, C, HW)      output
    """
    HW = H * W

    # Hoist the 14 (1, HW) validity masks into registers once per grid step.
    row_m = [m_ref[kh:kh + 1, :] for kh in range(KSIZE)]
    col_m = [m_ref[KSIZE + kw:KSIZE + kw + 1, :] for kw in range(KSIZE)]

    for b in range(bt):                                     # static unroll
        x = x_ref[b].astype(jnp.float32)                    # (C, HW)

        # Channel-wise mean / max -> the two conv input planes (flat layout).
        avg = jnp.mean(x, axis=0, keepdims=True)            # (1, HW)
        mx = jnp.max(x, axis=0, keepdims=True)              # (1, HW)

        # 7x7 conv, padding=3, no bias, evaluated in the flat H*W domain:
        # tap (kh, kw) reads plane[p + s] with s = (kh-3)*W + (kw-3),
        # realized as a lane roll (out[p] = plane[(p + s) % HW]) and zeroed
        # at image borders by the precomputed row/col masks.
        acc = jnp.zeros((1, HW), jnp.float32)
        for kh in range(KSIZE):
            for kw in range(KSIZE):
                s = (kh - PAD) * W + (kw - PAD)              # flat tap offset
                sh = (-s) % HW                               # jnp.roll-style shift
                if sh == 0:
                    s_avg, s_mx = avg, mx
                else:
                    s_avg = pltpu.roll(avg, shift=sh, axis=1)
                    s_mx = pltpu.roll(mx, shift=sh, axis=1)
                w_avg = w_ref[kh * KSIZE + kw]
                w_max = w_ref[KSIZE * KSIZE + kh * KSIZE + kw]
                mask = row_m[kh] * col_m[kw]                 # (1, HW) in {0,1}
                acc = acc + (w_avg * s_avg + w_max * s_mx) * mask

        attn = jax.nn.sigmoid(acc)                           # (1, HW)
        # Lane-dense store: broadcast attn over channels (sublanes).
        o_ref[b] = (attn * x).astype(o_ref.dtype)


def _pick_batch_tile(B, C, HW, itemsize):
    # Block a few batch elements per grid step to amortize the ~0.35us/step
    # pipeline overhead, but (a) keep >= 2 grid steps when B >= 2 so both v7x
    # TensorCores get work, and (b) keep the double-buffered in+out blocks
    # far below the scoped-VMEM budget (v7x has only 64 MiB physical VMEM).
    budget = 4 * 1024 * 1024
    hi = min(B, 8, max(1, B // 2))
    bt = 1
    for cand in range(1, hi + 1):
        if B % cand == 0 and 4 * cand * C * HW * itemsize <= budget:
            bt = cand
    return bt


def spatial_attention(x, conv_weight):
    """x: (B, C, H, W); conv_weight: (1, 2, 7, 7). Returns (B, C, H, W)."""
    B, C, H, W = x.shape
    HW = H * W

    # Lane-dense view: last dim H*W maps to lanes (a multiple of 128 for the
    # usual even spatial sizes), so loads, the broadcast multiply and stores
    # are full-lane ops. The reshapes are contiguous/metadata-only in XLA.
    x3 = x.reshape(B, C, HW)
    w_flat = conv_weight.reshape(-1).astype(jnp.float32)     # (2*49,)

    # Precomputed boundary masks for the zero-padded 7x7 conv in flat H*W
    # coordinates: rows 0..6 = row-validity per kh, rows 7..13 = col per kw.
    pos = np.arange(HW)
    row, col = pos // W, pos % W
    row_masks = np.stack(
        [((row + kh - PAD) >= 0) & ((row + kh - PAD) < H) for kh in range(KSIZE)])
    col_masks = np.stack(
        [((col + kw - PAD) >= 0) & ((col + kw - PAD) < W) for kw in range(KSIZE)])
    masks = jnp.asarray(
        np.concatenate([row_masks, col_masks], axis=0).astype(np.float32))

    bt = _pick_batch_tile(B, C, HW, x.dtype.itemsize)
    grid = (B // bt,)

    kernel = functools.partial(_spatial_attn_kernel, H=H, W=W, bt=bt)

    flops = B * HW * (3 * C + 6 * KSIZE * KSIZE + 2)
    bytes_accessed = (2 * B * C * HW + 2 * KSIZE * HW + 2 * KSIZE * KSIZE) * 4

    out3 = pl.pallas_call(
        kernel,
        out_shape=jax.ShapeDtypeStruct((B, C, HW), x.dtype),
        grid_spec=pltpu.PrefetchScalarGridSpec(
            num_scalar_prefetch=0,
            grid=grid,
            in_specs=[
                pl.BlockSpec((bt, C, HW), lambda b: (b, 0, 0)),
                pl.BlockSpec((2 * KSIZE, HW), lambda b: (0, 0)),
                pl.BlockSpec(memory_space=pltpu.MemorySpace.SMEM),
            ],
            out_specs=pl.BlockSpec((bt, C, HW), lambda b: (b, 0, 0)),
        ),
        compiler_params=pltpu.CompilerParams(
            dimension_semantics=("parallel",),
            vmem_limit_bytes=32 * 1024 * 1024,
        ),
        cost_estimate=pl.CostEstimate(
            flops=flops,
            transcendentals=B * HW,
            bytes_accessed=bytes_accessed,
        ),
    )(x3, masks, w_flat)

    # TODO(synk): for very large C, add a channel-tile grid axis (reduce+conv
    # pass, then multiply pass) to bound per-step VMEM on v7x's 64 MiB.
    return out3.reshape(B, C, H, W)


def _reference(x, conv_weight):
    """Pure-JAX reference matching the PyTorch forward."""
    avg = jnp.mean(x, axis=1, keepdims=True)
    mx = jnp.max(x, axis=1, keepdims=True)
    out = jnp.concatenate([avg, mx], axis=1)                 # (B, 2, H, W)
    out = lax.conv_general_dilated(
        out, conv_weight, window_strides=(1, 1),
        padding=((PAD, PAD), (PAD, PAD)),
        dimension_numbers=("NCHW", "OIHW", "NCHW"))
    return jax.nn.sigmoid(out) * x


if __name__ == "__main__":
    B, C, H, W = 2, 4, 16, 16
    key = jax.random.PRNGKey(0)
    kx, kw = jax.random.split(key)
    x = jax.random.normal(kx, (B, C, H, W), dtype=jnp.float32)
    # Conv2d(2, 1, 7, bias=False) weight -> (1, 2, 7, 7).
    conv_weight = jax.random.normal(kw, (1, 2, KSIZE, KSIZE), dtype=jnp.float32) * 0.1

    y = jax.block_until_ready(spatial_attention(x, conv_weight))
    y_ref = _reference(x, conv_weight)

    assert y.shape == (B, C, H, W)
    assert jnp.allclose(y, y_ref, atol=1e-5, rtol=1e-5), "mismatch vs reference"

    print("KERNEL_OK")
</pallas_src>

<mosaic_0001>
module attributes {stable_mosaic.version = 11 : i64} {
  func.func @_spatial_attn_kernel(%arg0: i32, %arg1: memref<1x4x256xf32, #tpu.memory_space<vmem>>, %arg2: memref<14x256xf32, #tpu.memory_space<vmem>>, %arg3: memref<98xf32, #tpu.memory_space<smem>>, %arg4: memref<1x4x256xf32, #tpu.memory_space<vmem>>) attributes {dimension_semantics = [#tpu.dimension_semantics<parallel>], iteration_bounds = array<i64: 2>, scalar_prefetch = 0 : i64, scratch_operands = 0 : i64, tpu.core_type = #tpu.core_type<tc>, window_params = [{transform_indices = @transform_0, window_bounds = array<i64: 1, 4, 256>}, {pipeline_mode = #tpu.pipeline_mode<synchronous>, transform_indices = @transform_1, window_bounds = array<i64: 14, 256>}, {transform_indices = @transform_2, window_bounds = array<i64: 98>}, {transform_indices = @transform_3, window_bounds = array<i64: 1, 4, 256>}]} {
    %c0 = arith.constant 0 : index
    %c0_0 = arith.constant 0 : index
    %0 = vector.load %arg2[%c0, %c0_0] : memref<14x256xf32, #tpu.memory_space<vmem>>, vector<1x256xf32>
    %c1 = arith.constant 1 : index
    %c0_1 = arith.constant 0 : index
    %1 = vector.load %arg2[%c1, %c0_1] : memref<14x256xf32, #tpu.memory_space<vmem>>, vector<1x256xf32>
    %c2 = arith.constant 2 : index
    %c0_2 = arith.constant 0 : index
    %2 = vector.load %arg2[%c2, %c0_2] : memref<14x256xf32, #tpu.memory_space<vmem>>, vector<1x256xf32>
    %c3 = arith.constant 3 : index
    %c0_3 = arith.constant 0 : index
    %3 = vector.load %arg2[%c3, %c0_3] : memref<14x256xf32, #tpu.memory_space<vmem>>, vector<1x256xf32>
    %c4 = arith.constant 4 : index
    %c0_4 = arith.constant 0 : index
    %4 = vector.load %arg2[%c4, %c0_4] : memref<14x256xf32, #tpu.memory_space<vmem>>, vector<1x256xf32>
    %c5 = arith.constant 5 : index
    %c0_5 = arith.constant 0 : index
    %5 = vector.load %arg2[%c5, %c0_5] : memref<14x256xf32, #tpu.memory_space<vmem>>, vector<1x256xf32>
    %c6 = arith.constant 6 : index
    %c0_6 = arith.constant 0 : index
    %6 = vector.load %arg2[%c6, %c0_6] : memref<14x256xf32, #tpu.memory_space<vmem>>, vector<1x256xf32>
    %c7 = arith.constant 7 : index
    %c0_7 = arith.constant 0 : index
    %7 = vector.load %arg2[%c7, %c0_7] : memref<14x256xf32, #tpu.memory_space<vmem>>, vector<1x256xf32>
    %c8 = arith.constant 8 : index
    %c0_8 = arith.constant 0 : index
    %8 = vector.load %arg2[%c8, %c0_8] : memref<14x256xf32, #tpu.memory_space<vmem>>, vector<1x256xf32>
    %c9 = arith.constant 9 : index
    %c0_9 = arith.constant 0 : index
    %9 = vector.load %arg2[%c9, %c0_9] : memref<14x256xf32, #tpu.memory_space<vmem>>, vector<1x256xf32>
    %c10 = arith.constant 10 : index
    %c0_10 = arith.constant 0 : index
    %10 = vector.load %arg2[%c10, %c0_10] : memref<14x256xf32, #tpu.memory_space<vmem>>, vector<1x256xf32>
    %c11 = arith.constant 11 : index
    %c0_11 = arith.constant 0 : index
    %11 = vector.load %arg2[%c11, %c0_11] : memref<14x256xf32, #tpu.memory_space<vmem>>, vector<1x256xf32>
    %c12 = arith.constant 12 : index
    %c0_12 = arith.constant 0 : index
    %12 = vector.load %arg2[%c12, %c0_12] : memref<14x256xf32, #tpu.memory_space<vmem>>, vector<1x256xf32>
    %c13 = arith.constant 13 : index
    %c0_13 = arith.constant 0 : index
    %13 = vector.load %arg2[%c13, %c0_13] : memref<14x256xf32, #tpu.memory_space<vmem>>, vector<1x256xf32>
    %c0_14 = arith.constant 0 : index
    %c0_15 = arith.constant 0 : index
    %c0_16 = arith.constant 0 : index
    %14 = vector.load %arg1[%c0_14, %c0_15, %c0_16] : memref<1x4x256xf32, #tpu.memory_space<vmem>>, vector<1x4x256xf32>
    %15 = vector.shape_cast %14 : vector<1x4x256xf32> to vector<4x256xf32>
    %cst = arith.constant dense<0.000000e+00> : vector<256xf32>
    %16 = vector.multi_reduction <add>, %15, %cst [0] : vector<4x256xf32> to vector<256xf32>
    %17 = vector.shape_cast %16 : vector<256xf32> to vector<1x256xf32>
    %cst_17 = arith.constant 4.000000e+00 : f32
    %18 = vector.broadcast %cst_17 : f32 to vector<1x256xf32>
    %19 = arith.divf %17, %18 : vector<1x256xf32>
    %cst_18 = arith.constant dense<0xFF800000> : vector<256xf32>
    %20 = vector.multi_reduction <maximumf>, %15, %cst_18 [0] : vector<4x256xf32> to vector<256xf32>
    %21 = vector.shape_cast %20 : vector<256xf32> to vector<1x256xf32>
    %cst_19 = arith.constant 0.000000e+00 : f32
    %22 = vector.broadcast %cst_19 : f32 to vector<1x256xf32>
    %c51_i32 = arith.constant 51 : i32
    %23 = tpu.dynamic_rotate %19 by %c51_i32 dim 1 : vector<1x256xf32>, i32 -> vector<1x256xf32>
    %c51_i32_20 = arith.constant 51 : i32
    %24 = tpu.dynamic_rotate %21 by %c51_i32_20 dim 1 : vector<1x256xf32>, i32 -> vector<1x256xf32>
    %c0_21 = arith.constant 0 : index
    %25 = memref.load %arg3[%c0_21] : memref<98xf32, #tpu.memory_space<smem>>
    %c49 = arith.constant 49 : index
    %26 = memref.load %arg3[%c49] : memref<98xf32, #tpu.memory_space<smem>>
    %27 = arith.mulf %0, %7 : vector<1x256xf32>
    %28 = vector.broadcast %25 : f32 to vector<1x256xf32>
    %29 = arith.mulf %28, %23 : vector<1x256xf32>
    %30 = vector.broadcast %26 : f32 to vector<1x256xf32>
    %31 = arith.mulf %30, %24 : vector<1x256xf32>
    %32 = arith.addf %29, %31 : vector<1x256xf32>
    %33 = arith.mulf %32, %27 : vector<1x256xf32>
    %34 = arith.addf %22, %33 : vector<1x256xf32>
    %c50_i32 = arith.constant 50 : i32
    %35 = tpu.dynamic_rotate %19 by %c50_i32 dim 1 : vector<1x256xf32>, i32 -> vector<1x256xf32>
    %c50_i32_22 = arith.constant 50 : i32
    %36 = tpu.dynamic_rotate %21 by %c50_i32_22 dim 1 : vector<1x256xf32>, i32 -> vector<1x256xf32>
    %c1_23 = arith.constant 1 : index
    %37 = memref.load %arg3[%c1_23] : memref<98xf32, #tpu.memory_space<smem>>
    %c50 = arith.constant 50 : index
    %38 = memref.load %arg3[%c50] : memref<98xf32, #tpu.memory_space<smem>>
    %39 = arith.mulf %0, %8 : vector<1x256xf32>
    %40 = vector.broadcast %37 : f32 to vector<1x256xf32>
    %41 = arith.mulf %40, %35 : vector<1x256xf32>
    %42 = vector.broadcast %38 : f32 to vector<1x256xf32>
    %43 = arith.mulf %42, %36 : vector<1x256xf32>
    %44 = arith.addf %41, %43 : vector<1x256xf32>
    %45 = arith.mulf %44, %39 : vector<1x256xf32>
    %46 = arith.addf %34, %45 : vector<1x256xf32>
    %c49_i32 = arith.constant 49 : i32
    %47 = tpu.dynamic_rotate %19 by %c49_i32 dim 1 : vector<1x256xf32>, i32 -> vector<1x256xf32>
    %c49_i32_24 = arith.constant 49 : i32
    %48 = tpu.dynamic_rotate %21 by %c49_i32_24 dim 1 : vector<1x256xf32>, i32 -> vector<1x256xf32>
    %c2_25 = arith.constant 2 : index
    %49 = memref.load %arg3[%c2_25] : memref<98xf32, #tpu.memory_space<smem>>
    %c51 = arith.constant 51 : index
    %50 = memref.load %arg3[%c51] : memref<98xf32, #tpu.memory_space<smem>>
    %51 = arith.mulf %0, %9 : vector<1x256xf32>
    %52 = vector.broadcast %49 : f32 to vector<1x256xf32>
    %53 = arith.mulf %52, %47 : vector<1x256xf32>
    %54 = vector.broadcast %50 : f32 to vector<1x256xf32>
    %55 = arith.mulf %54, %48 : vector<1x256xf32>
    %56 = arith.addf %53, %55 : vector<1x256xf32>
    %57 = arith.mulf %56, %51 : vector<1x256xf32>
    %58 = arith.addf %46, %57 : vector<1x256xf32>
    %c48_i32 = arith.constant 48 : i32
    %59 = tpu.dynamic_rotate %19 by %c48_i32 dim 1 : vector<1x256xf32>, i32 -> vector<1x256xf32>
    %c48_i32_26 = arith.constant 48 : i32
    %60 = tpu.dynamic_rotate %21 by %c48_i32_26 dim 1 : vector<1x256xf32>, i32 -> vector<1x256xf32>
    %c3_27 = arith.constant 3 : index
    %61 = memref.load %arg3[%c3_27] : memref<98xf32, #tpu.memory_space<smem>>
    %c52 = arith.constant 52 : index
    %62 = memref.load %arg3[%c52] : memref<98xf32, #tpu.memory_space<smem>>
    %63 = arith.mulf %0, %10 : vector<1x256xf32>
    %64 = vector.broadcast %61 : f32 to vector<1x256xf32>
    %65 = arith.mulf %64, %59 : vector<1x256xf32>
    %66 = vector.broadcast %62 : f32 to vector<1x256xf32>
    %67 = arith.mulf %66, %60 : vector<1x256xf32>
    %68 = arith.addf %65, %67 : vector<1x256xf32>
    %69 = arith.mulf %68, %63 : vector<1x256xf32>
    %70 = arith.addf %58, %69 : vector<1x256xf32>
    %c47_i32 = arith.constant 47 : i32
    %71 = tpu.dynamic_rotate %19 by %c47_i32 dim 1 : vector<1x256xf32>, i32 -> vector<1x256xf32>
    %c47_i32_28 = arith.constant 47 : i32
    %72 = tpu.dynamic_rotate %21 by %c47_i32_28 dim 1 : vector<1x256xf32>, i32 -> vector<1x256xf32>
    %c4_29 = arith.constant 4 : index
    %73 = memref.load %arg3[%c4_29] : memref<98xf32, #tpu.memory_space<smem>>
    %c53 = arith.constant 53 : index
    %74 = memref.load %arg3[%c53] : memref<98xf32, #tpu.memory_space<smem>>
    %75 = arith.mulf %0, %11 : vector<1x256xf32>
    %76 = vector.broadcast %73 : f32 to vector<1x256xf32>
    %77 = arith.mulf %76, %71 : vector<1x256xf32>
    %78 = vector.broadcast %74 : f32 to vector<1x256xf32>
    %79 = arith.mulf %78, %72 : vector<1x256xf32>
    %80 = arith.addf %77, %79 : vector<1x256xf32>
    %81 = arith.mulf %80, %75 : vector<1x256xf32>
    %82 = arith.addf %70, %81 : vector<1x256xf32>
    %c46_i32 = arith.constant 46 : i32
    %83 = tpu.dynamic_rotate %19 by %c46_i32 dim 1 : vector<1x256xf32>, i32 -> vector<1x256xf32>
    %c46_i32_30 = arith.constant 46 : i32
    %84 = tpu.dynamic_rotate %21 by %c46_i32_30 dim 1 : vector<1x256xf32>, i32 -> vector<1x256xf32>
    %c5_31 = arith.constant 5 : index
    %85 = memref.load %arg3[%c5_31] : memref<98xf32, #tpu.memory_space<smem>>
    %c54 = arith.constant 54 : index
    %86 = memref.load %arg3[%c54] : memref<98xf32, #tpu.memory_space<smem>>
    %87 = arith.mulf %0, %12 : vector<1x256xf32>
    %88 = vector.broadcast %85 : f32 to vector<1x256xf32>
    %89 = arith.mulf %88, %83 : vector<1x256xf32>
    %90 = vector.broadcast %86 : f32 to vector<1x256xf32>
    %91 = arith.mulf %90, %84 : vector<1x256xf32>
    %92 = arith.addf %89, %91 : vector<1x256xf32>
    %93 = arith.mulf %92, %87 : vector<1x256xf32>
    %94 = arith.addf %82, %93 : vector<1x256xf32>
    %c45_i32 = arith.constant 45 : i32
    %95 = tpu.dynamic_rotate %19 by %c45_i32 dim 1 : vector<1x256xf32>, i32 -> vector<1x256xf32>
    %c45_i32_32 = arith.constant 45 : i32
    %96 = tpu.dynamic_rotate %21 by %c45_i32_32 dim 1 : vector<1x256xf32>, i32 -> vector<1x256xf32>
    %c6_33 = arith.constant 6 : index
    %97 = memref.load %arg3[%c6_33] : memref<98xf32, #tpu.memory_space<smem>>
    %c55 = arith.constant 55 : index
    %98 = memref.load %arg3[%c55] : memref<98xf32, #tpu.memory_space<smem>>
    %99 = arith.mulf %0, %13 : vector<1x256xf32>
    %100 = vector.broadcast %97 : f32 to vector<1x256xf32>
    %101 = arith.mulf %100, %95 : vector<1x256xf32>
    %102 = vector.broadcast %98 : f32 to vector<1x256xf32>
    %103 = arith.mulf %102, %96 : vector<1x256xf32>
    %104 = arith.addf %101, %103 : vector<1x256xf32>
    %105 = arith.mulf %104, %99 : vector<1x256xf32>
    %106 = arith.addf %94, %105 : vector<1x256xf32>
    %c35_i32 = arith.constant 35 : i32
    %107 = tpu.dynamic_rotate %19 by %c35_i32 dim 1 : vector<1x256xf32>, i32 -> vector<1x256xf32>
    %c35_i32_34 = arith.constant 35 : i32
    %108 = tpu.dynamic_rotate %21 by %c35_i32_34 dim 1 : vector<1x256xf32>, i32 -> vector<1x256xf32>
    %c7_35 = arith.constant 7 : index
    %109 = memref.load %arg3[%c7_35] : memref<98xf32, #tpu.memory_space<smem>>
    %c56 = arith.constant 56 : index
    %110 = memref.load %arg3[%c56] : memref<98xf32, #tpu.memory_space<smem>>
    %111 = arith.mulf %1, %7 : vector<1x256xf32>
    %112 = vector.broadcast %109 : f32 to vector<1x256xf32>
    %113 = arith.mulf %112, %107 : vector<1x256xf32>
    %114 = vector.broadcast %110 : f32 to vector<1x256xf32>
    %115 = arith.mulf %114, %108 : vector<1x256xf32>
    %116 = arith.addf %113, %115 : vector<1x256xf32>
    %117 = arith.mulf %116, %111 : vector<1x256xf32>
    %118 = arith.addf %106, %117 : vector<1x256xf32>
    %c34_i32 = arith.constant 34 : i32
    %119 = tpu.dynamic_rotate %19 by %c34_i32 dim 1 : vector<1x256xf32>, i32 -> vector<1x256xf32>
    %c34_i32_36 = arith.constant 34 : i32
    %120 = tpu.dynamic_rotate %21 by %c34_i32_36 dim 1 : vector<1x256xf32>, i32 -> vector<1x256xf32>
    %c8_37 = arith.constant 8 : index
    %121 = memref.load %arg3[%c8_37] : memref<98xf32, #tpu.memory_space<smem>>
    %c57 = arith.constant 57 : index
    %122 = memref.load %arg3[%c57] : memref<98xf32, #tpu.memory_space<smem>>
    %123 = arith.mulf %1, %8 : vector<1x256xf32>
    %124 = vector.broadcast %121 : f32 to vector<1x256xf32>
    %125 = arith.mulf %124, %119 : vector<1x256xf32>
    %126 = vector.broadcast %122 : f32 to vector<1x256xf32>
    %127 = arith.mulf %126, %120 : vector<1x256xf32>
    %128 = arith.addf %125, %127 : vector<1x256xf32>
    %129 = arith.mulf %128, %123 : vector<1x256xf32>
    %130 = arith.addf %118, %129 : vector<1x256xf32>
    %c33_i32 = arith.constant 33 : i32
    %131 = tpu.dynamic_rotate %19 by %c33_i32 dim 1 : vector<1x256xf32>, i32 -> vector<1x256xf32>
    %c33_i32_38 = arith.constant 33 : i32
    %132 = tpu.dynamic_rotate %21 by %c33_i32_38 dim 1 : vector<1x256xf32>, i32 -> vector<1x256xf32>
    %c9_39 = arith.constant 9 : index
    %133 = memref.load %arg3[%c9_39] : memref<98xf32, #tpu.memory_space<smem>>
    %c58 = arith.constant 58 : index
    %134 = memref.load %arg3[%c58] : memref<98xf32, #tpu.memory_space<smem>>
    %135 = arith.mulf %1, %9 : vector<1x256xf32>
    %136 = vector.broadcast %133 : f32 to vector<1x256xf32>
    %137 = arith.mulf %136, %131 : vector<1x256xf32>
    %138 = vector.broadcast %134 : f32 to vector<1x256xf32>
    %139 = arith.mulf %138, %132 : vector<1x256xf32>
    %140 = arith.addf %137, %139 : vector<1x256xf32>
    %141 = arith.mulf %140, %135 : vector<1x256xf32>
    %142 = arith.addf %130, %141 : vector<1x256xf32>
    %c32_i32 = arith.constant 32 : i32
    %143 = tpu.dynamic_rotate %19 by %c32_i32 dim 1 : vector<1x256xf32>, i32 -> vector<1x256xf32>
    %c32_i32_40 = arith.constant 32 : i32
    %144 = tpu.dynamic_rotate %21 by %c32_i32_40 dim 1 : vector<1x256xf32>, i32 -> vector<1x256xf32>
    %c10_41 = arith.constant 10 : index
    %145 = memref.load %arg3[%c10_41] : memref<98xf32, #tpu.memory_space<smem>>
    %c59 = arith.constant 59 : index
    %146 = memref.load %arg3[%c59] : memref<98xf32, #tpu.memory_space<smem>>
    %147 = arith.mulf %1, %10 : vector<1x256xf32>
    %148 = vector.broadcast %145 : f32 to vector<1x256xf32>
    %149 = arith.mulf %148, %143 : vector<1x256xf32>
    %150 = vector.broadcast %146 : f32 to vector<1x256xf32>
    %151 = arith.mulf %150, %144 : vector<1x256xf32>
    %152 = arith.addf %149, %151 : vector<1x256xf32>
    %153 = arith.mulf %152, %147 : vector<1x256xf32>
    %154 = arith.addf %142, %153 : vector<1x256xf32>
    %c31_i32 = arith.constant 31 : i32
    %155 = tpu.dynamic_rotate %19 by %c31_i32 dim 1 : vector<1x256xf32>, i32 -> vector<1x256xf32>
    %c31_i32_42 = arith.constant 31 : i32
    %156 = tpu.dynamic_rotate %21 by %c31_i32_42 dim 1 : vector<1x256xf32>, i32 -> vector<1x256xf32>
    %c11_43 = arith.constant 11 : index
    %157 = memref.load %arg3[%c11_43] : memref<98xf32, #tpu.memory_space<smem>>
    %c60 = arith.constant 60 : index
    %158 = memref.load %arg3[%c60] : memref<98xf32, #tpu.memory_space<smem>>
    %159 = arith.mulf %1, %11 : vector<1x256xf32>
    %160 = vector.broadcast %157 : f32 to vector<1x256xf32>
    %161 = arith.mulf %160, %155 : vector<1x256xf32>
    %162 = vector.broadcast %158 : f32 to vector<1x256xf32>
    %163 = arith.mulf %162, %156 : vector<1x256xf32>
    %164 = arith.addf %161, %163 : vector<1x256xf32>
    %165 = arith.mulf %164, %159 : vector<1x256xf32>
    %166 = arith.addf %154, %165 : vector<1x256xf32>
    %c30_i32 = arith.constant 30 : i32
    %167 = tpu.dynamic_rotate %19 by %c30_i32 dim 1 : vector<1x256xf32>, i32 -> vector<1x256xf32>
    %c30_i32_44 = arith.constant 30 : i32
    %168 = tpu.dynamic_rotate %21 by %c30_i32_44 dim 1 : vector<1x256xf32>, i32 -> vector<1x256xf32>
    %c12_45 = arith.constant 12 : index
    %169 = memref.load %arg3[%c12_45] : memref<98xf32, #tpu.memory_space<smem>>
    %c61 = arith.constant 61 : index
    %170 = memref.load %arg3[%c61] : memref<98xf32, #tpu.memory_space<smem>>
    %171 = arith.mulf %1, %12 : vector<1x256xf32>
    %172 = vector.broadcast %169 : f32 to vector<1x256xf32>
    %173 = arith.mulf %172, %167 : vector<1x256xf32>
    %174 = vector.broadcast %170 : f32 to vector<1x256xf32>
    %175 = arith.mulf %174, %168 : vector<1x256xf32>
    %176 = arith.addf %173, %175 : vector<1x256xf32>
    %177 = arith.mulf %176, %171 : vector<1x256xf32>
    %178 = arith.addf %166, %177 : vector<1x256xf32>
    %c29_i32 = arith.constant 29 : i32
    %179 = tpu.dynamic_rotate %19 by %c29_i32 dim 1 : vector<1x256xf32>, i32 -> vector<1x256xf32>
    %c29_i32_46 = arith.constant 29 : i32
    %180 = tpu.dynamic_rotate %21 by %c29_i32_46 dim 1 : vector<1x256xf32>, i32 -> vector<1x256xf32>
    %c13_47 = arith.constant 13 : index
    %181 = memref.load %arg3[%c13_47] : memref<98xf32, #tpu.memory_space<smem>>
    %c62 = arith.constant 62 : index
    %182 = memref.load %arg3[%c62] : memref<98xf32, #tpu.memory_space<smem>>
    %183 = arith.mulf %1, %13 : vector<1x256xf32>
    %184 = vector.broadcast %181 : f32 to vector<1x256xf32>
    %185 = arith.mulf %184, %179 : vector<1x256xf32>
    %186 = vector.broadcast %182 : f32 to vector<1x256xf32>
    %187 = arith.mulf %186, %180 : vector<1x256xf32>
    %188 = arith.addf %185, %187 : vector<1x256xf32>
    %189 = arith.mulf %188, %183 : vector<1x256xf32>
    %190 = arith.addf %178, %189 : vector<1x256xf32>
    %c19_i32 = arith.constant 19 : i32
    %191 = tpu.dynamic_rotate %19 by %c19_i32 dim 1 : vector<1x256xf32>, i32 -> vector<1x256xf32>
    %c19_i32_48 = arith.constant 19 : i32
    %192 = tpu.dynamic_rotate %21 by %c19_i32_48 dim 1 : vector<1x256xf32>, i32 -> vector<1x256xf32>
    %c14 = arith.constant 14 : index
    %193 = memref.load %arg3[%c14] : memref<98xf32, #tpu.memory_space<smem>>
    %c63 = arith.constant 63 : index
    %194 = memref.load %arg3[%c63] : memref<98xf32, #tpu.memory_space<smem>>
    %195 = arith.mulf %2, %7 : vector<1x256xf32>
    %196 = vector.broadcast %193 : f32 to vector<1x256xf32>
    %197 = arith.mulf %196, %191 : vector<1x256xf32>
    %198 = vector.broadcast %194 : f32 to vector<1x256xf32>
    %199 = arith.mulf %198, %192 : vector<1x256xf32>
    %200 = arith.addf %197, %199 : vector<1x256xf32>
    %201 = arith.mulf %200, %195 : vector<1x256xf32>
    %202 = arith.addf %190, %201 : vector<1x256xf32>
    %c18_i32 = arith.constant 18 : i32
    %203 = tpu.dynamic_rotate %19 by %c18_i32 dim 1 : vector<1x256xf32>, i32 -> vector<1x256xf32>
    %c18_i32_49 = arith.constant 18 : i32
    %204 = tpu.dynamic_rotate %21 by %c18_i32_49 dim 1 : vector<1x256xf32>, i32 -> vector<1x256xf32>
    %c15 = arith.constant 15 : index
    %205 = memref.load %arg3[%c15] : memref<98xf32, #tpu.memory_space<smem>>
    %c64 = arith.constant 64 : index
    %206 = memref.load %arg3[%c64] : memref<98xf32, #tpu.memory_space<smem>>
    %207 = arith.mulf %2, %8 : vector<1x256xf32>
    %208 = vector.broadcast %205 : f32 to vector<1x256xf32>
    %209 = arith.mulf %208, %203 : vector<1x256xf32>
    %210 = vector.broadcast %206 : f32 to vector<1x256xf32>
    %211 = arith.mulf %210, %204 : vector<1x256xf32>
    %212 = arith.addf %209, %211 : vector<1x256xf32>
    %213 = arith.mulf %212, %207 : vector<1x256xf32>
    %214 = arith.addf %202, %213 : vector<1x256xf32>
    %c17_i32 = arith.constant 17 : i32
    %215 = tpu.dynamic_rotate %19 by %c17_i32 dim 1 : vector<1x256xf32>, i32 -> vector<1x256xf32>
    %c17_i32_50 = arith.constant 17 : i32
    %216 = tpu.dynamic_rotate %21 by %c17_i32_50 dim 1 : vector<1x256xf32>, i32 -> vector<1x256xf32>
    %c16 = arith.constant 16 : index
    %217 = memref.load %arg3[%c16] : memref<98xf32, #tpu.memory_space<smem>>
    %c65 = arith.constant 65 : index
    %218 = memref.load %arg3[%c65] : memref<98xf32, #tpu.memory_space<smem>>
    %219 = arith.mulf %2, %9 : vector<1x256xf32>
    %220 = vector.broadcast %217 : f32 to vector<1x256xf32>
    %221 = arith.mulf %220, %215 : vector<1x256xf32>
    %222 = vector.broadcast %218 : f32 to vector<1x256xf32>
    %223 = arith.mulf %222, %216 : vector<1x256xf32>
    %224 = arith.addf %221, %223 : vector<1x256xf32>
    %225 = arith.mulf %224, %219 : vector<1x256xf32>
    %226 = arith.addf %214, %225 : vector<1x256xf32>
    %c16_i32 = arith.constant 16 : i32
    %227 = tpu.dynamic_rotate %19 by %c16_i32 dim 1 : vector<1x256xf32>, i32 -> vector<1x256xf32>
    %c16_i32_51 = arith.constant 16 : i32
    %228 = tpu.dynamic_rotate %21 by %c16_i32_51 dim 1 : vector<1x256xf32>, i32 -> vector<1x256xf32>
    %c17 = arith.constant 17 : index
    %229 = memref.load %arg3[%c17] : memref<98xf32, #tpu.memory_space<smem>>
    %c66 = arith.constant 66 : index
    %230 = memref.load %arg3[%c66] : memref<98xf32, #tpu.memory_space<smem>>
    %231 = arith.mulf %2, %10 : vector<1x256xf32>
    %232 = vector.broadcast %229 : f32 to vector<1x256xf32>
    %233 = arith.mulf %232, %227 : vector<1x256xf32>
    %234 = vector.broadcast %230 : f32 to vector<1x256xf32>
    %235 = arith.mulf %234, %228 : vector<1x256xf32>
    %236 = arith.addf %233, %235 : vector<1x256xf32>
    %237 = arith.mulf %236, %231 : vector<1x256xf32>
    %238 = arith.addf %226, %237 : vector<1x256xf32>
    %c15_i32 = arith.constant 15 : i32
    %239 = tpu.dynamic_rotate %19 by %c15_i32 dim 1 : vector<1x256xf32>, i32 -> vector<1x256xf32>
    %c15_i32_52 = arith.constant 15 : i32
    %240 = tpu.dynamic_rotate %21 by %c15_i32_52 dim 1 : vector<1x256xf32>, i32 -> vector<1x256xf32>
    %c18 = arith.constant 18 : index
    %241 = memref.load %arg3[%c18] : memref<98xf32, #tpu.memory_space<smem>>
    %c67 = arith.constant 67 : index
    %242 = memref.load %arg3[%c67] : memref<98xf32, #tpu.memory_space<smem>>
    %243 = arith.mulf %2, %11 : vector<1x256xf32>
    %244 = vector.broadcast %241 : f32 to vector<1x256xf32>
    %245 = arith.mulf %244, %239 : vector<1x256xf32>
    %246 = vector.broadcast %242 : f32 to vector<1x256xf32>
    %247 = arith.mulf %246, %240 : vector<1x256xf32>
    %248 = arith.addf %245, %247 : vector<1x256xf32>
    %249 = arith.mulf %248, %243 : vector<1x256xf32>
    %250 = arith.addf %238, %249 : vector<1x256xf32>
    %c14_i32 = arith.constant 14 : i32
    %251 = tpu.dynamic_rotate %19 by %c14_i32 dim 1 : vector<1x256xf32>, i32 -> vector<1x256xf32>
    %c14_i32_53 = arith.constant 14 : i32
    %252 = tpu.dynamic_rotate %21 by %c14_i32_53 dim 1 : vector<1x256xf32>, i32 -> vector<1x256xf32>
    %c19 = arith.constant 19 : index
    %253 = memref.load %arg3[%c19] : memref<98xf32, #tpu.memory_space<smem>>
    %c68 = arith.constant 68 : index
    %254 = memref.load %arg3[%c68] : memref<98xf32, #tpu.memory_space<smem>>
    %255 = arith.mulf %2, %12 : vector<1x256xf32>
    %256 = vector.broadcast %253 : f32 to vector<1x256xf32>
    %257 = arith.mulf %256, %251 : vector<1x256xf32>
    %258 = vector.broadcast %254 : f32 to vector<1x256xf32>
    %259 = arith.mulf %258, %252 : vector<1x256xf32>
    %260 = arith.addf %257, %259 : vector<1x256xf32>
    %261 = arith.mulf %260, %255 : vector<1x256xf32>
    %262 = arith.addf %250, %261 : vector<1x256xf32>
    %c13_i32 = arith.constant 13 : i32
    %263 = tpu.dynamic_rotate %19 by %c13_i32 dim 1 : vector<1x256xf32>, i32 -> vector<1x256xf32>
    %c13_i32_54 = arith.constant 13 : i32
    %264 = tpu.dynamic_rotate %21 by %c13_i32_54 dim 1 : vector<1x256xf32>, i32 -> vector<1x256xf32>
    %c20 = arith.constant 20 : index
    %265 = memref.load %arg3[%c20] : memref<98xf32, #tpu.memory_space<smem>>
    %c69 = arith.constant 69 : index
    %266 = memref.load %arg3[%c69] : memref<98xf32, #tpu.memory_space<smem>>
    %267 = arith.mulf %2, %13 : vector<1x256xf32>
    %268 = vector.broadcast %265 : f32 to vector<1x256xf32>
    %269 = arith.mulf %268, %263 : vector<1x256xf32>
    %270 = vector.broadcast %266 : f32 to vector<1x256xf32>
    %271 = arith.mulf %270, %264 : vector<1x256xf32>
    %272 = arith.addf %269, %271 : vector<1x256xf32>
    %273 = arith.mulf %272, %267 : vector<1x256xf32>
    %274 = arith.addf %262, %273 : vector<1x256xf32>
    %c3_i32 = arith.constant 3 : i32
    %275 = tpu.dynamic_rotate %19 by %c3_i32 dim 1 : vector<1x256xf32>, i32 -> vector<1x256xf32>
    %c3_i32_55 = arith.constant 3 : i32
    %276 = tpu.dynamic_rotate %21 by %c3_i32_55 dim 1 : vector<1x256xf32>, i32 -> vector<1x256xf32>
    %c21 = arith.constant 21 : index
    %277 = memref.load %arg3[%c21] : memref<98xf32, #tpu.memory_space<smem>>
    %c70 = arith.constant 70 : index
    %278 = memref.load %arg3[%c70] : memref<98xf32, #tpu.memory_space<smem>>
    %279 = arith.mulf %3, %7 : vector<1x256xf32>
    %280 = vector.broadcast %277 : f32 to vector<1x256xf32>
    %281 = arith.mulf %280, %275 : vector<1x256xf32>
    %282 = vector.broadcast %278 : f32 to vector<1x256xf32>
    %283 = arith.mulf %282, %276 : vector<1x256xf32>
    %284 = arith.addf %281, %283 : vector<1x256xf32>
    %285 = arith.mulf %284, %279 : vector<1x256xf32>
    %286 = arith.addf %274, %285 : vector<1x256xf32>
    %c2_i32 = arith.constant 2 : i32
    %287 = tpu.dynamic_rotate %19 by %c2_i32 dim 1 : vector<1x256xf32>, i32 -> vector<1x256xf32>
    %c2_i32_56 = arith.constant 2 : i32
    %288 = tpu.dynamic_rotate %21 by %c2_i32_56 dim 1 : vector<1x256xf32>, i32 -> vector<1x256xf32>
    %c22 = arith.constant 22 : index
    %289 = memref.load %arg3[%c22] : memref<98xf32, #tpu.memory_space<smem>>
    %c71 = arith.constant 71 : index
    %290 = memref.load %arg3[%c71] : memref<98xf32, #tpu.memory_space<smem>>
    %291 = arith.mulf %3, %8 : vector<1x256xf32>
    %292 = vector.broadcast %289 : f32 to vector<1x256xf32>
    %293 = arith.mulf %292, %287 : vector<1x256xf32>
    %294 = vector.broadcast %290 : f32 to vector<1x256xf32>
    %295 = arith.mulf %294, %288 : vector<1x256xf32>
    %296 = arith.addf %293, %295 : vector<1x256xf32>
    %297 = arith.mulf %296, %291 : vector<1x256xf32>
    %298 = arith.addf %286, %297 : vector<1x256xf32>
    %c1_i32 = arith.constant 1 : i32
    %299 = tpu.dynamic_rotate %19 by %c1_i32 dim 1 : vector<1x256xf32>, i32 -> vector<1x256xf32>
    %c1_i32_57 = arith.constant 1 : i32
    %300 = tpu.dynamic_rotate %21 by %c1_i32_57 dim 1 : vector<1x256xf32>, i32 -> vector<1x256xf32>
    %c23 = arith.constant 23 : index
    %301 = memref.load %arg3[%c23] : memref<98xf32, #tpu.memory_space<smem>>
    %c72 = arith.constant 72 : index
    %302 = memref.load %arg3[%c72] : memref<98xf32, #tpu.memory_space<smem>>
    %303 = arith.mulf %3, %9 : vector<1x256xf32>
    %304 = vector.broadcast %301 : f32 to vector<1x256xf32>
    %305 = arith.mulf %304, %299 : vector<1x256xf32>
    %306 = vector.broadcast %302 : f32 to vector<1x256xf32>
    %307 = arith.mulf %306, %300 : vector<1x256xf32>
    %308 = arith.addf %305, %307 : vector<1x256xf32>
    %309 = arith.mulf %308, %303 : vector<1x256xf32>
    %310 = arith.addf %298, %309 : vector<1x256xf32>
    %c24 = arith.constant 24 : index
    %311 = memref.load %arg3[%c24] : memref<98xf32, #tpu.memory_space<smem>>
    %c73 = arith.constant 73 : index
    %312 = memref.load %arg3[%c73] : memref<98xf32, #tpu.memory_space<smem>>
    %313 = arith.mulf %3, %10 : vector<1x256xf32>
    %314 = vector.broadcast %311 : f32 to vector<1x256xf32>
    %315 = arith.mulf %314, %19 : vector<1x256xf32>
    %316 = vector.broadcast %312 : f32 to vector<1x256xf32>
    %317 = arith.mulf %316, %21 : vector<1x256xf32>
    %318 = arith.addf %315, %317 : vector<1x256xf32>
    %319 = arith.mulf %318, %313 : vector<1x256xf32>
    %320 = arith.addf %310, %319 : vector<1x256xf32>
    %c255_i32 = arith.constant 255 : i32
    %321 = tpu.dynamic_rotate %19 by %c255_i32 dim 1 : vector<1x256xf32>, i32 -> vector<1x256xf32>
    %c255_i32_58 = arith.constant 255 : i32
    %322 = tpu.dynamic_rotate %21 by %c255_i32_58 dim 1 : vector<1x256xf32>, i32 -> vector<1x256xf32>
    %c25 = arith.constant 25 : index
    %323 = memref.load %arg3[%c25] : memref<98xf32, #tpu.memory_space<smem>>
    %c74 = arith.constant 74 : index
    %324 = memref.load %arg3[%c74] : memref<98xf32, #tpu.memory_space<smem>>
    %325 = arith.mulf %3, %11 : vector<1x256xf32>
    %326 = vector.broadcast %323 : f32 to vector<1x256xf32>
    %327 = arith.mulf %326, %321 : vector<1x256xf32>
    %328 = vector.broadcast %324 : f32 to vector<1x256xf32>
    %329 = arith.mulf %328, %322 : vector<1x256xf32>
    %330 = arith.addf %327, %329 : vector<1x256xf32>
    %331 = arith.mulf %330, %325 : vector<1x256xf32>
    %332 = arith.addf %320, %331 : vector<1x256xf32>
    %c254_i32 = arith.constant 254 : i32
    %333 = tpu.dynamic_rotate %19 by %c254_i32 dim 1 : vector<1x256xf32>, i32 -> vector<1x256xf32>
    %c254_i32_59 = arith.constant 254 : i32
    %334 = tpu.dynamic_rotate %21 by %c254_i32_59 dim 1 : vector<1x256xf32>, i32 -> vector<1x256xf32>
    %c26 = arith.constant 26 : index
    %335 = memref.load %arg3[%c26] : memref<98xf32, #tpu.memory_space<smem>>
    %c75 = arith.constant 75 : index
    %336 = memref.load %arg3[%c75] : memref<98xf32, #tpu.memory_space<smem>>
    %337 = arith.mulf %3, %12 : vector<1x256xf32>
    %338 = vector.broadcast %335 : f32 to vector<1x256xf32>
    %339 = arith.mulf %338, %333 : vector<1x256xf32>
    %340 = vector.broadcast %336 : f32 to vector<1x256xf32>
    %341 = arith.mulf %340, %334 : vector<1x256xf32>
    %342 = arith.addf %339, %341 : vector<1x256xf32>
    %343 = arith.mulf %342, %337 : vector<1x256xf32>
    %344 = arith.addf %332, %343 : vector<1x256xf32>
    %c253_i32 = arith.constant 253 : i32
    %345 = tpu.dynamic_rotate %19 by %c253_i32 dim 1 : vector<1x256xf32>, i32 -> vector<1x256xf32>
    %c253_i32_60 = arith.constant 253 : i32
    %346 = tpu.dynamic_rotate %21 by %c253_i32_60 dim 1 : vector<1x256xf32>, i32 -> vector<1x256xf32>
    %c27 = arith.constant 27 : index
    %347 = memref.load %arg3[%c27] : memref<98xf32, #tpu.memory_space<smem>>
    %c76 = arith.constant 76 : index
    %348 = memref.load %arg3[%c76] : memref<98xf32, #tpu.memory_space<smem>>
    %349 = arith.mulf %3, %13 : vector<1x256xf32>
    %350 = vector.broadcast %347 : f32 to vector<1x256xf32>
    %351 = arith.mulf %350, %345 : vector<1x256xf32>
    %352 = vector.broadcast %348 : f32 to vector<1x256xf32>
    %353 = arith.mulf %352, %346 : vector<1x256xf32>
    %354 = arith.addf %351, %353 : vector<1x256xf32>
    %355 = arith.mulf %354, %349 : vector<1x256xf32>
    %356 = arith.addf %344, %355 : vector<1x256xf32>
    %c243_i32 = arith.constant 243 : i32
    %357 = tpu.dynamic_rotate %19 by %c243_i32 dim 1 : vector<1x256xf32>, i32 -> vector<1x256xf32>
    %c243_i32_61 = arith.constant 243 : i32
    %358 = tpu.dynamic_rotate %21 by %c243_i32_61 dim 1 : vector<1x256xf32>, i32 -> vector<1x256xf32>
    %c28 = arith.constant 28 : index
    %359 = memref.load %arg3[%c28] : memref<98xf32, #tpu.memory_space<smem>>
    %c77 = arith.constant 77 : index
    %360 = memref.load %arg3[%c77] : memref<98xf32, #tpu.memory_space<smem>>
    %361 = arith.mulf %4, %7 : vector<1x256xf32>
    %362 = vector.broadcast %359 : f32 to vector<1x256xf32>
    %363 = arith.mulf %362, %357 : vector<1x256xf32>
    %364 = vector.broadcast %360 : f32 to vector<1x256xf32>
    %365 = arith.mulf %364, %358 : vector<1x256xf32>
    %366 = arith.addf %363, %365 : vector<1x256xf32>
    %367 = arith.mulf %366, %361 : vector<1x256xf32>
    %368 = arith.addf %356, %367 : vector<1x256xf32>
    %c242_i32 = arith.constant 242 : i32
    %369 = tpu.dynamic_rotate %19 by %c242_i32 dim 1 : vector<1x256xf32>, i32 -> vector<1x256xf32>
    %c242_i32_62 = arith.constant 242 : i32
    %370 = tpu.dynamic_rotate %21 by %c242_i32_62 dim 1 : vector<1x256xf32>, i32 -> vector<1x256xf32>
    %c29 = arith.constant 29 : index
    %371 = memref.load %arg3[%c29] : memref<98xf32, #tpu.memory_space<smem>>
    %c78 = arith.constant 78 : index
    %372 = memref.load %arg3[%c78] : memref<98xf32, #tpu.memory_space<smem>>
    %373 = arith.mulf %4, %8 : vector<1x256xf32>
    %374 = vector.broadcast %371 : f32 to vector<1x256xf32>
    %375 = arith.mulf %374, %369 : vector<1x256xf32>
    %376 = vector.broadcast %372 : f32 to vector<1x256xf32>
    %377 = arith.mulf %376, %370 : vector<1x256xf32>
    %378 = arith.addf %375, %377 : vector<1x256xf32>
    %379 = arith.mulf %378, %373 : vector<1x256xf32>
    %380 = arith.addf %368, %379 : vector<1x256xf32>
    %c241_i32 = arith.constant 241 : i32
    %381 = tpu.dynamic_rotate %19 by %c241_i32 dim 1 : vector<1x256xf32>, i32 -> vector<1x256xf32>
    %c241_i32_63 = arith.constant 241 : i32
    %382 = tpu.dynamic_rotate %21 by %c241_i32_63 dim 1 : vector<1x256xf32>, i32 -> vector<1x256xf32>
    %c30 = arith.constant 30 : index
    %383 = memref.load %arg3[%c30] : memref<98xf32, #tpu.memory_space<smem>>
    %c79 = arith.constant 79 : index
    %384 = memref.load %arg3[%c79] : memref<98xf32, #tpu.memory_space<smem>>
    %385 = arith.mulf %4, %9 : vector<1x256xf32>
    %386 = vector.broadcast %383 : f32 to vector<1x256xf32>
    %387 = arith.mulf %386, %381 : vector<1x256xf32>
    %388 = vector.broadcast %384 : f32 to vector<1x256xf32>
    %389 = arith.mulf %388, %382 : vector<1x256xf32>
    %390 = arith.addf %387, %389 : vector<1x256xf32>
    %391 = arith.mulf %390, %385 : vector<1x256xf32>
    %392 = arith.addf %380, %391 : vector<1x256xf32>
    %c240_i32 = arith.constant 240 : i32
    %393 = tpu.dynamic_rotate %19 by %c240_i32 dim 1 : vector<1x256xf32>, i32 -> vector<1x256xf32>
    %c240_i32_64 = arith.constant 240 : i32
    %394 = tpu.dynamic_rotate %21 by %c240_i32_64 dim 1 : vector<1x256xf32>, i32 -> vector<1x256xf32>
    %c31 = arith.constant 31 : index
    %395 = memref.load %arg3[%c31] : memref<98xf32, #tpu.memory_space<smem>>
    %c80 = arith.constant 80 : index
    %396 = memref.load %arg3[%c80] : memref<98xf32, #tpu.memory_space<smem>>
    %397 = arith.mulf %4, %10 : vector<1x256xf32>
    %398 = vector.broadcast %395 : f32 to vector<1x256xf32>
    %399 = arith.mulf %398, %393 : vector<1x256xf32>
    %400 = vector.broadcast %396 : f32 to vector<1x256xf32>
    %401 = arith.mulf %400, %394 : vector<1x256xf32>
    %402 = arith.addf %399, %401 : vector<1x256xf32>
    %403 = arith.mulf %402, %397 : vector<1x256xf32>
    %404 = arith.addf %392, %403 : vector<1x256xf32>
    %c239_i32 = arith.constant 239 : i32
    %405 = tpu.dynamic_rotate %19 by %c239_i32 dim 1 : vector<1x256xf32>, i32 -> vector<1x256xf32>
    %c239_i32_65 = arith.constant 239 : i32
    %406 = tpu.dynamic_rotate %21 by %c239_i32_65 dim 1 : vector<1x256xf32>, i32 -> vector<1x256xf32>
    %c32 = arith.constant 32 : index
    %407 = memref.load %arg3[%c32] : memref<98xf32, #tpu.memory_space<smem>>
    %c81 = arith.constant 81 : index
    %408 = memref.load %arg3[%c81] : memref<98xf32, #tpu.memory_space<smem>>
    %409 = arith.mulf %4, %11 : vector<1x256xf32>
    %410 = vector.broadcast %407 : f32 to vector<1x256xf32>
    %411 = arith.mulf %410, %405 : vector<1x256xf32>
    %412 = vector.broadcast %408 : f32 to vector<1x256xf32>
    %413 = arith.mulf %412, %406 : vector<1x256xf32>
    %414 = arith.addf %411, %413 : vector<1x256xf32>
    %415 = arith.mulf %414, %409 : vector<1x256xf32>
    %416 = arith.addf %404, %415 : vector<1x256xf32>
    %c238_i32 = arith.constant 238 : i32
    %417 = tpu.dynamic_rotate %19 by %c238_i32 dim 1 : vector<1x256xf32>, i32 -> vector<1x256xf32>
    %c238_i32_66 = arith.constant 238 : i32
    %418 = tpu.dynamic_rotate %21 by %c238_i32_66 dim 1 : vector<1x256xf32>, i32 -> vector<1x256xf32>
    %c33 = arith.constant 33 : index
    %419 = memref.load %arg3[%c33] : memref<98xf32, #tpu.memory_space<smem>>
    %c82 = arith.constant 82 : index
    %420 = memref.load %arg3[%c82] : memref<98xf32, #tpu.memory_space<smem>>
    %421 = arith.mulf %4, %12 : vector<1x256xf32>
    %422 = vector.broadcast %419 : f32 to vector<1x256xf32>
    %423 = arith.mulf %422, %417 : vector<1x256xf32>
    %424 = vector.broadcast %420 : f32 to vector<1x256xf32>
    %425 = arith.mulf %424, %418 : vector<1x256xf32>
    %426 = arith.addf %423, %425 : vector<1x256xf32>
    %427 = arith.mulf %426, %421 : vector<1x256xf32>
    %428 = arith.addf %416, %427 : vector<1x256xf32>
    %c237_i32 = arith.constant 237 : i32
    %429 = tpu.dynamic_rotate %19 by %c237_i32 dim 1 : vector<1x256xf32>, i32 -> vector<1x256xf32>
    %c237_i32_67 = arith.constant 237 : i32
    %430 = tpu.dynamic_rotate %21 by %c237_i32_67 dim 1 : vector<1x256xf32>, i32 -> vector<1x256xf32>
    %c34 = arith.constant 34 : index
    %431 = memref.load %arg3[%c34] : memref<98xf32, #tpu.memory_space<smem>>
    %c83 = arith.constant 83 : index
    %432 = memref.load %arg3[%c83] : memref<98xf32, #tpu.memory_space<smem>>
    %433 = arith.mulf %4, %13 : vector<1x256xf32>
    %434 = vector.broadcast %431 : f32 to vector<1x256xf32>
    %435 = arith.mulf %434, %429 : vector<1x256xf32>
    %436 = vector.broadcast %432 : f32 to vector<1x256xf32>
    %437 = arith.mulf %436, %430 : vector<1x256xf32>
    %438 = arith.addf %435, %437 : vector<1x256xf32>
    %439 = arith.mulf %438, %433 : vector<1x256xf32>
    %440 = arith.addf %428, %439 : vector<1x256xf32>
    %c227_i32 = arith.constant 227 : i32
    %441 = tpu.dynamic_rotate %19 by %c227_i32 dim 1 : vector<1x256xf32>, i32 -> vector<1x256xf32>
    %c227_i32_68 = arith.constant 227 : i32
    %442 = tpu.dynamic_rotate %21 by %c227_i32_68 dim 1 : vector<1x256xf32>, i32 -> vector<1x256xf32>
    %c35 = arith.constant 35 : index
    %443 = memref.load %arg3[%c35] : memref<98xf32, #tpu.memory_space<smem>>
    %c84 = arith.constant 84 : index
    %444 = memref.load %arg3[%c84] : memref<98xf32, #tpu.memory_space<smem>>
    %445 = arith.mulf %5, %7 : vector<1x256xf32>
    %446 = vector.broadcast %443 : f32 to vector<1x256xf32>
    %447 = arith.mulf %446, %441 : vector<1x256xf32>
    %448 = vector.broadcast %444 : f32 to vector<1x256xf32>
    %449 = arith.mulf %448, %442 : vector<1x256xf32>
    %450 = arith.addf %447, %449 : vector<1x256xf32>
    %451 = arith.mulf %450, %445 : vector<1x256xf32>
    %452 = arith.addf %440, %451 : vector<1x256xf32>
    %c226_i32 = arith.constant 226 : i32
    %453 = tpu.dynamic_rotate %19 by %c226_i32 dim 1 : vector<1x256xf32>, i32 -> vector<1x256xf32>
    %c226_i32_69 = arith.constant 226 : i32
    %454 = tpu.dynamic_rotate %21 by %c226_i32_69 dim 1 : vector<1x256xf32>, i32 -> vector<1x256xf32>
    %c36 = arith.constant 36 : index
    %455 = memref.load %arg3[%c36] : memref<98xf32, #tpu.memory_space<smem>>
    %c85 = arith.constant 85 : index
    %456 = memref.load %arg3[%c85] : memref<98xf32, #tpu.memory_space<smem>>
    %457 = arith.mulf %5, %8 : vector<1x256xf32>
    %458 = vector.broadcast %455 : f32 to vector<1x256xf32>
    %459 = arith.mulf %458, %453 : vector<1x256xf32>
    %460 = vector.broadcast %456 : f32 to vector<1x256xf32>
    %461 = arith.mulf %460, %454 : vector<1x256xf32>
    %462 = arith.addf %459, %461 : vector<1x256xf32>
    %463 = arith.mulf %462, %457 : vector<1x256xf32>
    %464 = arith.addf %452, %463 : vector<1x256xf32>
    %c225_i32 = arith.constant 225 : i32
    %465 = tpu.dynamic_rotate %19 by %c225_i32 dim 1 : vector<1x256xf32>, i32 -> vector<1x256xf32>
    %c225_i32_70 = arith.constant 225 : i32
    %466 = tpu.dynamic_rotate %21 by %c225_i32_70 dim 1 : vector<1x256xf32>, i32 -> vector<1x256xf32>
    %c37 = arith.constant 37 : index
    %467 = memref.load %arg3[%c37] : memref<98xf32, #tpu.memory_space<smem>>
    %c86 = arith.constant 86 : index
    %468 = memref.load %arg3[%c86] : memref<98xf32, #tpu.memory_space<smem>>
    %469 = arith.mulf %5, %9 : vector<1x256xf32>
    %470 = vector.broadcast %467 : f32 to vector<1x256xf32>
    %471 = arith.mulf %470, %465 : vector<1x256xf32>
    %472 = vector.broadcast %468 : f32 to vector<1x256xf32>
    %473 = arith.mulf %472, %466 : vector<1x256xf32>
    %474 = arith.addf %471, %473 : vector<1x256xf32>
    %475 = arith.mulf %474, %469 : vector<1x256xf32>
    %476 = arith.addf %464, %475 : vector<1x256xf32>
    %c224_i32 = arith.constant 224 : i32
    %477 = tpu.dynamic_rotate %19 by %c224_i32 dim 1 : vector<1x256xf32>, i32 -> vector<1x256xf32>
    %c224_i32_71 = arith.constant 224 : i32
    %478 = tpu.dynamic_rotate %21 by %c224_i32_71 dim 1 : vector<1x256xf32>, i32 -> vector<1x256xf32>
    %c38 = arith.constant 38 : index
    %479 = memref.load %arg3[%c38] : memref<98xf32, #tpu.memory_space<smem>>
    %c87 = arith.constant 87 : index
    %480 = memref.load %arg3[%c87] : memref<98xf32, #tpu.memory_space<smem>>
    %481 = arith.mulf %5, %10 : vector<1x256xf32>
    %482 = vector.broadcast %479 : f32 to vector<1x256xf32>
    %483 = arith.mulf %482, %477 : vector<1x256xf32>
    %484 = vector.broadcast %480 : f32 to vector<1x256xf32>
    %485 = arith.mulf %484, %478 : vector<1x256xf32>
    %486 = arith.addf %483, %485 : vector<1x256xf32>
    %487 = arith.mulf %486, %481 : vector<1x256xf32>
    %488 = arith.addf %476, %487 : vector<1x256xf32>
    %c223_i32 = arith.constant 223 : i32
    %489 = tpu.dynamic_rotate %19 by %c223_i32 dim 1 : vector<1x256xf32>, i32 -> vector<1x256xf32>
    %c223_i32_72 = arith.constant 223 : i32
    %490 = tpu.dynamic_rotate %21 by %c223_i32_72 dim 1 : vector<1x256xf32>, i32 -> vector<1x256xf32>
    %c39 = arith.constant 39 : index
    %491 = memref.load %arg3[%c39] : memref<98xf32, #tpu.memory_space<smem>>
    %c88 = arith.constant 88 : index
    %492 = memref.load %arg3[%c88] : memref<98xf32, #tpu.memory_space<smem>>
    %493 = arith.mulf %5, %11 : vector<1x256xf32>
    %494 = vector.broadcast %491 : f32 to vector<1x256xf32>
    %495 = arith.mulf %494, %489 : vector<1x256xf32>
    %496 = vector.broadcast %492 : f32 to vector<1x256xf32>
    %497 = arith.mulf %496, %490 : vector<1x256xf32>
    %498 = arith.addf %495, %497 : vector<1x256xf32>
    %499 = arith.mulf %498, %493 : vector<1x256xf32>
    %500 = arith.addf %488, %499 : vector<1x256xf32>
    %c222_i32 = arith.constant 222 : i32
    %501 = tpu.dynamic_rotate %19 by %c222_i32 dim 1 : vector<1x256xf32>, i32 -> vector<1x256xf32>
    %c222_i32_73 = arith.constant 222 : i32
    %502 = tpu.dynamic_rotate %21 by %c222_i32_73 dim 1 : vector<1x256xf32>, i32 -> vector<1x256xf32>
    %c40 = arith.constant 40 : index
    %503 = memref.load %arg3[%c40] : memref<98xf32, #tpu.memory_space<smem>>
    %c89 = arith.constant 89 : index
    %504 = memref.load %arg3[%c89] : memref<98xf32, #tpu.memory_space<smem>>
    %505 = arith.mulf %5, %12 : vector<1x256xf32>
    %506 = vector.broadcast %503 : f32 to vector<1x256xf32>
    %507 = arith.mulf %506, %501 : vector<1x256xf32>
    %508 = vector.broadcast %504 : f32 to vector<1x256xf32>
    %509 = arith.mulf %508, %502 : vector<1x256xf32>
    %510 = arith.addf %507, %509 : vector<1x256xf32>
    %511 = arith.mulf %510, %505 : vector<1x256xf32>
    %512 = arith.addf %500, %511 : vector<1x256xf32>
    %c221_i32 = arith.constant 221 : i32
    %513 = tpu.dynamic_rotate %19 by %c221_i32 dim 1 : vector<1x256xf32>, i32 -> vector<1x256xf32>
    %c221_i32_74 = arith.constant 221 : i32
    %514 = tpu.dynamic_rotate %21 by %c221_i32_74 dim 1 : vector<1x256xf32>, i32 -> vector<1x256xf32>
    %c41 = arith.constant 41 : index
    %515 = memref.load %arg3[%c41] : memref<98xf32, #tpu.memory_space<smem>>
    %c90 = arith.constant 90 : index
    %516 = memref.load %arg3[%c90] : memref<98xf32, #tpu.memory_space<smem>>
    %517 = arith.mulf %5, %13 : vector<1x256xf32>
    %518 = vector.broadcast %515 : f32 to vector<1x256xf32>
    %519 = arith.mulf %518, %513 : vector<1x256xf32>
    %520 = vector.broadcast %516 : f32 to vector<1x256xf32>
    %521 = arith.mulf %520, %514 : vector<1x256xf32>
    %522 = arith.addf %519, %521 : vector<1x256xf32>
    %523 = arith.mulf %522, %517 : vector<1x256xf32>
    %524 = arith.addf %512, %523 : vector<1x256xf32>
    %c211_i32 = arith.constant 211 : i32
    %525 = tpu.dynamic_rotate %19 by %c211_i32 dim 1 : vector<1x256xf32>, i32 -> vector<1x256xf32>
    %c211_i32_75 = arith.constant 211 : i32
    %526 = tpu.dynamic_rotate %21 by %c211_i32_75 dim 1 : vector<1x256xf32>, i32 -> vector<1x256xf32>
    %c42 = arith.constant 42 : index
    %527 = memref.load %arg3[%c42] : memref<98xf32, #tpu.memory_space<smem>>
    %c91 = arith.constant 91 : index
    %528 = memref.load %arg3[%c91] : memref<98xf32, #tpu.memory_space<smem>>
    %529 = arith.mulf %6, %7 : vector<1x256xf32>
    %530 = vector.broadcast %527 : f32 to vector<1x256xf32>
    %531 = arith.mulf %530, %525 : vector<1x256xf32>
    %532 = vector.broadcast %528 : f32 to vector<1x256xf32>
    %533 = arith.mulf %532, %526 : vector<1x256xf32>
    %534 = arith.addf %531, %533 : vector<1x256xf32>
    %535 = arith.mulf %534, %529 : vector<1x256xf32>
    %536 = arith.addf %524, %535 : vector<1x256xf32>
    %c210_i32 = arith.constant 210 : i32
    %537 = tpu.dynamic_rotate %19 by %c210_i32 dim 1 : vector<1x256xf32>, i32 -> vector<1x256xf32>
    %c210_i32_76 = arith.constant 210 : i32
    %538 = tpu.dynamic_rotate %21 by %c210_i32_76 dim 1 : vector<1x256xf32>, i32 -> vector<1x256xf32>
    %c43 = arith.constant 43 : index
    %539 = memref.load %arg3[%c43] : memref<98xf32, #tpu.memory_space<smem>>
    %c92 = arith.constant 92 : index
    %540 = memref.load %arg3[%c92] : memref<98xf32, #tpu.memory_space<smem>>
    %541 = arith.mulf %6, %8 : vector<1x256xf32>
    %542 = vector.broadcast %539 : f32 to vector<1x256xf32>
    %543 = arith.mulf %542, %537 : vector<1x256xf32>
    %544 = vector.broadcast %540 : f32 to vector<1x256xf32>
    %545 = arith.mulf %544, %538 : vector<1x256xf32>
    %546 = arith.addf %543, %545 : vector<1x256xf32>
    %547 = arith.mulf %546, %541 : vector<1x256xf32>
    %548 = arith.addf %536, %547 : vector<1x256xf32>
    %c209_i32 = arith.constant 209 : i32
    %549 = tpu.dynamic_rotate %19 by %c209_i32 dim 1 : vector<1x256xf32>, i32 -> vector<1x256xf32>
    %c209_i32_77 = arith.constant 209 : i32
    %550 = tpu.dynamic_rotate %21 by %c209_i32_77 dim 1 : vector<1x256xf32>, i32 -> vector<1x256xf32>
    %c44 = arith.constant 44 : index
    %551 = memref.load %arg3[%c44] : memref<98xf32, #tpu.memory_space<smem>>
    %c93 = arith.constant 93 : index
    %552 = memref.load %arg3[%c93] : memref<98xf32, #tpu.memory_space<smem>>
    %553 = arith.mulf %6, %9 : vector<1x256xf32>
    %554 = vector.broadcast %551 : f32 to vector<1x256xf32>
    %555 = arith.mulf %554, %549 : vector<1x256xf32>
    %556 = vector.broadcast %552 : f32 to vector<1x256xf32>
    %557 = arith.mulf %556, %550 : vector<1x256xf32>
    %558 = arith.addf %555, %557 : vector<1x256xf32>
    %559 = arith.mulf %558, %553 : vector<1x256xf32>
    %560 = arith.addf %548, %559 : vector<1x256xf32>
    %c208_i32 = arith.constant 208 : i32
    %561 = tpu.dynamic_rotate %19 by %c208_i32 dim 1 : vector<1x256xf32>, i32 -> vector<1x256xf32>
    %c208_i32_78 = arith.constant 208 : i32
    %562 = tpu.dynamic_rotate %21 by %c208_i32_78 dim 1 : vector<1x256xf32>, i32 -> vector<1x256xf32>
    %c45 = arith.constant 45 : index
    %563 = memref.load %arg3[%c45] : memref<98xf32, #tpu.memory_space<smem>>
    %c94 = arith.constant 94 : index
    %564 = memref.load %arg3[%c94] : memref<98xf32, #tpu.memory_space<smem>>
    %565 = arith.mulf %6, %10 : vector<1x256xf32>
    %566 = vector.broadcast %563 : f32 to vector<1x256xf32>
    %567 = arith.mulf %566, %561 : vector<1x256xf32>
    %568 = vector.broadcast %564 : f32 to vector<1x256xf32>
    %569 = arith.mulf %568, %562 : vector<1x256xf32>
    %570 = arith.addf %567, %569 : vector<1x256xf32>
    %571 = arith.mulf %570, %565 : vector<1x256xf32>
    %572 = arith.addf %560, %571 : vector<1x256xf32>
    %c207_i32 = arith.constant 207 : i32
    %573 = tpu.dynamic_rotate %19 by %c207_i32 dim 1 : vector<1x256xf32>, i32 -> vector<1x256xf32>
    %c207_i32_79 = arith.constant 207 : i32
    %574 = tpu.dynamic_rotate %21 by %c207_i32_79 dim 1 : vector<1x256xf32>, i32 -> vector<1x256xf32>
    %c46 = arith.constant 46 : index
    %575 = memref.load %arg3[%c46] : memref<98xf32, #tpu.memory_space<smem>>
    %c95 = arith.constant 95 : index
    %576 = memref.load %arg3[%c95] : memref<98xf32, #tpu.memory_space<smem>>
    %577 = arith.mulf %6, %11 : vector<1x256xf32>
    %578 = vector.broadcast %575 : f32 to vector<1x256xf32>
    %579 = arith.mulf %578, %573 : vector<1x256xf32>
    %580 = vector.broadcast %576 : f32 to vector<1x256xf32>
    %581 = arith.mulf %580, %574 : vector<1x256xf32>
    %582 = arith.addf %579, %581 : vector<1x256xf32>
    %583 = arith.mulf %582, %577 : vector<1x256xf32>
    %584 = arith.addf %572, %583 : vector<1x256xf32>
    %c206_i32 = arith.constant 206 : i32
    %585 = tpu.dynamic_rotate %19 by %c206_i32 dim 1 : vector<1x256xf32>, i32 -> vector<1x256xf32>
    %c206_i32_80 = arith.constant 206 : i32
    %586 = tpu.dynamic_rotate %21 by %c206_i32_80 dim 1 : vector<1x256xf32>, i32 -> vector<1x256xf32>
    %c47 = arith.constant 47 : index
    %587 = memref.load %arg3[%c47] : memref<98xf32, #tpu.memory_space<smem>>
    %c96 = arith.constant 96 : index
    %588 = memref.load %arg3[%c96] : memref<98xf32, #tpu.memory_space<smem>>
    %589 = arith.mulf %6, %12 : vector<1x256xf32>
    %590 = vector.broadcast %587 : f32 to vector<1x256xf32>
    %591 = arith.mulf %590, %585 : vector<1x256xf32>
    %592 = vector.broadcast %588 : f32 to vector<1x256xf32>
    %593 = arith.mulf %592, %586 : vector<1x256xf32>
    %594 = arith.addf %591, %593 : vector<1x256xf32>
    %595 = arith.mulf %594, %589 : vector<1x256xf32>
    %596 = arith.addf %584, %595 : vector<1x256xf32>
    %c205_i32 = arith.constant 205 : i32
    %597 = tpu.dynamic_rotate %19 by %c205_i32 dim 1 : vector<1x256xf32>, i32 -> vector<1x256xf32>
    %c205_i32_81 = arith.constant 205 : i32
    %598 = tpu.dynamic_rotate %21 by %c205_i32_81 dim 1 : vector<1x256xf32>, i32 -> vector<1x256xf32>
    %c48 = arith.constant 48 : index
    %599 = memref.load %arg3[%c48] : memref<98xf32, #tpu.memory_space<smem>>
    %c97 = arith.constant 97 : index
    %600 = memref.load %arg3[%c97] : memref<98xf32, #tpu.memory_space<smem>>
    %601 = arith.mulf %6, %13 : vector<1x256xf32>
    %602 = vector.broadcast %599 : f32 to vector<1x256xf32>
    %603 = arith.mulf %602, %597 : vector<1x256xf32>
    %604 = vector.broadcast %600 : f32 to vector<1x256xf32>
    %605 = arith.mulf %604, %598 : vector<1x256xf32>
    %606 = arith.addf %603, %605 : vector<1x256xf32>
    %607 = arith.mulf %606, %601 : vector<1x256xf32>
    %608 = arith.addf %596, %607 : vector<1x256xf32>
    %609 = arith.negf %608 : vector<1x256xf32>
    %610 = math.exp %609 : vector<1x256xf32>
    %cst_82 = arith.constant 1.000000e+00 : f32
    %611 = vector.broadcast %cst_82 : f32 to vector<1x256xf32>
    %612 = arith.addf %611, %610 : vector<1x256xf32>
    %613 = arith.divf %611, %612 : vector<1x256xf32>
    %614 = vector.broadcast %613 : vector<1x256xf32> to vector<4x256xf32>
    %615 = arith.mulf %614, %15 : vector<4x256xf32>
    %c0_83 = arith.constant 0 : index
    %c0_84 = arith.constant 0 : index
    %c0_85 = arith.constant 0 : index
    %616 = vector.load %arg4[%c0_83, %c0_84, %c0_85] : memref<1x4x256xf32, #tpu.memory_space<vmem>>, vector<1x4x256xf32>
    %617 = vector.shape_cast %616 : vector<1x4x256xf32> to vector<4x256xf32>
    %618 = vector.shape_cast %615 : vector<4x256xf32> to vector<1x4x256xf32>
    tpu.vector_store %arg4[%c0_83, %c0_84, %c0_85], %618 {strides = array<i32>} : memref<1x4x256xf32, #tpu.memory_space<vmem>>, vector<1x4x256xf32>,
    return
  }
  func.func @transform_0(%arg0: i32) -> (i32, i32, i32) {
    %c0_i32 = arith.constant 0 : i32
    %c0_i32_0 = arith.constant 0 : i32
    %c0_i32_1 = arith.constant 0 : i32
    return %arg0, %c0_i32, %c0_i32_0 : i32, i32, i32
  }
  func.func @transform_1(%arg0: i32) -> (i32, i32) {
    %c0_i32 = arith.constant 0 : i32
    %c0_i32_0 = arith.constant 0 : i32
    %c0_i32_1 = arith.constant 0 : i32
    return %c0_i32, %c0_i32_0 : i32, i32
  }
  func.func @transform_2(%arg0: i32) -> i32 {
    %c0_i32 = arith.constant 0 : i32
    %c0_i32_0 = arith.constant 0 : i32
    return %c0_i32 : i32
  }
  func.func @transform_3(%arg0: i32) -> (i32, i32, i32) {
    %c0_i32 = arith.constant 0 : i32
    %c0_i32_0 = arith.constant 0 : i32
    %c0_i32_1 = arith.constant 0 : i32
    return %arg0, %c0_i32, %c0_i32_0 : i32, i32, i32
  }
}

</mosaic_0001>

<bundles_post_ra>
// kernel: tpu_custom_call.1
= control target key start
LH: loop header
LB: loop body
LE: loop exit
PB: predicated region body
PF: predicated region fallthrough
CT: control target
= control target key end

     0   :  { %s5250_s0 = inlined_call_operand.hbm [shape: f32[2,4,256], index: 0, kind: input, shape index: {}]   ;;  %s5251_s1 = inlined_call_operand.hbm [shape: f32[14,256], index: 1, kind: input, shape index: {}]   ;;  %s5252_s2 = inlined_call_operand.vmem [shape: f32[98], index: 2, kind: input, shape index: {}]   ;;  %s5253_s3 = inlined_call_operand.hbm [shape: f32[2,4,256], index: 3, kind: output, shape index: {}]  }
   0x1   :  { %5340 = sst [smem:[#allocation69_spill]] %s5250_s0 }
   0x2   :  { %5341 = sst [smem:[#allocation70_spill]] %s5251_s1 }
   0x3   :  { %5342 = sst [smem:[#allocation71_spill]] %s5252_s2 }
   0x4   :  { %5343 = sst [smem:[#allocation72_spill]] %s5253_s3 }
   0x5   :  { %8 = vsyncpa [#allocation3], 0 }
   0x6   :  { %10 = vsyncpa [#allocation3 + $0x1], 0 }
   0x7   :  { %11 = vsyncpa [#allocation7], 0 }
   0x8   :  { %12 = vsyncpa [#allocation5], 0 }
   0x9   :  { %13 = vsyncpa [#allocation4], 0 }
   0xa   :  { %15 = vsyncpa [#allocation4 + $0x1], 0  ;;  %s2792_s12 = smov 0   ;;  %s2794_s13 = smov 0  }
   0xb   :  { %s2796_s14 = smov 0   ;;  %s2798_s15 = smov 0  }
   0xc LB: > { %5344 = sst [smem:[#allocation14_spill]] %s2704_s12  ;;  %s2813_s16 = sadd.s32 4294967295, %s2716_s15   ;;  %s2716_s15 = sphi %s2798_s15, %s5619_s15   ;;  %s2712_s14 = sphi %s2796_s14, %s5622_s14   ;;  %s2708_s13 = sphi %s2794_s13, %s5621_s13   ;;  %s2704_s12 = sphi %s2792_s12, %s5620_s12  }
   0xd   : > { %5345 = sst [smem:[#allocation15_spill]] %s2708_s13  ;;  %s2313_s17 = sadd.s32 4294967294, %s2716_s15  }
   0xe   : > { %5346 = sst [smem:[#allocation16_spill]] %s2712_s14  ;;  %p41_p0 = scmp.ne.s32.totalorder %s2708_s13, %s2704_s12 }
   0xf   : > { %5347 = sst [smem:[#allocation17_spill]] %s2716_s15  ;;  %p5254_p1 = scmp.eq.s32.totalorder %s2813_s16, 0 }
  0x10   : > { %5348 = sst [smem:[#allocation18_spill]] %s2813_s16  ;;  %p113_p3 = scmp.eq.s32.totalorder %s2313_s17, 1 }
  0x11   : > { %p2822_p4 = por %p5254_p1, %p41_p0  ;;  %p2314_p5 = scmp.ge.s32.totalorder %s2716_s15, 1 }
  0x12   : > { %p2827_p6 = por %p113_p3, %p41_p0  ;;  %p120_p7 = scmp.lt.s32.totalorder %s2716_s15, 3 }
  0x13   : > { %s5349_s18 = scalar_select %p2822_p4, 1, 0 }
  0x14   : > { %s5350_s19 = scalar_select %p2827_p6, 1, 0 }
  0x15   : > { %p2832_p8 = pnand %p2314_p5, %p120_p7  ;;  %s2718_s21 = smov [#allocation6]  }
  0x16   : > { %5351 = sst [smem:[#allocation19_spill]] %s5350_s19  ;;  %s132_s22 = sshll.u32 %s2718_s21, 4  ;;  %s133_s22 = int_to_ptr.vmem [resolvable:$true] %s132_s22 }
  0x17   : > { %s5352_s20 = scalar_select %p2832_p8, 1, 0 }
  0x18   : > { %p2444_p9 = pneg %p2832_p8  ;;  %s5353_s2 = sld [smem:[#allocation71_spill]] }
  0x19   : > { %s5355_s1 = sld [smem:[#allocation70_spill]] }
  0x1a   : > { %p2844_p11 = pnand %p2444_p9, %p5254_p1 }
  0x1c   : > { %p2571_p13 = pneg %p2844_p11 }
  0x1e   : > { %s146_s25 = sshll.u32 %s5353_s2, 4  ;;  %s2848_s25 = int_to_ptr.vmem [resolvable:$true] %s146_s25 }
  0x1f   : > { %s2569_s29 = scalar_lea.hbm %s5355_s1, 512 }
  0x20   : > { %p2570_p12 = scmp.ne.s32.totalorder %s5355_s1, %s2569_s29  ;;  %p2576_p5 = scmp.lt.u32.totalorder %s2569_s29, %s5355_s1 }
  0x22   : > { %p2572_p0 = pnand %p2571_p13, %p2570_p12 }
  0x24   : > { %p2573_p3 = pneg %p2572_p0 }
  0x26   : > { %p2578_p7 = pnand %p2576_p5, %p2573_p3 }
  0x28   : > { %2581 = shalt.err (!%p2578_p7)
}
  0x29   : > { %s2582_s7 = scalar_lea.vmem %s133_s22, 512  ;;  %p2590_p2 = scmp.lt.s32.totalorder %s133_s22, %s133_s22 }
  0x2a   : > { %p2583_p9 = scmp.ne.s32.totalorder %s133_s22, %s2582_s7  ;;  %p2591_p6 = scmp.lt.s32.totalorder %s2582_s7, %s2582_s7 }
  0x2c   : > { %p2585_p10 = pnand %p2583_p9, %p2571_p13  ;;  %p2592_p4 = por %p2591_p6, %p2590_p2 }
  0x2e   : > { %p2586_p1 = pneg %p2585_p10 }
  0x30   : > { %p2593_p8 = pnand %p2592_p4, %p2586_p1 }
  0x32   : > { %2596 = shalt.err (!%p2593_p8)
}
  0x33   : > { %s2719_s8 = smov 256   ;;  %s2720_s9 = smov 16  }
  0x34   : > { %2447 = dma.hbm_to_vmem [thread:$0]  (!%p2844_p11), %s5355_s1, 512, %s133_s22, [#allocation7], %s2719_s8, %s2719_s8, %s2720_s9  }
  0x35   : > { %s2597_s17 = scalar_lea.vmem %s2848_s25, 16  ;;  %p2605_p1 = scmp.lt.s32.totalorder %s2848_s25, %s2848_s25 }
  0x36   : > { %p2598_p12 = scmp.ne.s32.totalorder %s2848_s25, %s2597_s17  ;;  %p2606_p4 = scmp.lt.s32.totalorder %s2597_s17, %s2597_s17 }
  0x38   : > { %p2600_p10 = pnand %p2598_p12, %p2571_p13  ;;  %p2607_p6 = por %p2606_p4, %p2605_p1 }
  0x3a   : > { %p2601_p2 = pneg %p2600_p10 }
  0x3c   : > { %p2608_p8 = pnand %p2607_p6, %p2601_p2 }
  0x3e   : > { %2611 = shalt.err (!%p2608_p8)
}
  0x3f   : > { %s2721_s21 = smov [#allocation8]   ;;  %s2883_s22 = sadd.s32 1, %s2716_s15  }
  0x40   : > { %2450 = dma.vmem_to_smem (!%p2844_p11), %s2848_s25, 16, %s2721_s21, [#allocation5]  }
  0x41   : > { %5356 = sst [smem:[#allocation20_spill]] %s2883_s22  ;;  %s28_s23 = sadd.s32 1, %s2712_s14 }
  0x42   : > { %s25_s24 = ssub.s32 %s2716_s15, %s2883_s22  ;;  %p35_p13 = scmp.ne.s32.totalorder %s2712_s14, %s2708_s13 }
  0x43   : > { %p26_p0 = scmp.eq.s32.totalorder %s25_s24, 0  ;;  %p36_p3 = scmp.eq.s32.totalorder %s2716_s15, 0 }
  0x44   : > { %p5357_p5 = scmp.eq.s32.totalorder %s2813_s16, 1  ;;  %p2461_p9 = scmp.lt.s32.totalorder %s2716_s15, 2 }
  0x45   : > { %s2899_s27 = scalar_select %p26_p0, %s2712_s14, %s28_s23  }
  0x46   : > { %p2893_p7 = por %p5357_p5, %p35_p13  ;;  %p37_p12 = por %p36_p3, %p35_p13 }
  0x47   : > { %5360 = sst [smem:[#allocation22_spill]] %s2899_s27  ;;  %s157_s28 = sand.u32 1, %s2712_s14  }
  0x48   : > { %s5358_s26 = scalar_select %p2893_p7, 1, 0 }
  0x49   : > { %s2318_s29 = sshll.u32 %s157_s28, 3  ;;  %s2430_s25 = sshll.u32 %s2716_s15, 7 }
  0x4a   : > { %5359 = sst [smem:[#allocation21_spill]] %s5358_s26  ;;  %s5361_s0 = sld [smem:[#allocation69_spill]] }
  0x4b   : > { %s161_s6 = scalar_lea.vmem [#allocation2], %s2318_s29  ;;  %p2910_p11 = pnand %p2461_p9, %p37_p12 }
  0x4c   : > { %s169_s7 = sshll.u32 %s161_s6, 4  ;;  %s158_s9 = scalar_lea.sflag [#allocation3], %s157_s28  ;;  %s2908_s7 = int_to_ptr.vmem [resolvable:$true] %s169_s7 }
  0x4d   : > { %p2614_p2 = pneg %p2910_p11 }
  0x50   : > { %s2906_s5 = scalar_lea.hbm %s5361_s0, %s2430_s25  ;;  %s2617_s21 = scalar_lea.hbm %s5361_s0, 256 }
  0x51   : > { %s2612_s10 = scalar_lea.hbm %s2906_s5, 128  ;;  %p2618_p6 = scmp.lt.u32.totalorder %s2906_s5, %s5361_s0 }
  0x52   : > { %p2613_p10 = scmp.ne.s32.totalorder %s2906_s5, %s2612_s10  ;;  %p2619_p8 = scmp.lt.u32.totalorder %s2617_s21, %s2612_s10 }
  0x53   : > { %p2621_p0 = scmp.lt.u32.totalorder %s2612_s10, %s2906_s5 }
  0x54   : > { %p2615_p1 = pnand %p2614_p2, %p2613_p10  ;;  %p2620_p13 = por %p2619_p8, %p2618_p6 }
  0x56   : > { %p2616_p4 = pneg %p2615_p1  ;;  %p2622_p3 = por %p2621_p0, %p2620_p13 }
  0x58   : > { %p2623_p5 = pnand %p2622_p3, %p2616_p4 }
  0x5a   : > { %2626 = shalt.err (!%p2623_p5)
}
  0x5b   : > { %s2627_s28 = scalar_lea.vmem %s2908_s7, 128  ;;  %s2722_s29 = smov [#allocation2]  }
  0x5c   : > { %p2628_p9 = scmp.ne.s32.totalorder %s2908_s7, %s2627_s28  ;;  %s2632_s25 = sshll.u32 %s2722_s29, 4  ;;  %s2633_s25 = int_to_ptr.vmem [resolvable:$false] %s2632_s25 }
  0x5d   : > { %s2634_s30 = scalar_lea.vmem %s2633_s25, 256  ;;  %p2635_p1 = scmp.lt.s32.totalorder %s2908_s7, %s2633_s25 }
  0x5e   : > { %p2630_p12 = pnand %p2628_p9, %p2614_p2  ;;  %p2636_p6 = scmp.lt.s32.totalorder %s2634_s30, %s2627_s28 }
  0x60   : > { %p2631_p10 = pneg %p2630_p12  ;;  %p2637_p8 = por %p2636_p6, %p2635_p1 }
  0x62   : > { %p2638_p13 = pnand %p2637_p8, %p2631_p10 }
  0x64   : > { %2641 = shalt.err (!%p2638_p13)
}
  0x65   : > { %2454 = dma.hbm_to_vmem [thread:$0]  (!%p2910_p11), %s2906_s5, 128, %s2908_s7, %s158_s9  }
  0x66   : > { %p5363_p4 = scmp.ne.s32.totalorder %s5352_s20, 0 }
  0x68   : > { %178 = sbr.rel (%p5363_p4) target bundleno = 710 (0x2c6), region = 32 }
  0x6f   : > { %s2942_s4 = sand.u32 1, %s2708_s13   ;;  %p5366_p2 = scmp.ne.s32.totalorder %s5349_s18, 0 }
  0x70   : > { %5364 = sst [smem:[#allocation23_spill]] %s2942_s4  ;;  %s5257_s6 = sshll.u32 %s2942_s4, 3 }
  0x71   : > { %s181_s10 = scalar_lea.sflag [#allocation3], %s2942_s4  ;;  %s2948_s11 = scalar_lea.vmem [#allocation2], %s5257_s6 }
  0x72   : > { %5365 = sst [smem:[#allocation24_spill]] %s2948_s11 }
  0x73   : > { %2687 = dma.done.wait (%p5366_p2), %s181_s10, 128  }
  0x74   : > { %2689 = vsyncadd (%p5366_p2), %s181_s10, 4294967168  ;;  %p5367_p11 = scmp.eq.s32.totalorder %s2813_s16, 0 }
  0x76   : > { %2691 = dma.done.wait (%p5367_p11), [#allocation7], 512   ;;  %p5368_p0 = pmov %p5367_p11 }
  0x78   : > { %2693 = vsyncadd (%p5368_p0), [#allocation7], 4294966784  ;;  %p5369_p3 = pmov %p5368_p0 }
  0x79   : > { %p5370_p5 = pmov %p5368_p0 }
  0x7a   : > { %2695 = dma.done.wait (%p5369_p3), [#allocation5], 16  }
  0x7b   : > { %2697 = vsyncadd (%p5370_p5), [#allocation5], 4294967280 }
  0x7c   : > { %197 = sfence }
  0x7d   : > { %v243_v0 = vld [vmem:[%s2948_s11] sm:$0xff]  ;;  %vm247_vm0 = vcmask 1043456   ;;  %s2723_s18 = smov 50   ;;  %s2724_s20 = smov 51  }
  0x7e   : > { %v265_v1 = vsel %vm247_vm0, %v243_v0, -inf  ;;  %v248_v2 = vsel %vm247_vm0, %v243_v0, 0.0  ;;  %v2963_v3 = vcombine.high %v243_v0, %v243_v0  ;;  %s2725_s5 = smov 49   ;;  %s2726_s7 = smov 48  }
  0x7f   : > { %v266_v4 = vrot.slane %v265_v1, 4  ;;  %v249_v5 = vrot.slane %v248_v2, 4  ;;  %s2727_s8 = smov 47   ;;  %s2728_s9 = smov 46  }
  0x80   : > { %5371 = vst [vmem:[#allocation25_spill] sm:$0xff] %v2963_v3  ;;  %v272_v6 = vsel %vm247_vm0, %v2963_v3, -inf  ;;  %v255_v7 = vsel %vm247_vm0, %v2963_v3, 0.0  ;;  %s2729_s17 = smov 45   ;;  %s2730_s21 = smov 35  }
  0x81   : > { %v267_v8 = vmax.f32 %v265_v1, %v266_v4  ;;  %v250_v9 = vadd.f32 %v249_v5, %v248_v2  ;;  %v273_v10 = vrot.slane %v272_v6, 4  ;;  %v256_v11 = vrot.slane %v255_v7, 4  ;;  %s2731_s23 = smov 34   ;;  %s2732_s24 = smov 33  }
  0x82   : > { %s2733_s28 = smov 32   ;;  %s2734_s29 = smov 31   ;;  %v283_v5 = vlaneseq }
  0x83   : > { %v268_v12 = vrot.slane %v267_v8, 2  ;;  %v251_v13 = vrot.slane %v250_v9, 2  ;;  %v274_v14 = vmax.f32 %v272_v6, %v273_v10  ;;  %v257_v15 = vadd.f32 %v256_v11, %v255_v7  ;;  %s2735_s25 = smov 30   ;;  %s2736_s30 = smov 29  }
  0x84   : > { %s2737_s10 = smov 19   ;;  %v307_v6 = vshrl.u32 %v283_v5, 7  ;;  %v216_v7 = vld [vmem:[#allocation6] ss:$8 sm:$0x3]  ;;  %s3217_s6 = sld [smem:[#allocation8 + $0x7]] }
  0x85   : > { %v269_v16 = vmax.f32 %v267_v8, %v268_v12  ;;  %v252_v17 = vadd.f32 %v251_v13, %v250_v9  ;;  %v275_v18 = vrot.slane %v274_v14, 2  ;;  %v258_v19 = vrot.slane %v257_v15, 2  ;;  %v3149_v8 = vld [vmem:[#allocation6 + $0x10] ss:$8 sm:$0x3]  ;;  %s3241_s0 = sld [smem:[#allocation8 + $0x8]] }
  0x86   : > { %v3157_v11 = vld [vmem:[#allocation6 + $0x7] ss:$8 sm:$0x3]  ;;  %v3161_v12 = vld [vmem:[#allocation6 + $0x11] ss:$8 sm:$0x3] }
  0x87   : > { %v270_v20 = vrot.slane %v269_v16, 1  ;;  %v253_v21 = vrot.slane %v252_v17, 1  ;;  %v276_v22 = vmax.f32 %v274_v14, %v275_v18  ;;  %v259_v23 = vadd.f32 %v258_v19, %v257_v15  ;;  %v3168_v13 = vld [vmem:[#allocation6 + $0x12] ss:$8 sm:$0x3]  ;;  %s3243_s1 = sld [smem:[#allocation8 + $0x39]] }
  0x88   : > { %v3171_v14 = vsub.s32 0, %v307_v6  ;;  %v3184_v18 = vmul.f32 %v3149_v8, %v216_v7  ;;  %v3186_v19 = vld [vmem:[#allocation6 + $0x13] ss:$8 sm:$0x3]  ;;  %s5386_s2 = smov 127   ;;  %s3255_s27 = sld [smem:[#allocation8 + $0x9]] }
  0x89   : > { %v2967_v24 = vmax.f32 %v269_v16, %v270_v20  ;;  %v254_v25 = vadd.f32 %v253_v21, %v252_v17  ;;  %v277_v26 = vrot.slane %v276_v22, 1  ;;  %v260_v29 = vrot.slane %v259_v23, 1  ;;  %v3195_v21 = vld [vmem:[#allocation6 + $0x14] ss:$8 sm:$0x3]  ;;  %s3266_s14 = sld [smem:[#allocation8 + $0x3a]] }
  0x8a   : > { %v3181_v17 = vsub.s32 1, %v307_v6  ;;  %v3191_v20 = vmul.f32 %v3157_v11, %v216_v7  ;;  %s3282_s13 = sld [smem:[#allocation8 + $0x3b]]  ;;  %s5279_s22 = smov 126  }
  0x8b   : > { %327 = vrot.lane.b32.xlu0 %v2967_v24, %s2723_s18  ;;  %288 = vrot.lane.b32.xlu1 %v2967_v24, %s2724_s20  ;;  %v2971_v27 = vmul.f32 0.25, %v254_v25  ;;  %v2973_v28 = vmax.f32 %v276_v22, %v277_v26  ;;  %v261_v30 = vadd.f32 %v260_v29, %v259_v23  ;;  %v3200_v22 = vmul.f32 %v3161_v12, %v216_v7  ;;  %v3231_v25 = vld [vmem:[#allocation6 + $0x1] ss:$8 sm:$0x3]  ;;  %5385 = sst [smem:[#allocation39_spill]] %s3241_s0  ;;  %s3294_s19 = sld [smem:[#allocation8 + $0x3c]] }
  0x8c   : > { %v3208_v23 = vand.u32 127, %v283_v5  ;;  %v3213_v29 = vmul.f32 %v3168_v13, %v216_v7  ;;  %s3292_s15 = sld [smem:[#allocation8 + $0xb]]  ;;  %v3303_v5 = vmul.f32 %v3149_v8, %v3231_v25  ;;  %s3307_s12 = sld [smem:[#allocation8 + $0xc]]  ;;  %v3350_v26 = vmul.f32 %v3186_v19, %v3231_v25 }
  0x8d   : > { %v2979_v31 = vmul.f32 0.25, %v261_v30  ;;  %v3215_v30 = vld [vmem:[#allocation6 + $0x15] ss:$8 sm:$0x3]  ;;  %s3309_s3 = sld [smem:[#allocation8 + $0x3d]]  ;;  %s3327_s26 = sld [smem:[#allocation8 + $0x3e]] }
  0x8e   : > { %5387 = sst [smem:[#allocation40_spill]] %s3255_s27  ;;  %5392 = vst [vmem:[#allocation45_spill] sm:$0xff] %v3303_v5  ;;  %vm285_vm1 = vcmp.lt.s32.totalorder %v3208_v23, 51  ;;  %vm324_vm2 = vcmp.lt.s32.totalorder %v3208_v23, 50  ;;  %s3338_s4 = sld [smem:[#allocation8 + $0xe]]  ;;  %5401 = vst [vmem:[#allocation53_spill] sm:$0xff] %v3350_v26 }
  0x8f   : > { %279 = vrot.lane.b32.xlu0 %v2971_v27, %s2724_s20  ;;  %290 = vrot.lane.b32.xlu1 %v2973_v28, %s2724_s20  ;;  %s3340_s16 = sld [smem:[#allocation8 + $0x3f]]  ;;  %s5400_s11 = smov 126   ;;  %vm363_vm3 = vcmp.lt.s32.totalorder %v3208_v23, 49  ;;  %vm402_vm4 = vcmp.lt.s32.totalorder %v3208_v23, 48  ;;  %vm441_vm5 = vcmp.lt.s32.totalorder %v3208_v23, 47  ;;  %vm480_vm6 = vcmp.lt.s32.totalorder %v3208_v23, 46 }
  0x90   : > { %s3365_s0 = sld [smem:[#allocation8 + $0xf]]  ;;  %s2749_s27 = smov 125   ;;  %vm519_vm7 = vcmp.lt.s32.totalorder %v3208_v23, 45  ;;  %vm558_vm8 = vcmp.lt.s32.totalorder %v3208_v23, 35  ;;  %vm597_vm9 = vcmp.lt.s32.totalorder %v3208_v23, 34  ;;  %vm636_vm10 = vcmp.lt.s32.totalorder %v3208_v23, 33 }
  0x91   : > { %vm675_vm11 = vcmp.lt.s32.totalorder %v3208_v23, 32  ;;  %vm714_vm12 = vcmp.lt.s32.totalorder %v3208_v23, 31  ;;  %vm753_vm13 = vcmp.lt.s32.totalorder %v3208_v23, 30  ;;  %vm792_vm14 = vcmp.lt.s32.totalorder %v3208_v23, 29 }
  0x92   : > { %5393 = sst [smem:[#allocation46_spill]] %s3307_s12  ;;  %s3423_s12 = sld [smem:[#allocation8 + $0x10]]  ;;  %vm831_vm15 = vcmp.lt.s32.totalorder %v3208_v23, 19  ;;  %vm870_vm0 = vcmp.lt.s32.totalorder %v3208_v23, 18 }
  0x93   : > { %320 = vrot.lane.b32.xlu0 %v2971_v27, %s2723_s18  ;;  %329 = vrot.lane.b32.xlu1 %v2973_v28, %s2723_s18 }
  0x94   : > { %5398 = sst [smem:[#allocation51_spill]] %s3338_s4  ;;  %s3440_s4 = sld [smem:[#allocation8 + $0x41]] }
  0x95   : > { %5399 = sst [smem:[#allocation52_spill]] %s3340_s16  ;;  %s3455_s16 = sld [smem:[#allocation8 + $0x11]] }
  0x96   : > { %5403 = sst [smem:[#allocation55_spill]] %s3365_s0  ;;  %s2750_s0 = smov 115  }
  0x97   : > { %359 = vrot.lane.b32.xlu0 %v2971_v27, %s2725_s5  ;;  %322 = vrot.lane.b32.xlu1 %v2979_v31, %s2723_s18  ;;  %s2738_s18 = smov 18  }
  0x9b   : > { %361 = vrot.lane.b32.xlu1 %v2979_v31, %s2725_s5  ;;  %281 = vrot.lane.b32.xlu0 %v2979_v31, %s2724_s20  ;;  %s2739_s20 = smov 17  }
  0x9f   : > { %368 = vrot.lane.b32.xlu1 %v2973_v28, %s2725_s5  ;;  %366 = vrot.lane.b32.xlu0 %v2967_v24, %s2725_s5  ;;  %s2740_s5 = smov 16  }
  0xa3   : > { %400 = vrot.lane.b32.xlu1 %v2979_v31, %s2726_s7  ;;  %398 = vrot.lane.b32.xlu0 %v2971_v27, %s2726_s7 }
  0xa7   : > { %407 = vrot.lane.b32.xlu1 %v2973_v28, %s2726_s7  ;;  %405 = vrot.lane.b32.xlu0 %v2967_v24, %s2726_s7  ;;  %s2741_s7 = smov 15  }
  0xab   : > { %439 = vrot.lane.b32.xlu1 %v2979_v31, %s2727_s8  ;;  %437 = vrot.lane.b32.xlu0 %v2971_v27, %s2727_s8 }
  0xaf   : > { %446 = vrot.lane.b32.xlu1 %v2973_v28, %s2727_s8  ;;  %444 = vrot.lane.b32.xlu0 %v2967_v24, %s2727_s8  ;;  %s2742_s8 = smov 14  }
  0xb3   : > { %478 = vrot.lane.b32.xlu1 %v2979_v31, %s2728_s9  ;;  %476 = vrot.lane.b32.xlu0 %v2971_v27, %s2728_s9 }
  0xb7   : > { %485 = vrot.lane.b32.xlu1 %v2973_v28, %s2728_s9  ;;  %483 = vrot.lane.b32.xlu0 %v2967_v24, %s2728_s9  ;;  %s2743_s9 = smov 13  }
  0xbb   : > { %517 = vrot.lane.b32.xlu1 %v2979_v31, %s2729_s17  ;;  %515 = vrot.lane.b32.xlu0 %v2971_v27, %s2729_s17 }
  0xbf   : > { %524 = vrot.lane.b32.xlu1 %v2973_v28, %s2729_s17  ;;  %522 = vrot.lane.b32.xlu0 %v2967_v24, %s2729_s17  ;;  %s2744_s17 = smov 3  }
  0xc3   : > { %556 = vrot.lane.b32.xlu1 %v2979_v31, %s2730_s21  ;;  %554 = vrot.lane.b32.xlu0 %v2971_v27, %s2730_s21 }
  0xc7   : > { %563 = vrot.lane.b32.xlu1 %v2973_v28, %s2730_s21  ;;  %561 = vrot.lane.b32.xlu0 %v2967_v24, %s2730_s21  ;;  %s2745_s21 = smov 2  }
  0xcb   : > { %595 = vrot.lane.b32.xlu1 %v2979_v31, %s2731_s23  ;;  %593 = vrot.lane.b32.xlu0 %v2971_v27, %s2731_s23 }
  0xcf   : > { %602 = vrot.lane.b32.xlu1 %v2973_v28, %s2731_s23  ;;  %600 = vrot.lane.b32.xlu0 %v2967_v24, %s2731_s23  ;;  %s3139_s23 = sld [smem:[#allocation8 + $0x31]] }
  0xd3   : > { %634 = vrot.lane.b32.xlu1 %v2979_v31, %s2732_s24  ;;  %632 = vrot.lane.b32.xlu0 %v2971_v27, %s2732_s24 }
  0xd7   : > { %641 = vrot.lane.b32.xlu1 %v2973_v28, %s2732_s24  ;;  %639 = vrot.lane.b32.xlu0 %v2967_v24, %s2732_s24  ;;  %s3141_s24 = sld [smem:[#allocation8 + $0x32]] }
  0xdb   : > { %673 = vrot.lane.b32.xlu1 %v2979_v31, %s2733_s28  ;;  %671 = vrot.lane.b32.xlu0 %v2971_v27, %s2733_s28 }
  0xdf   : > { %680 = vrot.lane.b32.xlu1 %v2973_v28, %s2733_s28  ;;  %678 = vrot.lane.b32.xlu0 %v2967_v24, %s2733_s28  ;;  %s2746_s28 = smov 1  }
  0xe3   : > { %712 = vrot.lane.b32.xlu1 %v2979_v31, %s2734_s29  ;;  %710 = vrot.lane.b32.xlu0 %v2971_v27, %s2734_s29 }
  0xe7   : > { %719 = vrot.lane.b32.xlu1 %v2973_v28, %s2734_s29  ;;  %717 = vrot.lane.b32.xlu0 %v2967_v24, %s2734_s29  ;;  %s3144_s29 = sld [smem:[#allocation8 + $0x1]] }
  0xeb   : > { %751 = vrot.lane.b32.xlu1 %v2979_v31, %s2735_s25  ;;  %749 = vrot.lane.b32.xlu0 %v2971_v27, %s2735_s25 }
  0xef   : > { %758 = vrot.lane.b32.xlu1 %v2973_v28, %s2735_s25  ;;  %756 = vrot.lane.b32.xlu0 %v2967_v24, %s2735_s25  ;;  %s3146_s25 = sld [smem:[#allocation8 + $0x2]] }
  0xf3   : > { %790 = vrot.lane.b32.xlu1 %v2979_v31, %s2736_s30  ;;  %788 = vrot.lane.b32.xlu0 %v2971_v27, %s2736_s30 }
  0xf7   : > { %797 = vrot.lane.b32.xlu1 %v2973_v28, %s2736_s30  ;;  %795 = vrot.lane.b32.xlu0 %v2967_v24, %s2736_s30  ;;  %s3151_s30 = sld [smem:[#allocation8]] }
  0xfb   : > { %829 = vrot.lane.b32.xlu1 %v2979_v31, %s2737_s10  ;;  %827 = vrot.lane.b32.xlu0 %v2971_v27, %s2737_s10 }
  0xfd   : > { %v3033_v32 = vpop.permute.xlu0 %327  ;;  %v3035_v33 = vpop.permute.xlu1 %288 }
  0xff   : > { %836 = vrot.lane.b32.xlu1 %v2973_v28, %s2737_s10  ;;  %834 = vrot.lane.b32.xlu0 %v2967_v24, %s2737_s10  ;;  %s3159_s10 = sld [smem:[#allocation8 + $0x33]] }
 0x101   : > { %v3039_v34 = vpop.permute.xlu0 %279  ;;  %v3041_v35 = vpop.permute.xlu1 %290 }
 0x103   : > { %868 = vrot.lane.b32.xlu1 %v2979_v31, %s2738_s18  ;;  %866 = vrot.lane.b32.xlu0 %v2971_v27, %s2738_s18 }
 0x105   : > { %v3045_v36 = vpop.permute.xlu0 %320  ;;  %v3047_v37 = vpop.permute.xlu1 %329 }
 0x107   : > { %875 = vrot.lane.b32.xlu1 %v2973_v28, %s2738_s18  ;;  %873 = vrot.lane.b32.xlu0 %v2967_v24, %s2738_s18  ;;  %s3163_s18 = sld [smem:[#allocation8 + $0x3]] }
 0x109   : > { %v3051_v38 = vpop.permute.xlu0 %359  ;;  %v3053_v39 = vpop.permute.xlu1 %322 }
 0x10b   : > { %907 = vrot.lane.b32.xlu1 %v2979_v31, %s2739_s20  ;;  %905 = vrot.lane.b32.xlu0 %v2971_v27, %s2739_s20 }
 0x10d   : > { %v3057_v40 = vpop.permute.xlu1 %361  ;;  %v3059_v41 = vpop.permute.xlu0 %281 }
 0x10f   : > { %914 = vrot.lane.b32.xlu1 %v2973_v28, %s2739_s20  ;;  %912 = vrot.lane.b32.xlu0 %v2967_v24, %s2739_s20  ;;  %s3166_s20 = sld [smem:[#allocation8 + $0x34]] }
 0x111   : > { %v3063_v42 = vpop.permute.xlu1 %368  ;;  %v3065_v43 = vpop.permute.xlu0 %366 }
 0x113   : > { %946 = vrot.lane.b32.xlu1 %v2979_v31, %s2740_s5  ;;  %944 = vrot.lane.b32.xlu0 %v2971_v27, %s2740_s5 }
 0x115   : > { %v3069_v44 = vpop.permute.xlu1 %400  ;;  %v3071_v45 = vpop.permute.xlu0 %398 }
 0x117   : > { %953 = vrot.lane.b32.xlu1 %v2973_v28, %s2740_s5  ;;  %951 = vrot.lane.b32.xlu0 %v2967_v24, %s2740_s5  ;;  %s3173_s5 = sld [smem:[#allocation8 + $0x4]] }
 0x119   : > { %v3075_v46 = vpop.permute.xlu1 %407  ;;  %v3077_v47 = vpop.permute.xlu0 %405 }
 0x11b   : > { %985 = vrot.lane.b32.xlu1 %v2979_v31, %s2741_s7  ;;  %983 = vrot.lane.b32.xlu0 %v2971_v27, %s2741_s7 }
 0x11d   : > { %v3081_v48 = vpop.permute.xlu1 %439  ;;  %v3083_v49 = vpop.permute.xlu0 %437 }
 0x11f   : > { %992 = vrot.lane.b32.xlu1 %v2973_v28, %s2741_s7  ;;  %990 = vrot.lane.b32.xlu0 %v2967_v24, %s2741_s7  ;;  %s3175_s7 = sld [smem:[#allocation8 + $0x35]] }
 0x121   : > { %v3087_v50 = vpop.permute.xlu1 %446  ;;  %v3089_v51 = vpop.permute.xlu0 %444 }
 0x123   : > { %1024 = vrot.lane.b32.xlu1 %v2979_v31, %s2742_s8  ;;  %1022 = vrot.lane.b32.xlu0 %v2971_v27, %s2742_s8 }
 0x125   : > { %v3093_v52 = vpop.permute.xlu1 %478  ;;  %v3095_v53 = vpop.permute.xlu0 %476 }
 0x127   : > { %1031 = vrot.lane.b32.xlu1 %v2973_v28, %s2742_s8  ;;  %1029 = vrot.lane.b32.xlu0 %v2967_v24, %s2742_s8  ;;  %s3188_s8 = sld [smem:[#allocation8 + $0x5]] }
 0x129   : > { %v3099_v54 = vpop.permute.xlu1 %485  ;;  %v3101_v55 = vpop.permute.xlu0 %483 }
 0x12b   : > { %1063 = vrot.lane.b32.xlu1 %v2979_v31, %s2743_s9  ;;  %1061 = vrot.lane.b32.xlu0 %v2971_v27, %s2743_s9 }
 0x12d   : > { %v3105_v56 = vpop.permute.xlu1 %517  ;;  %v3107_v57 = vpop.permute.xlu0 %515 }
 0x12f   : > { %1070 = vrot.lane.b32.xlu1 %v2973_v28, %s2743_s9  ;;  %1068 = vrot.lane.b32.xlu0 %v2967_v24, %s2743_s9  ;;  %s3193_s9 = sld [smem:[#allocation8 + $0x36]] }
 0x131   : > { %v3111_v58 = vpop.permute.xlu1 %524  ;;  %v3113_v59 = vpop.permute.xlu0 %522 }
 0x133   : > { %1102 = vrot.lane.b32.xlu1 %v2979_v31, %s2744_s17  ;;  %1100 = vrot.lane.b32.xlu0 %v2971_v27, %s2744_s17 }
 0x135   : > { %v3117_v60 = vpop.permute.xlu1 %556  ;;  %v3119_v61 = vpop.permute.xlu0 %554 }
 0x136   : > { %5372 = vst [vmem:[#allocation26_spill] sm:$0xff] %v3117_v60  ;;  %v326_v60 = vsel %vm324_vm2, %v3053_v39, %v3045_v36 }
 0x137   : > { %1109 = vrot.lane.b32.xlu1 %v2973_v28, %s2744_s17  ;;  %1107 = vrot.lane.b32.xlu0 %v2967_v24, %s2744_s17  ;;  %s5261_s17 = smov 127  }
 0x139   : > { %v3123_v62 = vpop.permute.xlu1 %563  ;;  %v3125_v63 = vpop.permute.xlu0 %561 }
 0x13a   : > { %5373 = vst [vmem:[#allocation27_spill] sm:$0xff] %v3123_v62  ;;  %5374 = vst [vmem:[#allocation28_spill] sm:$0xff] %v3125_v63  ;;  %v287_v63 = vsel %vm285_vm1, %v3059_v41, %v3039_v34 }
 0x13b   : > { %1141 = vrot.lane.b32.xlu1 %v2979_v31, %s2745_s21  ;;  %1139 = vrot.lane.b32.xlu0 %v2971_v27, %s2745_s21 }
 0x13d   : > { %v3129_v0 = vpop.permute.xlu1 %595  ;;  %v3131_v1 = vpop.permute.xlu0 %593 }
 0x13e   : > { %5375 = vst [vmem:[#allocation29_spill] sm:$0xff] %v3129_v0  ;;  %5376 = vst [vmem:[#allocation30_spill] sm:$0xff] %v3131_v1  ;;  %v325_v0 = vsel %vm324_vm2, %v3045_v36, %v3053_v39  ;;  %v286_v36 = vsel %vm285_vm1, %v3039_v34, %v3059_v41  ;;  %v332_v34 = vsel %vm324_vm2, %v3047_v37, %v3033_v32  ;;  %v5410_v41 = vstv %s3151_s30  ;;  %s3660_s30 = sld [smem:[#allocation8 + $0x14]] }
 0x13f   : > { %1148 = vrot.lane.b32.xlu1 %v2973_v28, %s2745_s21  ;;  %1146 = vrot.lane.b32.xlu0 %v2967_v24, %s2745_s21  ;;  %s3202_s21 = sld [smem:[#allocation8 + $0x6]] }
 0x141   : > { %v3135_v2 = vpop.permute.xlu1 %602  ;;  %v3137_v4 = vpop.permute.xlu0 %600 }
 0x142   : > { %5377 = vst [vmem:[#allocation31_spill] sm:$0xff] %v3135_v2  ;;  %5378 = vst [vmem:[#allocation32_spill] sm:$0xff] %v3137_v4  ;;  %v3336_v4 = vmul.f32 %v3168_v13, %v3231_v25 }
 0x143   : > { %1180 = vrot.lane.b32.xlu1 %v2979_v31, %s2746_s28  ;;  %1178 = vrot.lane.b32.xlu0 %v2971_v27, %s2746_s28 }
 0x144   : > { %5397 = vst [vmem:[#allocation50_spill] sm:$0xff] %v3336_v4  ;;  %v331_v4 = vsel %vm324_vm2, %v3033_v32, %v3047_v37  ;;  %v371_v32 = vsel %vm363_vm3, %v3063_v42, %v3065_v43  ;;  %v5414_v37 = vstv %s3139_s23  ;;  %s2751_s23 = smov 114   ;;  %vm948_vm2 = vcmp.lt.s32.totalorder %v3208_v23, 16 }
 0x145   : > { %v3153_v9 = vpop.permute.xlu1 %634  ;;  %v3155_v10 = vpop.permute.xlu0 %632 }
 0x146   : > { %5379 = vst [vmem:[#allocation33_spill] sm:$0xff] %v3153_v9  ;;  %5380 = vst [vmem:[#allocation34_spill] sm:$0xff] %v3155_v10  ;;  %v3253_v10 = vmul.f32 %v3195_v21, %v216_v7  ;;  %v3264_v9 = vmul.f32 %v3215_v30, %v216_v7 }
 0x147   : > { %1187 = vrot.lane.b32.xlu1 %v2973_v28, %s2746_s28  ;;  %1185 = vrot.lane.b32.xlu0 %v2967_v24, %s2746_s28  ;;  %s3204_s28 = sld [smem:[#allocation8 + $0x37]] }
 0x148   : > { %5388 = vst [vmem:[#allocation41_spill] sm:$0xff] %v3264_v9  ;;  %v298_v9 = vmul.f32 %v5410_v41, %v287_v63 }
 0x149   : > { %v3177_v15 = vpop.permute.xlu1 %641  ;;  %v3179_v16 = vpop.permute.xlu0 %639 }
 0x14a   : > { %5381 = vst [vmem:[#allocation35_spill] sm:$0xff] %v3177_v15  ;;  %5382 = vst [vmem:[#allocation36_spill] sm:$0xff] %v3179_v16  ;;  %v3278_v16 = vmul.f32 %v3157_v11, %v3231_v25 }
 0x14b   : > { %1245 = vrot.lane.b32.xlu1 %v2979_v31, %s5261_s17  ;;  %1243 = vrot.lane.b32.xlu0 %v2971_v27, %s5261_s17  ;;  %s3229_s17 = sld [smem:[#allocation8 + $0x38]] }
 0x14c   : > { %5391 = vst [vmem:[#allocation44_spill] sm:$0xff] %v3278_v16  ;;  %v3379_v16 = vmul.f32 %v3215_v30, %v3231_v25 }
 0x14d   : > { %v3219_v6 = vpop.permute.xlu1 %673  ;;  %v3221_v3 = vpop.permute.xlu0 %671 }
 0x14e   : > { %5383 = vst [vmem:[#allocation37_spill] sm:$0xff] %v3219_v6  ;;  %5384 = vst [vmem:[#allocation38_spill] sm:$0xff] %v3221_v3  ;;  %v3239_v3 = vmul.f32 %v3186_v19, %v216_v7 }
 0x14f   : > { %1252 = vrot.lane.b32.xlu1 %v2973_v28, %s5386_s2  ;;  %1250 = vrot.lane.b32.xlu0 %v2967_v24, %s5386_s2  ;;  %s3280_s2 = sld [smem:[#allocation8 + $0xa]]  ;;  %5406 = vst [vmem:[#allocation58_spill] sm:$0xff] %v3379_v16 }
 0x151   : > { %v3268_v6 = vpop.permute.xlu1 %680  ;;  %v3270_v15 = vpop.permute.xlu0 %678 }
 0x152   : > { %5389 = vst [vmem:[#allocation42_spill] sm:$0xff] %v3268_v6  ;;  %5390 = vst [vmem:[#allocation43_spill] sm:$0xff] %v3270_v15  ;;  %v3319_v15 = vmul.f32 %v3161_v12, %v3231_v25 }
 0x153   : > { %1284 = vrot.lane.b32.xlu1 %v2979_v31, %s5279_s22  ;;  %1282 = vrot.lane.b32.xlu0 %v2971_v27, %s5279_s22  ;;  %s3325_s22 = sld [smem:[#allocation8 + $0xd]] }
 0x154   : > { %5394 = vst [vmem:[#allocation47_spill] sm:$0xff] %v3319_v15  ;;  %v293_v15 = vsel %vm285_vm1, %v3041_v35, %v3035_v33 }
 0x155   : > { %v3321_v1 = vpop.permute.xlu1 %712  ;;  %v3323_v6 = vpop.permute.xlu0 %710  ;;  %v301_v63 = vmul.f32 %v5414_v37, %v293_v15  ;;  %v365_v15 = vsel %vm363_vm3, %v3057_v40, %v3051_v38 }
 0x156   : > { %5395 = vst [vmem:[#allocation48_spill] sm:$0xff] %v3321_v1  ;;  %5396 = vst [vmem:[#allocation49_spill] sm:$0xff] %v3323_v6  ;;  %v3361_v6 = vmul.f32 %v3195_v21, %v3231_v25  ;;  %v3363_v1 = vld [vmem:[#allocation6 + $0x2] ss:$8 sm:$0x3] }
 0x157   : > { %1291 = vrot.lane.b32.xlu1 %v2973_v28, %s5400_s11  ;;  %1289 = vrot.lane.b32.xlu0 %v2967_v24, %s5400_s11  ;;  %s3381_s11 = sld [smem:[#allocation8 + $0x40]]  ;;  %v3396_v25 = vmul.f32 %v3157_v11, %v3363_v1  ;;  %v3438_v7 = vmul.f32 %v3149_v8, %v3363_v1 }
 0x158   : > { %5402 = vst [vmem:[#allocation54_spill] sm:$0xff] %v3361_v6  ;;  %v5412_v6 = vstv %s3144_s29  ;;  %s3523_s29 = sld [smem:[#allocation8 + $0x43]] }
 0x159   : > { %v3373_v2 = vpop.permute.xlu1 %719  ;;  %v3375_v5 = vpop.permute.xlu0 %717  ;;  %5407 = vst [vmem:[#allocation59_spill] sm:$0xff] %v3396_v25  ;;  %v292_v25 = vsel %vm285_vm1, %v3035_v33, %v3041_v35  ;;  %v337_v26 = vmul.f32 %v5412_v6, %v326_v60  ;;  %v3495_v35 = vmul.f32 %v3161_v12, %v3363_v1  ;;  %v5415_v60 = vstv %s3141_s24  ;;  %s3521_s24 = sld [smem:[#allocation8 + $0x12]] }
 0x15a   : > { %5404 = vst [vmem:[#allocation56_spill] sm:$0xff] %v3373_v2  ;;  %5405 = vst [vmem:[#allocation57_spill] sm:$0xff] %v3375_v5  ;;  %v299_v2 = vmul.f32 %v5410_v41, %v286_v36  ;;  %v370_v36 = vsel %vm363_vm3, %v3065_v43, %v3063_v42  ;;  %v302_v41 = vmul.f32 %v5414_v37, %v292_v25  ;;  %v5484_v25 = vld [vmem:[#allocation38_spill] sm:$0xff]  ;;  %vm909_vm1 = vcmp.lt.s32.totalorder %v3208_v23, 17 }
 0x15b   : > { %1323 = vrot.lane.b32.xlu1 %v2979_v31, %s2749_s27  ;;  %1321 = vrot.lane.b32.xlu0 %v2971_v27, %s2749_s27 }
 0x15c   : > { %v304_v37 = vadd.f32 %v302_v41, %v299_v2  ;;  %v3545_v2 = vmul.f32 %v3168_v13, %v3363_v1  ;;  %v410_v41 = vsel %vm402_vm4, %v3075_v46, %v3077_v47 }
 0x15d   : > { %v3405_v5 = vpop.permute.xlu1 %751  ;;  %v3407_v62 = vpop.permute.xlu0 %749 }
 0x15e   : > { %5408 = vst [vmem:[#allocation60_spill] sm:$0xff] %v3405_v5  ;;  %5409 = vst [vmem:[#allocation61_spill] sm:$0xff] %v3407_v62  ;;  %v5413_v62 = vmov %v5412_v6 }
 0x15f   : > { %1330 = vrot.lane.b32.xlu1 %v2973_v28, %s2749_s27  ;;  %1328 = vrot.lane.b32.xlu0 %v2967_v24, %s2749_s27  ;;  %v338_v5 = vmul.f32 %v5413_v62, %v325_v0  ;;  %s3484_s27 = sld [smem:[#allocation8 + $0x42]]  ;;  %v340_v62 = vmul.f32 %v5415_v60, %v332_v34  ;;  %v5416_v0 = vmov %v5415_v60  ;;  %v303_v34 = vadd.f32 %v301_v63, %v298_v9 }
 0x160   : > { %v341_v6 = vmul.f32 %v5416_v0, %v331_v4  ;;  %v5417_v60 = vstv %s3159_s10  ;;  %v364_v9 = vsel %vm363_vm3, %v3051_v38, %v3057_v40  ;;  %v5422_v38 = vrot.slane %v3184_v18, %v3171_v14  ;;  %s2752_s10 = smov 113  }
 0x161   : > { %v3467_v16 = vpop.permute.xlu1 %758  ;;  %v3469_v39 = vpop.permute.xlu0 %756  ;;  %v379_v4 = vmul.f32 %v5417_v60, %v371_v32  ;;  %v342_v42 = vadd.f32 %v340_v62, %v337_v26  ;;  %v5419_v32 = vstv %s3146_s25  ;;  %s3626_s25 = sld [smem:[#allocation8 + $0x44]]  ;;  %vm987_vm3 = vcmp.lt.s32.totalorder %v3208_v23, 15 }
 0x162   : > { %5411 = vst [vmem:[#allocation62_spill] sm:$0xff] %v3469_v39  ;;  %v343_v43 = vadd.f32 %v341_v6, %v338_v5  ;;  %v376_v63 = vmul.f32 %v5419_v32, %v365_v15  ;;  %v5420_v5 = vmov %v5419_v32  ;;  %v5421_v6 = vrot.slane %v3191_v20, %v3171_v14 }
 0x163   : > { %1362 = vrot.lane.b32.xlu1 %v2979_v31, %s2750_s0  ;;  %1360 = vrot.lane.b32.xlu0 %v2971_v27, %s2750_s0  ;;  %v377_v62 = vmul.f32 %v5420_v5, %v364_v9  ;;  %v355_v26 = vmul.f32 %v5422_v38, %v342_v42  ;;  %v5423_v9 = vrot.slane %v3184_v18, %v3181_v17 }
 0x164   : > { %v316_v15 = vmul.f32 %v5421_v6, %v303_v34  ;;  %v404_v18 = vsel %vm402_vm4, %v3069_v44, %v3071_v45  ;;  %v5480_v34 = vld [vmem:[#allocation43_spill] sm:$0xff] }
 0x165   : > { %v3515_v0 = vpop.permute.xlu1 %790  ;;  %v3517_v33 = vpop.permute.xlu0 %788  ;;  %v356_v5 = vmul.f32 %v5423_v9, %v343_v43 }
 0x166   : > { %5418 = vst [vmem:[#allocation63_spill] sm:$0xff] %v3517_v33  ;;  %v380_v33 = vmul.f32 %v5417_v60, %v370_v36  ;;  %v381_v36 = vadd.f32 %v379_v4, %v376_v63  ;;  %v3569_v4 = vmul.f32 %v3186_v19, %v3363_v1  ;;  %v5425_v63 = vrot.slane %v3191_v20, %v3181_v17 }
 0x167   : > { %1369 = vrot.lane.b32.xlu1 %v2973_v28, %s2750_s0  ;;  %1367 = vrot.lane.b32.xlu0 %v2967_v24, %s2750_s0  ;;  %s3571_s0 = sld [smem:[#allocation8 + $0x13]]  ;;  %v409_v19 = vsel %vm402_vm4, %v3077_v47, %v3075_v46  ;;  %v403_v20 = vsel %vm402_vm4, %v3071_v45, %v3069_v44  ;;  %v357_v47 = vadd.f32 %v355_v26, %v316_v15  ;;  %v5479_v45 = vld [vmem:[#allocation42_spill] sm:$0xff]  ;;  %vm1026_vm4 = vcmp.lt.s32.totalorder %v3208_v23, 14 }
 0x168   : > { %5424 = vst [vmem:[#allocation64_spill] sm:$0xff] %v3569_v4  ;;  %v317_v6 = vmul.f32 %v5425_v63, %v304_v37  ;;  %v382_v40 = vadd.f32 %v380_v33, %v377_v62  ;;  %v5426_v33 = vstv %s3166_s20  ;;  %v5427_v37 = vrot.slane %v3200_v22, %v3171_v14  ;;  %s3698_s20 = sld [smem:[#allocation8 + $0x15]] }
 0x169   : > { %v3556_v32 = vpop.permute.xlu1 %797  ;;  %v3558_v60 = vpop.permute.xlu0 %795  ;;  %v418_v42 = vmul.f32 %v5426_v33, %v410_v41  ;;  %v5428_v41 = vstv %s3163_s18  ;;  %v419_v43 = vmul.f32 %v5426_v33, %v409_v19  ;;  %v448_v26 = vsel %vm441_vm5, %v3089_v51, %v3087_v50  ;;  %s3676_s18 = sld [smem:[#allocation8 + $0x45]] }
 0x16a   : > { %v394_v38 = vmul.f32 %v5427_v37, %v381_v36  ;;  %v415_v63 = vmul.f32 %v5428_v41, %v404_v18  ;;  %v449_v15 = vsel %vm441_vm5, %v3087_v50, %v3089_v51  ;;  %v358_v36 = vadd.f32 %v356_v5, %v317_v6 }
 0x16b   : > { %1401 = vrot.lane.b32.xlu1 %v2979_v31, %s2751_s23  ;;  %1399 = vrot.lane.b32.xlu0 %v2971_v27, %s2751_s23  ;;  %v5429_v37 = vrot.slane %v3200_v22, %v3181_v17  ;;  %v5430_v46 = vmov %v5428_v41  ;;  %v442_v50 = vsel %vm441_vm5, %v3083_v49, %v3081_v48  ;;  %v443_v51 = vsel %vm441_vm5, %v3081_v48, %v3083_v49 }
 0x16c   : > { %v416_v18 = vmul.f32 %v5430_v46, %v403_v20  ;;  %v420_v41 = vadd.f32 %v418_v42, %v415_v63  ;;  %v487_v42 = vsel %vm480_vm6, %v3101_v55, %v3099_v54  ;;  %v488_v46 = vsel %vm480_vm6, %v3099_v54, %v3101_v55 }
 0x16d   : > { %v3600_v62 = vpop.permute.xlu1 %829  ;;  %v3602_v9 = vpop.permute.xlu0 %827  ;;  %v395_v44 = vmul.f32 %v5429_v37, %v382_v40  ;;  %v5431_v40 = vstv %s3175_s7  ;;  %v396_v63 = vadd.f32 %v394_v38, %v357_v47  ;;  %v5434_v37 = vstv %s3173_s5  ;;  %s3712_s5 = sld [smem:[#allocation8 + $0x46]] }
 0x16e   : > { %v457_v5 = vmul.f32 %v5431_v40, %v449_v15  ;;  %v5432_v6 = vmov %v5431_v40  ;;  %v421_v33 = vadd.f32 %v419_v43, %v416_v18  ;;  %v454_v40 = vmul.f32 %v5434_v37, %v443_v51  ;;  %s3732_s7 = sld [smem:[#allocation8 + $0x16]] }
 0x16f   : > { %1408 = vrot.lane.b32.xlu1 %v2973_v28, %s2751_s23  ;;  %1406 = vrot.lane.b32.xlu0 %v2967_v24, %s2751_s23  ;;  %v458_v20 = vmul.f32 %v5432_v6, %v448_v26  ;;  %v3658_v26 = vmul.f32 %v3195_v21, %v3363_v1  ;;  %v5435_v6 = vmov %v5434_v37  ;;  %v481_v54 = vsel %vm480_vm6, %v3095_v53, %v3093_v52  ;;  %s3813_s23 = sld [smem:[#allocation8 + $0x18]] }
 0x170   : > { %v455_v22 = vmul.f32 %v5435_v6, %v442_v50  ;;  %v482_v55 = vsel %vm480_vm6, %v3093_v52, %v3095_v53  ;;  %v5436_v21 = vstv %s3193_s9  ;;  %v526_v18 = vsel %vm519_vm7, %v3113_v59, %v3111_v58  ;;  %s2753_s9 = smov 112  }
 0x171   : > { %v3651_v48 = vpop.permute.xlu1 %836  ;;  %v3653_v49 = vpop.permute.xlu0 %834  ;;  %5433 = vst [vmem:[#allocation65_spill] sm:$0xff] %v3658_v26  ;;  %v496_v43 = vmul.f32 %v5436_v21, %v488_v46  ;;  %v5437_v47 = vmov %v5436_v21  ;;  %v527_v52 = vsel %vm519_vm7, %v3111_v58, %v3113_v59  ;;  %v397_v53 = vadd.f32 %v395_v44, %v358_v36 }
 0x172   : > { %v497_v38 = vmul.f32 %v5437_v47, %v487_v42  ;;  %v5438_v50 = vrot.slane %v3213_v29, %v3171_v14  ;;  %v459_v42 = vadd.f32 %v457_v5, %v454_v40  ;;  %v460_v46 = vadd.f32 %v458_v20, %v455_v22 }
 0x173   : > { %1440 = vrot.lane.b32.xlu1 %v2979_v31, %s2752_s10  ;;  %1438 = vrot.lane.b32.xlu0 %v2971_v27, %s2752_s10  ;;  %v5439_v21 = vstv %s3188_s8  ;;  %v520_v44 = vsel %vm519_vm7, %v3107_v57, %v3105_v56  ;;  %v521_v36 = vsel %vm519_vm7, %v3105_v56, %v3107_v57  ;;  %v5442_v5 = vstv %s3204_s28  ;;  %s3749_s8 = sld [smem:[#allocation8 + $0x47]]  ;;  %s3776_s28 = sld [smem:[#allocation8 + $0x48]]  ;;  %v5466_v57 = vld [vmem:[#allocation30_spill] sm:$0xff] }
 0x174   : > { %v433_v51 = vmul.f32 %v5438_v50, %v420_v41  ;;  %v493_v47 = vmul.f32 %v5439_v21, %v482_v55  ;;  %v5440_v58 = vmov %v5439_v21  ;;  %v5441_v41 = vrot.slane %v3213_v29, %v3181_v17  ;;  %v3723_v50 = vld [vmem:[#allocation6 + $0x3] ss:$8 sm:$0x3] }
 0x175   : > { %v3694_v37 = vpop.permute.xlu1 %868  ;;  %v3696_v6 = vpop.permute.xlu0 %866  ;;  %v494_v59 = vmul.f32 %v5440_v58, %v481_v54  ;;  %v535_v20 = vmul.f32 %v5442_v5, %v527_v52  ;;  %v5443_v40 = vmov %v5442_v5  ;;  %v3730_v29 = vmul.f32 %v3215_v30, %v3363_v1  ;;  %v5473_v5 = vld [vmem:[#allocation34_spill] sm:$0xff] }
 0x176   : > { %v434_v22 = vmul.f32 %v5441_v41, %v421_v33  ;;  %v536_v54 = vmul.f32 %v5443_v40, %v526_v18  ;;  %v498_v21 = vadd.f32 %v496_v43, %v493_v47  ;;  %v5445_v33 = vrot.slane %v3239_v3, %v3171_v14 }
 0x177   : > { %1447 = vrot.lane.b32.xlu1 %v2973_v28, %s2752_s10  ;;  %v499_v56 = vadd.f32 %v497_v38, %v494_v59  ;;  %1445 = vrot.lane.b32.xlu0 %v2967_v24, %s2752_s10  ;;  %5444 = vst [vmem:[#allocation66_spill] sm:$0xff] %v3730_v29  ;;  %v5446_v43 = vrot.slane %v3239_v3, %v3181_v17  ;;  %v5447_v38 = vstv %s3202_s21  ;;  %s3762_s21 = sld [smem:[#allocation8 + $0x17]]  ;;  %s3815_s10 = sld [smem:[#allocation8 + $0x49]]  ;;  %v5493_v29 = vld [vmem:[#allocation49_spill] sm:$0xff]  ;;  %vm1065_vm5 = vcmp.lt.s32.totalorder %v3208_v23, 13 }
 0x178   : > { %v472_v18 = vmul.f32 %v5445_v33, %v459_v42  ;;  %v532_v47 = vmul.f32 %v5447_v38, %v521_v36  ;;  %v5448_v58 = vmov %v5447_v38  ;;  %v435_v30 = vadd.f32 %v433_v51, %v396_v63 }
 0x179   : > { %v473_v52 = vmul.f32 %v5446_v43, %v460_v46  ;;  %v533_v59 = vmul.f32 %v5448_v58, %v520_v44  ;;  %v3745_v41 = vpop.permute.xlu1 %875  ;;  %v3747_v1 = vpop.permute.xlu0 %873  ;;  %v3756_v3 = vmul.f32 %v3157_v11, %v3723_v50  ;;  %v436_v46 = vadd.f32 %v434_v22, %v397_v53  ;;  %v5472_v58 = vld [vmem:[#allocation33_spill] sm:$0xff] }
 0x17a   : > { %v537_v36 = vadd.f32 %v535_v20, %v532_v47  ;;  %v5450_v51 = vrot.slane %v3253_v10, %v3171_v14  ;;  %v5451_v11 = vrot.slane %v3253_v10, %v3181_v17  ;;  %v3785_v10 = vmul.f32 %v3149_v8, %v3723_v50  ;;  %v5458_v20 = vld [vmem:[#allocation28_spill] sm:$0xff] }
 0x17b   : > { %5449 = vst [vmem:[#allocation67_spill] sm:$0xff] %v3756_v3  ;;  %v538_v44 = vadd.f32 %v536_v54, %v533_v59  ;;  %1479 = vrot.lane.b32.xlu1 %v2979_v31, %s2753_s9  ;;  %1477 = vrot.lane.b32.xlu0 %v2971_v27, %s2753_s9  ;;  %v474_v54 = vadd.f32 %v472_v18, %v435_v30  ;;  %v5454_v59 = vld [vmem:[#allocation41_spill] sm:$0xff]  ;;  %v5492_v3 = vld [vmem:[#allocation48_spill] sm:$0xff]  ;;  %vm1104_vm6 = vcmp.lt.s32.totalorder %v3208_v23, 3  ;;  %vm1143_vm7 = vcmp.lt.s32.totalorder %v3208_v23, 2 }
 0x17c   : > { %v511_v40 = vmul.f32 %v5450_v51, %v498_v21  ;;  %v512_v53 = vmul.f32 %v5451_v11, %v499_v56  ;;  %v475_v33 = vadd.f32 %v473_v52, %v436_v46  ;;  %5452 = vst [vmem:[#allocation68_spill] sm:$0xff] %v3785_v10  ;;  %v5453_v56 = vld [vmem:[#allocation26_spill] sm:$0xff]  ;;  %v5455_v30 = vrot.slane %v5454_v59, %v3171_v14  ;;  %v5457_v11 = vld [vmem:[#allocation27_spill] sm:$0xff] }
 0x17d   : > { %v3778_v43 = vpop.permute.xlu1 %907  ;;  %v3780_v21 = vpop.permute.xlu0 %905  ;;  %v560_v47 = vsel %vm558_vm8, %v5453_v56, %v3119_v61  ;;  %v5456_v8 = vrot.slane %v5454_v59, %v3181_v17  ;;  %v565_v22 = vsel %vm558_vm8, %v5458_v20, %v5457_v11  ;;  %v566_v18 = vsel %vm558_vm8, %v5457_v11, %v5458_v20  ;;  %v5462_v20 = vld [vmem:[#allocation31_spill] sm:$0xff] }
 0x17e   : > { %v550_v46 = vmul.f32 %v5455_v30, %v537_v36  ;;  %v513_v36 = vadd.f32 %v511_v40, %v474_v54  ;;  %v559_v59 = vsel %vm558_vm8, %v3119_v61, %v5453_v56  ;;  %v5459_v30 = vstv %s3217_s6 }
 0x17f   : > { %v551_v51 = vmul.f32 %v5456_v8, %v538_v44  ;;  %1486 = vrot.lane.b32.xlu1 %v2973_v28, %s2753_s9  ;;  %v514_v44 = vadd.f32 %v512_v53, %v475_v33  ;;  %1484 = vrot.lane.b32.xlu0 %v2967_v24, %s2753_s9  ;;  %v571_v8 = vmul.f32 %v5459_v30, %v560_v47  ;;  %v5460_v53 = vstv %s3229_s17  ;;  %v5463_v47 = vld [vmem:[#allocation32_spill] sm:$0xff]  ;;  %s2754_s17 = smov 111   ;;  %s5467_s9 = sld [smem:[#allocation39_spill]] }
 0x180   : > { %v574_v54 = vmul.f32 %v5460_v53, %v566_v18  ;;  %v5461_v33 = vmov %v5460_v53  ;;  %v604_v30 = vsel %vm597_vm9, %v5463_v47, %v5462_v20  ;;  %v605_v40 = vsel %vm597_vm9, %v5462_v20, %v5463_v47 }
 0x181   : > { %v3827_v11 = vpop.permute.xlu1 %914  ;;  %v575_v56 = vmul.f32 %v5461_v33, %v565_v22  ;;  %v3846_v52 = vpop.permute.xlu0 %912  ;;  %v3848_v42 = vadd.f32 %v550_v46, %v513_v36  ;;  %v3850_v61 = vadd.f32 %v551_v51, %v514_v44  ;;  %v5464_v18 = vstv %s3217_s6  ;;  %v5465_v33 = vld [vmem:[#allocation29_spill] sm:$0xff]  ;;  %v5471_v22 = vld [vmem:[#allocation36_spill] sm:$0xff]  ;;  %s4382_s6 = sld [smem:[#allocation8 + $0x19]] }
 0x182   : > { %v572_v53 = vmul.f32 %v5464_v18, %v559_v59  ;;  %v598_v38 = vsel %vm597_vm9, %v5466_v57, %v5465_v33  ;;  %v599_v46 = vsel %vm597_vm9, %v5465_v33, %v5466_v57  ;;  %v3868_v36 = vmul.f32 %v3161_v12, %v3723_v50  ;;  %v5470_v18 = vld [vmem:[#allocation35_spill] sm:$0xff] }
 0x183   : > { %1518 = vrot.lane.b32.xlu1 %v2979_v31, %s2754_s17  ;;  %1516 = vrot.lane.b32.xlu0 %v2971_v27, %s2754_s17  ;;  %v5468_v44 = vstv %s3243_s1  ;;  %v643_v57 = vsel %vm636_vm10, %v5471_v22, %v5470_v18  ;;  %v644_v33 = vsel %vm636_vm10, %v5470_v18, %v5471_v22  ;;  %v576_v12 = vadd.f32 %v574_v54, %v571_v8  ;;  %s5474_s1 = sld [smem:[#allocation40_spill]]  ;;  %v5486_v54 = vld [vmem:[#allocation57_spill] sm:$0xff] }
 0x184   : > { %v613_v59 = vmul.f32 %v5468_v44, %v605_v40  ;;  %v5469_v20 = vmov %v5468_v44  ;;  %v577_v19 = vadd.f32 %v575_v56, %v572_v53  ;;  %v637_v40 = vsel %vm636_vm10, %v5473_v5, %v5472_v58 }
 0x185   : > { %v614_v47 = vmul.f32 %v5469_v20, %v604_v30  ;;  %v3882_v51 = vpop.permute.xlu1 %946  ;;  %v638_v30 = vsel %vm636_vm10, %v5472_v58, %v5473_v5  ;;  %v3892_v44 = vpop.permute.xlu0 %944  ;;  %v5475_v20 = vstv %s5467_s9  ;;  %v5477_v56 = vstv %s3266_s14  ;;  %s2755_s14 = smov 110   ;;  %s4581_s9 = sld [smem:[#allocation8 + $0x50]] }
 0x186   : > { %v610_v22 = vmul.f32 %v5475_v20, %v599_v46  ;;  %v5476_v18 = vmov %v5475_v20  ;;  %v652_v53 = vmul.f32 %v5477_v56, %v644_v33  ;;  %v5478_v15 = vmov %v5477_v56  ;;  %v5483_v56 = vld [vmem:[#allocation37_spill] sm:$0xff] }
 0x187   : > { %v611_v63 = vmul.f32 %v5476_v18, %v598_v38  ;;  %1525 = vrot.lane.b32.xlu1 %v2973_v28, %s2754_s17  ;;  %v653_v55 = vmul.f32 %v5478_v15, %v643_v57  ;;  %v682_v5 = vsel %vm675_vm11, %v5480_v34, %v5479_v45  ;;  %v683_v58 = vsel %vm675_vm11, %v5479_v45, %v5480_v34  ;;  %v5485_v45 = vld [vmem:[#allocation56_spill] sm:$0xff] }
 0x188   : > { %1523 = vrot.lane.b32.xlu0 %v2967_v24, %s2754_s17  ;;  %v615_v38 = vadd.f32 %v613_v59, %v610_v22  ;;  %v676_v39 = vsel %vm675_vm11, %v5484_v25, %v5483_v56  ;;  %v677_v34 = vsel %vm675_vm11, %v5483_v56, %v5484_v25  ;;  %v722_v59 = vsel %vm714_vm12, %v5485_v45, %v5486_v54  ;;  %s4579_s17 = sld [smem:[#allocation8 + $0x1f]] }
 0x189   : > { %v616_v46 = vadd.f32 %v614_v47, %v611_v63  ;;  %v5481_v33 = vstv %s5474_s1  ;;  %v3919_v18 = vpop.permute.xlu1 %953  ;;  %v721_v63 = vsel %vm714_vm12, %v5486_v54, %v5485_v45  ;;  %v3937_v47 = vpop.permute.xlu0 %951  ;;  %v715_v26 = vsel %vm714_vm12, %v5493_v29, %v5492_v3  ;;  %s2767_s1 = smov 80  }
 0x18a   : > { %v649_v15 = vmul.f32 %v5481_v33, %v638_v30  ;;  %v5482_v57 = vmov %v5481_v33  ;;  %vm1182_vm8 = vcmp.lt.s32.totalorder %v3208_v23, 1  ;;  %vm1247_vm9 = vcmp.lt.s32.totalorder %v3208_v23, 127 }
 0x18b   : > { %v650_v20 = vmul.f32 %v5482_v57, %v637_v40  ;;  %v5487_v40 = vld [vmem:[#allocation44_spill] sm:$0xff]  ;;  %v5490_v57 = vstv %s3282_s13  ;;  %1557 = vrot.lane.b32.xlu1 %v2979_v31, %s2755_s14  ;;  %s5514_s13 = sld [smem:[#allocation46_spill]]  ;;  %vm1286_vm10 = vcmp.lt.s32.totalorder %v3208_v23, 126  ;;  %vm1325_vm11 = vcmp.lt.s32.totalorder %v3208_v23, 125 }
 0x18c   : > { %v5488_v30 = vrot.slane %v5487_v40, %v3171_v14  ;;  %v5489_v22 = vrot.slane %v5487_v40, %v3181_v17  ;;  %v691_v56 = vmul.f32 %v5490_v57, %v683_v58  ;;  %v5491_v8 = vmov %v5490_v57  ;;  %1555 = vrot.lane.b32.xlu0 %v2971_v27, %s2755_s14 }
 0x18d   : > { %v692_v10 = vmul.f32 %v5491_v8, %v682_v5  ;;  %v654_v54 = vadd.f32 %v652_v53, %v649_v15  ;;  %v655_v45 = vadd.f32 %v653_v55, %v650_v20  ;;  %v5496_v5 = vstv %s3294_s19  ;;  %v3968_v40 = vpop.permute.xlu1 %985  ;;  %v3976_v4 = vpop.permute.xlu0 %983  ;;  %s5529_s19 = sld [smem:[#allocation51_spill]] }
 0x18e   : > { %v589_v25 = vmul.f32 %v5488_v30, %v576_v12  ;;  %v590_v33 = vmul.f32 %v5489_v22, %v577_v19  ;;  %v716_v19 = vsel %vm714_vm12, %v5492_v3, %v5493_v29  ;;  %v5494_v12 = vstv %s3280_s2  ;;  %v5498_v30 = vld [vmem:[#allocation45_spill] sm:$0xff]  ;;  %s4403_s2 = sld [smem:[#allocation8 + $0x4a]] }
 0x18f   : > { %v688_v8 = vmul.f32 %v5494_v12, %v677_v34  ;;  %v5495_v53 = vmov %v5494_v12  ;;  %v730_v58 = vmul.f32 %v5496_v5, %v722_v59  ;;  %v5497_v15 = vmov %v5496_v5  ;;  %1564 = vrot.lane.b32.xlu1 %v2973_v28, %s2755_s14 }
 0x190   : > { %v689_v55 = vmul.f32 %v5495_v53, %v676_v39  ;;  %v731_v20 = vmul.f32 %v5497_v15, %v721_v63  ;;  %v5499_v22 = vrot.slane %v5498_v30, %v3171_v14  ;;  %v5500_v29 = vrot.slane %v5498_v30, %v3181_v17  ;;  %v5503_v30 = vld [vmem:[#allocation47_spill] sm:$0xff]  ;;  %1562 = vrot.lane.b32.xlu0 %v2967_v24, %s2755_s14  ;;  %s4604_s14 = sld [smem:[#allocation8 + $0x20]] }
 0x191   : > { %v693_v59 = vadd.f32 %v691_v56, %v688_v8  ;;  %v5501_v12 = vstv %s3292_s15  ;;  %v5506_v8 = vld [vmem:[#allocation62_spill] sm:$0xff]  ;;  %s2756_s15 = smov 109   ;;  %vm1364_vm12 = vcmp.lt.s32.totalorder %v3208_v23, 115 }
 0x192   : > { %v628_v57 = vmul.f32 %v5499_v22, %v615_v38  ;;  %v629_v3 = vmul.f32 %v5500_v29, %v616_v46  ;;  %v694_v63 = vadd.f32 %v692_v10, %v689_v55  ;;  %v727_v53 = vmul.f32 %v5501_v12, %v716_v19 }
 0x193   : > { %v5502_v5 = vmov %v5501_v12  ;;  %v591_v38 = vadd.f32 %v589_v25, %v3848_v42  ;;  %v592_v46 = vadd.f32 %v590_v33, %v3850_v61  ;;  %v5504_v22 = vrot.slane %v5503_v30, %v3171_v14  ;;  %v4006_v25 = vpop.permute.xlu1 %992  ;;  %1596 = vrot.lane.b32.xlu1 %v2979_v31, %s2756_s15 }
 0x194   : > { %v728_v15 = vmul.f32 %v5502_v5, %v715_v26  ;;  %v5505_v10 = vrot.slane %v5503_v30, %v3181_v17  ;;  %v732_v26 = vadd.f32 %v730_v58, %v727_v53  ;;  %v760_v42 = vsel %vm753_vm13, %v5506_v8, %v3467_v16  ;;  %v5509_v53 = vld [vmem:[#allocation50_spill] sm:$0xff]  ;;  %1594 = vrot.lane.b32.xlu0 %v2971_v27, %s2756_s15 }
 0x195   : > { %v667_v29 = vmul.f32 %v5504_v22, %v654_v54  ;;  %v761_v61 = vsel %vm753_vm13, %v3467_v16, %v5506_v8  ;;  %v630_v33 = vadd.f32 %v628_v57, %v591_v38  ;;  %v631_v54 = vadd.f32 %v629_v3, %v592_v46  ;;  %v5512_v57 = vld [vmem:[#allocation60_spill] sm:$0xff]  ;;  %v5513_v3 = vld [vmem:[#allocation61_spill] sm:$0xff] }
 0x196   : > { %v668_v56 = vmul.f32 %v5505_v10, %v655_v45  ;;  %v733_v19 = vadd.f32 %v731_v20, %v728_v15  ;;  %v4008_v45 = vpop.permute.xlu0 %990  ;;  %v5507_v55 = vstv %s3813_s23  ;;  %v5508_v20 = vstv %s3815_s10  ;;  %s2766_s10 = smov 81  }
 0x197   : > { %v4013_v58 = vmul.f32 %v5507_v55, %v2971_v27  ;;  %v4018_v12 = vmul.f32 %v5508_v20, %v2967_v24  ;;  %v5510_v16 = vrot.slane %v5509_v53, %v3171_v14  ;;  %v5511_v15 = vrot.slane %v5509_v53, %v3181_v17  ;;  %1603 = vrot.lane.b32.xlu1 %v2973_v28, %s2756_s15 }
 0x198   : > { %v754_v38 = vsel %vm753_vm13, %v5513_v3, %v5512_v57  ;;  %v755_v46 = vsel %vm753_vm13, %v5512_v57, %v5513_v3  ;;  %v669_v53 = vadd.f32 %v667_v29, %v630_v33  ;;  %v800_v29 = vsel %vm792_vm14, %v3556_v32, %v3558_v60  ;;  %v5523_v33 = vld [vmem:[#allocation63_spill] sm:$0xff]  ;;  %1601 = vrot.lane.b32.xlu0 %v2967_v24, %s2756_s15  ;;  %s2768_s15 = smov 79  }
 0x199   : > { %v706_v5 = vmul.f32 %v5510_v16, %v693_v59  ;;  %v707_v30 = vmul.f32 %v5511_v15, %v694_v63  ;;  %v5515_v59 = vstv %s3309_s3  ;;  %v5517_v63 = vmov %v5508_v20  ;;  %v5518_v15 = vld [vmem:[#allocation53_spill] sm:$0xff]  ;;  %s5524_s3 = sld [smem:[#allocation52_spill]] }
 0x19a   : > { %v769_v22 = vmul.f32 %v5515_v59, %v761_v61  ;;  %v5516_v10 = vmov %v5515_v59  ;;  %v4043_v55 = vmul.f32 %v5517_v63, %v2973_v28  ;;  %v4047_v20 = vmul.f32 %v3168_v13, %v3723_v50  ;;  %v4056_v59 = vpop.permute.xlu1 %1024 }
 0x19b   : > { %v770_v8 = vmul.f32 %v5516_v10, %v760_v42  ;;  %v670_v16 = vadd.f32 %v668_v56, %v631_v54  ;;  %v5519_v57 = vrot.slane %v5518_v15, %v3171_v14  ;;  %v5520_v61 = vrot.slane %v5518_v15, %v3181_v17  ;;  %v4070_v56 = vpop.permute.xlu0 %1022 }
 0x19c   : > { %v5521_v10 = vstv %s5514_s13  ;;  %v799_v13 = vsel %vm792_vm14, %v3558_v60, %v3556_v32  ;;  %v794_v54 = vsel %vm792_vm14, %v3515_v0, %v5523_v33  ;;  %vm1403_vm13 = vcmp.lt.s32.totalorder %v3208_v23, 114  ;;  %s4606_s13 = sld [smem:[#allocation8 + $0x51]] }
 0x19d   : > { %v745_v3 = vmul.f32 %v5519_v57, %v732_v26  ;;  %v746_v42 = vmul.f32 %v5520_v61, %v733_v19  ;;  %v766_v63 = vmul.f32 %v5521_v10, %v755_v46  ;;  %v5522_v39 = vmov %v5521_v10 }
 0x19e   : > { %v767_v34 = vmul.f32 %v5522_v39, %v754_v38  ;;  %v708_v26 = vadd.f32 %v706_v5, %v669_v53  ;;  %v709_v19 = vadd.f32 %v707_v30, %v670_v16  ;;  %v793_v39 = vsel %vm792_vm14, %v5523_v33, %v3515_v0  ;;  %v4095_v15 = vpop.permute.xlu1 %1031 }
 0x19f   : > { %v771_v32 = vadd.f32 %v769_v22, %v766_v63  ;;  %v838_v5 = vsel %vm831_vm15, %v3653_v49, %v3651_v48  ;;  %v839_v30 = vsel %vm831_vm15, %v3651_v48, %v3653_v49  ;;  %v5525_v46 = vstv %s3327_s26  ;;  %v4109_v49 = vpop.permute.xlu0 %1029  ;;  %s5535_s26 = sld [smem:[#allocation55_spill]] }
 0x1a0   : > { %v772_v60 = vadd.f32 %v770_v8, %v767_v34  ;;  %v747_v0 = vadd.f32 %v745_v3, %v708_v26  ;;  %v748_v38 = vadd.f32 %v746_v42, %v709_v19  ;;  %v808_v53 = vmul.f32 %v5525_v46, %v800_v29 }
 0x1a1   : > { %v5526_v16 = vmov %v5525_v46  ;;  %v5527_v34 = vstv %s3325_s22  ;;  %v832_v10 = vsel %vm831_vm15, %v3602_v9, %v3600_v62  ;;  %v833_v48 = vsel %vm831_vm15, %v3600_v62, %v3602_v9  ;;  %s2757_s22 = smov 99   ;;  %v5532_v62 = vld [vmem:[#allocation54_spill] sm:$0xff] }
 0x1a2   : > { %v809_v22 = vmul.f32 %v5526_v16, %v799_v13  ;;  %v805_v8 = vmul.f32 %v5527_v34, %v794_v54  ;;  %v5528_v57 = vmov %v5527_v34  ;;  %v5530_v3 = vstv %s5524_s3  ;;  %1635 = vrot.lane.b32.xlu1 %v2979_v31, %s2757_s22  ;;  %1633 = vrot.lane.b32.xlu0 %v2971_v27, %s2757_s22  ;;  %v4143_v16 = vpop.permute.xlu1 %1063  ;;  %s4627_s3 = sld [smem:[#allocation8 + $0x21]] }
 0x1a3   : > { %v806_v61 = vmul.f32 %v5528_v57, %v793_v39  ;;  %v847_v42 = vmul.f32 %v5530_v3, %v839_v30  ;;  %v5531_v63 = vmov %v5530_v3  ;;  %v877_v29 = vsel %vm870_vm0, %v3747_v1, %v3745_v41 }
 0x1a4   : > { %v848_v13 = vmul.f32 %v5531_v63, %v838_v5  ;;  %v878_v26 = vsel %vm870_vm0, %v3745_v41, %v3747_v1  ;;  %v5533_v9 = vrot.slane %v5532_v62, %v3171_v14  ;;  %v5534_v33 = vrot.slane %v5532_v62, %v3181_v17 }
 0x1a5   : > { %v871_v54 = vsel %vm870_vm0, %v3696_v6, %v3694_v37  ;;  %v872_v41 = vsel %vm870_vm0, %v3694_v37, %v3696_v6  ;;  %v810_v1 = vadd.f32 %v808_v53, %v805_v8  ;;  %v5536_v5 = vstv %s5529_s19  ;;  %v4158_v53 = vpop.permute.xlu0 %1061  ;;  %s4629_s19 = sld [smem:[#allocation8 + $0x52]] }
 0x1a6   : > { %v784_v19 = vmul.f32 %v5533_v9, %v771_v32  ;;  %v785_v39 = vmul.f32 %v5534_v33, %v772_v60  ;;  %v811_v32 = vadd.f32 %v809_v22, %v806_v61  ;;  %v844_v30 = vmul.f32 %v5536_v5, %v833_v48  ;;  %1642 = vrot.lane.b32.xlu1 %v2973_v28, %s2757_s22 }
 0x1a7   : > { %v5537_v46 = vmov %v5536_v5  ;;  %v5538_v34 = vstv %s3381_s11  ;;  %v916_v37 = vsel %vm909_vm1, %v3846_v52, %v3827_v11  ;;  %v917_v6 = vsel %vm909_vm1, %v3827_v11, %v3846_v52  ;;  %1640 = vrot.lane.b32.xlu0 %v2967_v24, %s2757_s22  ;;  %s2761_s11 = smov 95   ;;  %s2769_s22 = smov 78  }
 0x1a8   : > { %v845_v60 = vmul.f32 %v5537_v46, %v832_v10  ;;  %v886_v57 = vmul.f32 %v5538_v34, %v878_v26  ;;  %v5539_v3 = vmov %v5538_v34  ;;  %v849_v22 = vadd.f32 %v847_v42, %v844_v30  ;;  %v4193_v30 = vpop.permute.xlu1 %1070 }
 0x1a9   : > { %v887_v63 = vmul.f32 %v5539_v3, %v877_v29  ;;  %v5540_v61 = vstv %s5535_s26  ;;  %v910_v26 = vsel %vm909_vm1, %v3780_v21, %v3778_v43  ;;  %v911_v52 = vsel %vm909_vm1, %v3778_v43, %v3780_v21  ;;  %s4650_s26 = sld [smem:[#allocation8 + $0x22]] }
 0x1aa   : > { %v850_v8 = vadd.f32 %v848_v13, %v845_v60  ;;  %v883_v10 = vmul.f32 %v5540_v61, %v872_v41  ;;  %v5541_v48 = vmov %v5540_v61  ;;  %v955_v11 = vsel %vm948_vm2, %v3937_v47, %v3919_v18  ;;  %v5542_v13 = vld [vmem:[#allocation58_spill] sm:$0xff] }
 0x1ab   : > { %v884_v29 = vmul.f32 %v5541_v48, %v871_v54  ;;  %v956_v42 = vsel %vm948_vm2, %v3919_v18, %v3937_v47  ;;  %v5543_v62 = vrot.slane %v5542_v13, %v3171_v14  ;;  %v5544_v43 = vrot.slane %v5542_v13, %v3181_v17 }
 0x1ac   : > { %v5545_v33 = vstv %s3440_s4  ;;  %v888_v18 = vadd.f32 %v886_v57, %v883_v10  ;;  %v949_v46 = vsel %vm948_vm2, %v3892_v44, %v3882_v51  ;;  %v5547_v60 = vstv %s3423_s12  ;;  %s2758_s4 = smov 98   ;;  %s2759_s12 = smov 97  }
 0x1ad   : > { %v823_v9 = vmul.f32 %v5543_v62, %v810_v1  ;;  %v824_v21 = vmul.f32 %v5544_v43, %v811_v32  ;;  %v925_v54 = vmul.f32 %v5545_v33, %v917_v6  ;;  %v5546_v41 = vmov %v5545_v33  ;;  %v1069_v32 = vpop.permute.xlu0 %1068  ;;  %1674 = vrot.lane.b32.xlu1 %v2979_v31, %s2758_s4 }
 0x1ae   : > { %v926_v5 = vmul.f32 %v5546_v41, %v916_v37  ;;  %v889_v47 = vadd.f32 %v887_v63, %v884_v29  ;;  %v950_v1 = vsel %vm948_vm2, %v3882_v51, %v3892_v44  ;;  %v922_v34 = vmul.f32 %v5547_v60, %v911_v52  ;;  %v5551_v29 = vld [vmem:[#allocation59_spill] sm:$0xff]  ;;  %1672 = vrot.lane.b32.xlu0 %v2971_v27, %s2758_s4 }
 0x1af   : > { %v5548_v3 = vmov %v5547_v60  ;;  %v5549_v6 = vstv %s3484_s27  ;;  %v786_v10 = vadd.f32 %v784_v19, %v747_v0  ;;  %v787_v48 = vadd.f32 %v785_v39, %v748_v38  ;;  %v4224_v0 = vpop.permute.xlu1 %1102  ;;  %s4453_s27 = sld [smem:[#allocation8 + $0x1a]] }
 0x1b0   : > { %v923_v37 = vmul.f32 %v5548_v3, %v910_v26  ;;  %v964_v57 = vmul.f32 %v5549_v6, %v956_v42  ;;  %v5550_v63 = vmov %v5549_v6  ;;  %v5552_v13 = vrot.slane %v5551_v29, %v3171_v14 }
 0x1b1   : > { %v965_v61 = vmul.f32 %v5550_v63, %v955_v11  ;;  %v5553_v44 = vrot.slane %v5551_v29, %v3181_v17  ;;  %v927_v26 = vadd.f32 %v925_v54, %v922_v34  ;;  %v5554_v11 = vstv %s3455_s16  ;;  %v4232_v60 = vpop.permute.xlu0 %1100  ;;  %1681 = vrot.lane.b32.xlu1 %v2973_v28, %s2758_s4  ;;  %s2760_s16 = smov 96  }
 0x1b2   : > { %v862_v51 = vmul.f32 %v5552_v13, %v849_v22  ;;  %v928_v52 = vadd.f32 %v926_v5, %v923_v37  ;;  %v961_v42 = vmul.f32 %v5554_v11, %v950_v1  ;;  %v5555_v43 = vmov %v5554_v11  ;;  %1679 = vrot.lane.b32.xlu0 %v2967_v24, %s2758_s4  ;;  %s4652_s4 = sld [smem:[#allocation8 + $0x53]] }
 0x1b3   : > { %v863_v62 = vmul.f32 %v5553_v44, %v850_v8  ;;  %v962_v33 = vmul.f32 %v5555_v43, %v949_v46  ;;  %v825_v38 = vadd.f32 %v823_v9, %v786_v10  ;;  %v826_v19 = vadd.f32 %v824_v21, %v787_v48 }
 0x1b4   : > { %v5556_v39 = vrot.slane %v3438_v7, %v3171_v14  ;;  %v5557_v8 = vrot.slane %v3438_v7, %v3181_v17  ;;  %v966_v54 = vadd.f32 %v964_v57, %v961_v42  ;;  %v994_v9 = vsel %vm987_vm3, %v4008_v45, %v4006_v25 }
 0x1b5   : > { %v967_v5 = vadd.f32 %v965_v61, %v962_v33  ;;  %v995_v21 = vsel %vm987_vm3, %v4006_v25, %v4008_v45  ;;  %v864_v7 = vadd.f32 %v862_v51, %v825_v38  ;;  %v5558_v46 = vstv %s3813_s23  ;;  %v1108_v48 = vpop.permute.xlu0 %1107  ;;  %1713 = vrot.lane.b32.xlu1 %v2979_v31, %s2759_s12  ;;  %s4556_s23 = sld [smem:[#allocation8 + $0x4f]] }
 0x1b6   : > { %v901_v22 = vmul.f32 %v5556_v39, %v888_v18  ;;  %v902_v41 = vmul.f32 %v5557_v8, %v889_v47  ;;  %v865_v18 = vadd.f32 %v863_v62, %v826_v19  ;;  %v4247_v47 = vadd.f32 %v4018_v12, %v4013_v58  ;;  %v1110_v12 = vpop.permute.xlu1 %1109  ;;  %1711 = vrot.lane.b32.xlu0 %v2971_v27, %s2759_s12 }
 0x1b7   : > { %v4252_v1 = vmul.f32 %v5558_v46, %v2979_v31  ;;  %v5559_v34 = vrot.slane %v3495_v35, %v3171_v14  ;;  %v5560_v45 = vrot.slane %v3495_v35, %v3181_v17  ;;  %v988_v37 = vsel %vm987_vm3, %v3976_v4, %v3968_v40 }
 0x1b8   : > { %v989_v58 = vsel %vm987_vm3, %v3968_v40, %v3976_v4  ;;  %v5561_v6 = vstv %s3523_s29  ;;  %v1033_v35 = vsel %vm1026_vm4, %v4109_v49, %v4095_v15  ;;  %v1034_v10 = vsel %vm1026_vm4, %v4095_v15, %v4109_v49  ;;  %s2762_s29 = smov 94  }
 0x1b9   : > { %v940_v25 = vmul.f32 %v5559_v34, %v927_v26  ;;  %v941_v3 = vmul.f32 %v5560_v45, %v928_v52  ;;  %v1003_v57 = vmul.f32 %v5561_v6, %v995_v21  ;;  %v5562_v63 = vmov %v5561_v6  ;;  %1720 = vrot.lane.b32.xlu1 %v2973_v28, %s2759_s12 }
 0x1ba   : > { %v1004_v61 = vmul.f32 %v5562_v63, %v994_v9  ;;  %v903_v4 = vadd.f32 %v901_v22, %v864_v7  ;;  %v904_v40 = vadd.f32 %v902_v41, %v865_v18  ;;  %v5563_v29 = vrot.slane %v3545_v2, %v3171_v14  ;;  %v1142_v39 = vpop.permute.xlu1 %1141  ;;  %v1140_v41 = vpop.permute.xlu0 %1139  ;;  %1718 = vrot.lane.b32.xlu0 %v2967_v24, %s2759_s12  ;;  %s2770_s12 = smov 77  }
 0x1bb   : > { %v5564_v51 = vrot.slane %v3545_v2, %v3181_v17  ;;  %v5565_v62 = vstv %s3521_s24  ;;  %v1027_v49 = vsel %vm1026_vm4, %v4070_v56, %v4056_v59  ;;  %v1028_v2 = vsel %vm1026_vm4, %v4056_v59, %v4070_v56  ;;  %s4455_s24 = sld [smem:[#allocation8 + $0x4b]] }
 0x1bc   : > { %v979_v13 = vmul.f32 %v5563_v29, %v966_v54  ;;  %v1000_v26 = vmul.f32 %v5565_v62, %v989_v58  ;;  %v5566_v52 = vmov %v5565_v62  ;;  %v5567_v11 = vstv %s3626_s25  ;;  %s4479_s25 = sld [smem:[#allocation8 + $0x4c]] }
 0x1bd   : > { %v980_v44 = vmul.f32 %v5564_v51, %v967_v5  ;;  %v1001_v15 = vmul.f32 %v5566_v52, %v988_v37  ;;  %v1042_v42 = vmul.f32 %v5567_v11, %v1034_v10  ;;  %v5568_v43 = vmov %v5567_v11  ;;  %1752 = vrot.lane.b32.xlu1 %v2979_v31, %s2760_s16 }
 0x1be   : > { %v1043_v33 = vmul.f32 %v5568_v43, %v1033_v35  ;;  %v1072_v38 = vsel %vm1065_vm5, %v1069_v32, %v4193_v30  ;;  %v1073_v19 = vsel %vm1065_vm5, %v4193_v30, %v1069_v32  ;;  %v942_v22 = vadd.f32 %v940_v25, %v903_v4  ;;  %v1147_v10 = vpop.permute.xlu0 %1146  ;;  %1750 = vrot.lane.b32.xlu0 %v2971_v27, %s2760_s16 }
 0x1bf   : > { %v943_v8 = vadd.f32 %v941_v3, %v904_v40  ;;  %v1005_v59 = vadd.f32 %v1003_v57, %v1000_v26  ;;  %v1006_v56 = vadd.f32 %v1004_v61, %v1001_v15  ;;  %v5569_v54 = vstv %s3571_s0  ;;  %s4477_s0 = sld [smem:[#allocation8 + $0x1b]] }
 0x1c0   : > { %v1039_v5 = vmul.f32 %v5569_v54, %v1028_v2  ;;  %v5570_v9 = vmov %v5569_v54  ;;  %v1066_v7 = vsel %vm1065_vm5, %v4158_v53, %v4143_v16  ;;  %v1067_v30 = vsel %vm1065_vm5, %v4143_v16, %v4158_v53  ;;  %v1149_v53 = vpop.permute.xlu1 %1148 }
 0x1c1   : > { %v1040_v21 = vmul.f32 %v5570_v9, %v1027_v49  ;;  %v5571_v32 = vstv %s3676_s18  ;;  %v1111_v25 = vsel %vm1104_vm6, %v1108_v48, %v1110_v12  ;;  %v1112_v45 = vsel %vm1104_vm6, %v1110_v12, %v1108_v48  ;;  %1759 = vrot.lane.b32.xlu1 %v2973_v28, %s2760_s16  ;;  %s4502_s18 = sld [smem:[#allocation8 + $0x1c]] }
 0x1c2   : > { %v1081_v18 = vmul.f32 %v5571_v32, %v1073_v19  ;;  %v5572_v46 = vmov %v5571_v32  ;;  %v981_v3 = vadd.f32 %v979_v13, %v942_v22  ;;  %v982_v37 = vadd.f32 %v980_v44, %v943_v8  ;;  %v5577_v44 = vld [vmem:[#allocation64_spill] sm:$0xff]  ;;  %v5582_v19 = vld [vmem:[#allocation65_spill] sm:$0xff]  ;;  %1757 = vrot.lane.b32.xlu0 %v2967_v24, %s2760_s16  ;;  %s4673_s16 = sld [smem:[#allocation8 + $0x23]] }
 0x1c3   : > { %v1082_v34 = vmul.f32 %v5572_v46, %v1072_v38  ;;  %v1044_v58 = vadd.f32 %v1042_v42, %v1039_v5  ;;  %v1045_v16 = vadd.f32 %v1043_v33, %v1040_v21  ;;  %v5573_v6 = vstv %s3660_s30  ;;  %s2763_s30 = smov 93  }
 0x1c4   : > { %v1078_v57 = vmul.f32 %v5573_v6, %v1067_v30  ;;  %v5574_v63 = vmov %v5573_v6  ;;  %v1105_v35 = vsel %vm1104_vm6, %v4232_v60, %v4224_v0  ;;  %v1106_v12 = vsel %vm1104_vm6, %v4224_v0, %v4232_v60  ;;  %v1181_v38 = vpop.permute.xlu1 %1180 }
 0x1c5   : > { %v1079_v61 = vmul.f32 %v5574_v63, %v1066_v7  ;;  %v5575_v48 = vstv %s3712_s5  ;;  %v1150_v13 = vsel %vm1143_vm7, %v1147_v10, %v1149_v53  ;;  %v1151_v51 = vsel %vm1143_vm7, %v1149_v53, %v1147_v10  ;;  %v1179_v7 = vpop.permute.xlu0 %1178  ;;  %1791 = vrot.lane.b32.xlu1 %v2979_v31, %s2761_s11  ;;  %s2764_s5 = smov 83  }
 0x1c6   : > { %v1120_v4 = vmul.f32 %v5575_v48, %v1112_v45  ;;  %v5576_v40 = vmov %v5575_v48  ;;  %v5578_v62 = vrot.slane %v5577_v44, %v3171_v14  ;;  %v5579_v60 = vrot.slane %v5577_v44, %v3181_v17  ;;  %v5592_v48 = vld [vmem:[#allocation67_spill] sm:$0xff]  ;;  %1789 = vrot.lane.b32.xlu0 %v2971_v27, %s2761_s11 }
 0x1c7   : > { %v1121_v29 = vmul.f32 %v5576_v40, %v1111_v25  ;;  %v1083_v52 = vadd.f32 %v1081_v18, %v1078_v57  ;;  %v1084_v15 = vadd.f32 %v1082_v34, %v1079_v61  ;;  %v5580_v49 = vstv %s3698_s20  ;;  %s4504_s20 = sld [smem:[#allocation8 + $0x4d]] }
 0x1c8   : > { %v1018_v0 = vmul.f32 %v5578_v62, %v1005_v59  ;;  %v1019_v26 = vmul.f32 %v5579_v60, %v1006_v56  ;;  %v1117_v2 = vmul.f32 %v5580_v49, %v1106_v12  ;;  %v5581_v11 = vmov %v5580_v49 }
 0x1c9   : > { %v1118_v42 = vmul.f32 %v5581_v11, %v1105_v35  ;;  %v1144_v43 = vsel %vm1143_vm7, %v1140_v41, %v1142_v39  ;;  %v1145_v33 = vsel %vm1143_vm7, %v1142_v39, %v1140_v41  ;;  %v5583_v22 = vrot.slane %v5582_v19, %v3171_v14  ;;  %v1186_v10 = vpop.permute.xlu0 %1185  ;;  %1798 = vrot.lane.b32.xlu1 %v2973_v28, %s2761_s11 }
 0x1ca   : > { %v5584_v59 = vrot.slane %v5582_v19, %v3181_v17  ;;  %v5585_v54 = vstv %s3749_s8  ;;  %v1122_v30 = vadd.f32 %v1120_v4, %v1117_v2  ;;  %v1227_v39 = vadd.f32 %v4043_v55, %v4252_v1  ;;  %1796 = vrot.lane.b32.xlu0 %v2967_v24, %s2761_s11  ;;  %s4531_s8 = sld [smem:[#allocation8 + $0x4e]]  ;;  %s4696_s11 = sld [smem:[#allocation8 + $0x55]] }
 0x1cb   : > { %v1057_v8 = vmul.f32 %v5583_v22, %v1044_v58  ;;  %v1159_v5 = vmul.f32 %v5585_v54, %v1151_v51  ;;  %v5586_v9 = vmov %v5585_v54  ;;  %v1123_v32 = vadd.f32 %v1121_v29, %v1118_v42  ;;  %v5599_v22 = vld [vmem:[#allocation68_spill] sm:$0xff] }
 0x1cc   : > { %v1058_v56 = vmul.f32 %v5584_v59, %v1045_v16  ;;  %v1160_v21 = vmul.f32 %v5586_v9, %v1150_v13  ;;  %v1232_v41 = vrot.slane %v4047_v20, %v3171_v14  ;;  %v1020_v18 = vadd.f32 %v1018_v0, %v981_v3  ;;  %v5589_v16 = vld [vmem:[#allocation66_spill] sm:$0xff]  ;;  %v1188_v3 = vpop.permute.xlu1 %1187 }
 0x1cd   : > { %v1021_v46 = vadd.f32 %v1019_v26, %v982_v37  ;;  %v5587_v34 = vstv %s3732_s7  ;;  %v5590_v53 = vrot.slane %v5589_v16, %v3171_v14  ;;  %v5591_v57 = vrot.slane %v5589_v16, %v3181_v17  ;;  %1830 = vrot.lane.b32.xlu1 %v2979_v31, %s2762_s29  ;;  %s4529_s7 = sld [smem:[#allocation8 + $0x1d]] }
 0x1ce   : > { %v1156_v25 = vmul.f32 %v5587_v34, %v1145_v33  ;;  %v5588_v45 = vmov %v5587_v34  ;;  %v1183_v55 = vsel %vm1182_vm8, %v1179_v7, %v1181_v38  ;;  %v1184_v1 = vsel %vm1182_vm8, %v1181_v38, %v1179_v7  ;;  %v4427_v38 = vld [vmem:[#allocation6 + $0x13] ss:$8 sm:$0x3]  ;;  %1828 = vrot.lane.b32.xlu0 %v2971_v27, %s2762_s29 }
 0x1cf   : > { %v1157_v58 = vmul.f32 %v5588_v45, %v1144_v43  ;;  %v1096_v6 = vmul.f32 %v5590_v53, %v1083_v52  ;;  %v1097_v63 = vmul.f32 %v5591_v57, %v1084_v15  ;;  %v1059_v37 = vadd.f32 %v1057_v8, %v1020_v18 }
 0x1d0   : > { %v1060_v61 = vadd.f32 %v1058_v56, %v1021_v46  ;;  %v1161_v35 = vadd.f32 %v1159_v5, %v1156_v25  ;;  %v5593_v4 = vrot.slane %v5592_v48, %v3171_v14  ;;  %v5594_v29 = vrot.slane %v5592_v48, %v3181_v17  ;;  %v1246_v43 = vpop.permute.xlu1 %1245 }
 0x1d1   : > { %v1162_v12 = vadd.f32 %v1160_v21, %v1157_v58  ;;  %v1189_v51 = vsel %vm1182_vm8, %v1186_v10, %v1188_v3  ;;  %v1190_v44 = vsel %vm1182_vm8, %v1188_v3, %v1186_v10  ;;  %v5595_v62 = vstv %s3762_s21  ;;  %v1244_v21 = vpop.permute.xlu0 %1243  ;;  %1837 = vrot.lane.b32.xlu1 %v2973_v28, %s2762_s29  ;;  %s2765_s21 = smov 82  }
 0x1d2   : > { %v1135_v40 = vmul.f32 %v5593_v4, %v1122_v30  ;;  %v1136_v13 = vmul.f32 %v5594_v29, %v1123_v32  ;;  %v1195_v0 = vmul.f32 %v5595_v62, %v1184_v1  ;;  %v5596_v60 = vmov %v5595_v62  ;;  %v4465_v29 = vld [vmem:[#allocation6 + $0x14] ss:$8 sm:$0x3]  ;;  %1835 = vrot.lane.b32.xlu0 %v2967_v24, %s2762_s29  ;;  %s4732_s29 = sld [smem:[#allocation8 + $0x26]] }
 0x1d3   : > { %v1196_v26 = vmul.f32 %v5596_v60, %v1183_v55  ;;  %v5597_v52 = vstv %s3776_s28  ;;  %v1098_v11 = vadd.f32 %v1096_v6, %v1059_v37  ;;  %v1099_v42 = vadd.f32 %v1097_v63, %v1060_v61  ;;  %s4554_s28 = sld [smem:[#allocation8 + $0x1e]] }
 0x1d4   : > { %v1198_v15 = vmul.f32 %v5597_v52, %v1190_v44  ;;  %v5598_v49 = vmov %v5597_v52  ;;  %v1236_v33 = vrot.slane %v4047_v20, %v3181_v17  ;;  %v1258_v19 = vmul.f32 %v4427_v38, %v3723_v50  ;;  %v1253_v58 = vpop.permute.xlu1 %1252 }
 0x1d5   : > { %v1199_v2 = vmul.f32 %v5598_v49, %v1189_v51  ;;  %v5600_v8 = vrot.slane %v5599_v22, %v3171_v14  ;;  %v5601_v56 = vrot.slane %v5599_v22, %v3181_v17  ;;  %v1259_v7 = vstv %s4382_s6  ;;  %v1251_v1 = vpop.permute.xlu0 %1250  ;;  %1869 = vrot.lane.b32.xlu1 %v2979_v31, %s2763_s30  ;;  %s4675_s6 = sld [smem:[#allocation8 + $0x54]] }
 0x1d6   : > { %v1200_v5 = vadd.f32 %v1198_v15, %v1195_v0  ;;  %v1248_v20 = vsel %vm1247_vm9, %v1244_v21, %v1246_v43  ;;  %v1249_v30 = vsel %vm1247_vm9, %v1246_v43, %v1244_v21  ;;  %v1137_v32 = vadd.f32 %v1135_v40, %v1098_v11  ;;  %1867 = vrot.lane.b32.xlu0 %v2971_v27, %s2763_s30 }
 0x1d7   : > { %v1174_v59 = vmul.f32 %v5600_v8, %v1161_v35  ;;  %v1175_v54 = vmul.f32 %v5601_v56, %v1162_v12  ;;  %v1201_v9 = vadd.f32 %v1199_v2, %v1196_v26  ;;  %v1138_v18 = vadd.f32 %v1136_v13, %v1099_v42 }
 0x1d8   : > { %v5602_v46 = vrot.slane %v3868_v36, %v3171_v14  ;;  %v5603_v25 = vrot.slane %v3868_v36, %v3181_v17  ;;  %v1262_v16 = vstv %s4403_s2  ;;  %v1239_v53 = vmul.f32 %v1232_v41, %v4247_v47  ;;  %v1285_v10 = vpop.permute.xlu1 %1284  ;;  %s4694_s2 = sld [smem:[#allocation8 + $0x24]] }
 0x1d9   : > { %v1240_v6 = vmul.f32 %v1236_v33, %v1227_v39  ;;  %v1271_v57 = vrot.slane %v1258_v19, %v3171_v14  ;;  %v1176_v63 = vadd.f32 %v1174_v59, %v1137_v32  ;;  %v1177_v55 = vadd.f32 %v1175_v54, %v1138_v18  ;;  %v1283_v40 = vpop.permute.xlu0 %1282  ;;  %1876 = vrot.lane.b32.xlu1 %v2973_v28, %s2763_s30 }
 0x1da   : > { %v1213_v34 = vmul.f32 %v5602_v46, %v1200_v5  ;;  %v1214_v45 = vmul.f32 %v5603_v25, %v1201_v9  ;;  %v1275_v3 = vrot.slane %v1258_v19, %v3181_v17  ;;  %v1260_v36 = vmul.f32 %v1259_v7, %v1248_v20  ;;  %v4490_v20 = vld [vmem:[#allocation6 + $0x15] ss:$8 sm:$0x3]  ;;  %1874 = vrot.lane.b32.xlu0 %v2967_v24, %s2763_s30  ;;  %s4787_s30 = sld [smem:[#allocation8 + $0x58]] }
 0x1db   : > { %v1261_v37 = vmul.f32 %v1259_v7, %v1249_v30  ;;  %v1254_v61 = vsel %vm1247_vm9, %v1251_v1, %v1253_v58  ;;  %v1255_v47 = vsel %vm1247_vm9, %v1253_v58, %v1251_v1  ;;  %v1297_v13 = vmul.f32 %v4465_v29, %v3723_v50  ;;  %v4514_v1 = vld [vmem:[#allocation6 + $0x4] ss:$8 sm:$0x3] }
 0x1dc   : > { %v1215_v39 = vadd.f32 %v1213_v34, %v1176_v63  ;;  %v1216_v41 = vadd.f32 %v1214_v45, %v1177_v55  ;;  %v1263_v35 = vmul.f32 %v1262_v16, %v1254_v61  ;;  %v1264_v12 = vmul.f32 %v1262_v16, %v1255_v47  ;;  %v1292_v15 = vpop.permute.xlu1 %1291 }
 0x1dd   : > { %v1287_v51 = vsel %vm1286_vm10, %v1283_v40, %v1285_v10  ;;  %v1288_v44 = vsel %vm1286_vm10, %v1285_v10, %v1283_v40  ;;  %v1298_v52 = vstv %s4453_s27  ;;  %v1301_v49 = vstv %s4455_s24  ;;  %v1290_v42 = vpop.permute.xlu0 %1289  ;;  %1908 = vrot.lane.b32.xlu1 %v2979_v31, %s2764_s5  ;;  %s4713_s27 = sld [smem:[#allocation8 + $0x25]]  ;;  %s4715_s24 = sld [smem:[#allocation8 + $0x56]] }
 0x1de   : > { %v1265_v48 = vadd.f32 %v1263_v35, %v1260_v36  ;;  %v1266_v4 = vadd.f32 %v1264_v12, %v1261_v37  ;;  %v1241_v62 = vadd.f32 %v1239_v53, %v1215_v39  ;;  %v1242_v0 = vadd.f32 %v1240_v6, %v1216_v41  ;;  %1906 = vrot.lane.b32.xlu0 %v2971_v27, %s2764_s5  ;;  %v4517_v12 = vld [vmem:[#allocation6 + $0x7] ss:$8 sm:$0x3] }
 0x1df   : > { %v1310_v43 = vrot.slane %v1297_v13, %v3171_v14  ;;  %v1293_v33 = vsel %vm1286_vm10, %v1290_v42, %v1292_v15  ;;  %v1294_v19 = vsel %vm1286_vm10, %v1292_v15, %v1290_v42  ;;  %v1314_v22 = vrot.slane %v1297_v13, %v3181_v17 }
 0x1e0   : > { %v1278_v60 = vmul.f32 %v1271_v57, %v1265_v48  ;;  %v1279_v26 = vmul.f32 %v1275_v3, %v1266_v4  ;;  %v1299_v8 = vmul.f32 %v1298_v52, %v1287_v51  ;;  %v1300_v59 = vmul.f32 %v1298_v52, %v1288_v44  ;;  %v1324_v5 = vpop.permute.xlu1 %1323 }
 0x1e1   : > { %v1302_v56 = vmul.f32 %v1301_v49, %v1293_v33  ;;  %v1303_v54 = vmul.f32 %v1301_v49, %v1294_v19  ;;  %v1322_v7 = vpop.permute.xlu0 %1321  ;;  %v1336_v30 = vmul.f32 %v4490_v20, %v3723_v50  ;;  %v1337_v25 = vstv %s4477_s0  ;;  %1915 = vrot.lane.b32.xlu1 %v2973_v28, %s2764_s5  ;;  %s4734_s0 = sld [smem:[#allocation8 + $0x57]] }
 0x1e2   : > { %v1280_v2 = vadd.f32 %v1278_v60, %v1241_v62  ;;  %v1281_v11 = vadd.f32 %v1279_v26, %v1242_v0  ;;  %v1326_v32 = vsel %vm1325_vm11, %v1322_v7, %v1324_v5  ;;  %v1327_v18 = vsel %vm1325_vm11, %v1324_v5, %v1322_v7  ;;  %1913 = vrot.lane.b32.xlu0 %v2967_v24, %s2764_s5  ;;  %s4797_s5 = sld [smem:[#allocation8 + $0x29]] }
 0x1e3   : > { %v1304_v9 = vadd.f32 %v1302_v56, %v1299_v8  ;;  %v1305_v21 = vadd.f32 %v1303_v54, %v1300_v59  ;;  %v1340_v58 = vstv %s4479_s25  ;;  %v1349_v6 = vrot.slane %v1336_v30, %v3171_v14  ;;  %v4542_v56 = vld [vmem:[#allocation6 + $0x10] ss:$8 sm:$0x3]  ;;  %s4785_s25 = sld [smem:[#allocation8 + $0x27]] }
 0x1e4   : > { %v1331_v45 = vpop.permute.xlu1 %1330  ;;  %v1353_v55 = vrot.slane %v1336_v30, %v3181_v17  ;;  %v1338_v3 = vmul.f32 %v1337_v25, %v1326_v32  ;;  %v1339_v36 = vmul.f32 %v1337_v25, %v1327_v18  ;;  %v1375_v10 = vmul.f32 %v4517_v12, %v4514_v1 }
 0x1e5   : > { %v1317_v46 = vmul.f32 %v1310_v43, %v1304_v9  ;;  %v1318_v34 = vmul.f32 %v1314_v22, %v1305_v21  ;;  %v1329_v53 = vpop.permute.xlu0 %1328  ;;  %v1376_v51 = vstv %s4502_s18  ;;  %v1379_v62 = vstv %s4504_s20  ;;  %1947 = vrot.lane.b32.xlu1 %v2979_v31, %s2765_s21  ;;  %s4791_s18 = sld [smem:[#allocation8 + $0x28]]  ;;  %s4793_s20 = sld [smem:[#allocation8 + $0x59]] }
 0x1e6   : > { %v1332_v57 = vsel %vm1325_vm11, %v1329_v53, %v1331_v45  ;;  %v1333_v63 = vsel %vm1325_vm11, %v1331_v45, %v1329_v53  ;;  %v1388_v52 = vrot.slane %v1375_v10, %v3171_v14  ;;  %1945 = vrot.lane.b32.xlu0 %v2971_v27, %s2765_s21  ;;  %v1414_v54 = vmul.f32 %v4542_v56, %v4514_v1 }
 0x1e7   : > { %v1319_v50 = vadd.f32 %v1317_v46, %v1280_v2  ;;  %v1320_v16 = vadd.f32 %v1318_v34, %v1281_v11  ;;  %v1341_v37 = vmul.f32 %v1340_v58, %v1332_v57  ;;  %v1342_v61 = vmul.f32 %v1340_v58, %v1333_v63 }
 0x1e8   : > { %v1363_v47 = vpop.permute.xlu1 %1362  ;;  %v1392_v2 = vrot.slane %v1375_v10, %v3181_v17  ;;  %v1415_v30 = vstv %s4529_s7  ;;  %v1418_v18 = vstv %s4531_s8  ;;  %v1427_v45 = vrot.slane %v1414_v54, %v3171_v14  ;;  %s4799_s7 = sld [smem:[#allocation8 + $0x5a]] }
 0x1e9   : > { %v1343_v39 = vadd.f32 %v1341_v37, %v1338_v3  ;;  %v1344_v41 = vadd.f32 %v1342_v61, %v1339_v36  ;;  %v1361_v35 = vpop.permute.xlu0 %1360  ;;  %1954 = vrot.lane.b32.xlu1 %v2973_v28, %s2765_s21  ;;  %vm1442_vm14 = vcmp.lt.s32.totalorder %v3208_v23, 113  ;;  %v4567_v61 = vld [vmem:[#allocation6 + $0x11] ss:$8 sm:$0x3]  ;;  %vm1481_vm15 = vcmp.lt.s32.totalorder %v3208_v23, 112  ;;  %s4801_s8 = sld [smem:[#allocation8 + $0x2a]] }
 0x1ea   : > { %v1365_v48 = vsel %vm1364_vm12, %v1361_v35, %v1363_v47  ;;  %v1366_v4 = vsel %vm1364_vm12, %v1363_v47, %v1361_v35  ;;  %1952 = vrot.lane.b32.xlu0 %v2967_v24, %s2765_s21  ;;  %v1453_v47 = vmul.f32 %v4567_v61, %v4514_v1  ;;  %vm1520_vm0 = vcmp.lt.s32.totalorder %v3208_v23, 111  ;;  %s4807_s21 = sld [smem:[#allocation8 + $0x5b]] }
 0x1eb   : > { %v1356_v40 = vmul.f32 %v1349_v6, %v1343_v39  ;;  %v1357_v13 = vmul.f32 %v1353_v55, %v1344_v41  ;;  %v1377_v11 = vmul.f32 %v1376_v51, %v1365_v48  ;;  %v1378_v42 = vmul.f32 %v1376_v51, %v1366_v4 }
 0x1ec   : > { %v1370_v44 = vpop.permute.xlu1 %1369  ;;  %v1454_v48 = vstv %s4554_s28  ;;  %vm1559_vm1 = vcmp.lt.s32.totalorder %v3208_v23, 110  ;;  %vm1598_vm2 = vcmp.lt.s32.totalorder %v3208_v23, 109  ;;  %vm1637_vm3 = vcmp.lt.s32.totalorder %v3208_v23, 99  ;;  %s4811_s28 = sld [smem:[#allocation8 + $0x2b]] }
 0x1ed   : > { %v1358_v0 = vadd.f32 %v1356_v40, %v1319_v50  ;;  %v1359_v60 = vadd.f32 %v1357_v13, %v1320_v16  ;;  %v1368_v26 = vpop.permute.xlu0 %1367  ;;  %v1431_v16 = vrot.slane %v1414_v54, %v3181_v17  ;;  %1986 = vrot.lane.b32.xlu1 %v2979_v31, %s2766_s10  ;;  %v1457_v40 = vstv %s4556_s23  ;;  %s4821_s23 = sld [smem:[#allocation8 + $0x5c]] }
 0x1ee   : > { %v1371_v15 = vsel %vm1364_vm12, %v1368_v26, %v1370_v44  ;;  %v1372_v49 = vsel %vm1364_vm12, %v1370_v44, %v1368_v26  ;;  %1984 = vrot.lane.b32.xlu0 %v2971_v27, %s2766_s10  ;;  %v1470_v26 = vrot.slane %v1453_v47, %v3181_v17  ;;  %vm1676_vm4 = vcmp.lt.s32.totalorder %v3208_v23, 98 }
 0x1ef   : > { %v1380_v43 = vmul.f32 %v1379_v62, %v1371_v15  ;;  %v1381_v33 = vmul.f32 %v1379_v62, %v1372_v49  ;;  %v1466_v62 = vrot.slane %v1453_v47, %v3171_v14  ;;  %vm1715_vm5 = vcmp.lt.s32.totalorder %v3208_v23, 97 }
 0x1f0   : > { %v1402_v19 = vpop.permute.xlu1 %1401  ;;  %vm1754_vm6 = vcmp.lt.s32.totalorder %v3208_v23, 96  ;;  %vm1793_vm7 = vcmp.lt.s32.totalorder %v3208_v23, 95  ;;  %vm1832_vm8 = vcmp.lt.s32.totalorder %v3208_v23, 94  ;;  %vm1871_vm9 = vcmp.lt.s32.totalorder %v3208_v23, 93 }
 0x1f1   : > { %v1382_v22 = vadd.f32 %v1380_v43, %v1377_v11  ;;  %v1383_v8 = vadd.f32 %v1381_v33, %v1378_v42  ;;  %v1400_v59 = vpop.permute.xlu0 %1399  ;;  %1993 = vrot.lane.b32.xlu1 %v2973_v28, %s2766_s10  ;;  %vm1910_vm10 = vcmp.lt.s32.totalorder %v3208_v23, 83  ;;  %vm1949_vm11 = vcmp.lt.s32.totalorder %v3208_v23, 82 }
 0x1f2   : > { %v1404_v5 = vsel %vm1403_vm13, %v1400_v59, %v1402_v19  ;;  %v1405_v9 = vsel %vm1403_vm13, %v1402_v19, %v1400_v59  ;;  %1991 = vrot.lane.b32.xlu0 %v2967_v24, %s2766_s10  ;;  %v4592_v19 = vld [vmem:[#allocation6 + $0x12] ss:$8 sm:$0x3]  ;;  %s4830_s10 = sld [smem:[#allocation8 + $0x2c]]  ;;  %vm1988_vm12 = vcmp.lt.s32.totalorder %v3208_v23, 81 }
 0x1f3   : > { %v1395_v21 = vmul.f32 %v1388_v52, %v1382_v22  ;;  %v1396_v7 = vmul.f32 %v1392_v2, %v1383_v8  ;;  %v1416_v53 = vmul.f32 %v1415_v30, %v1404_v5  ;;  %v1417_v6 = vmul.f32 %v1415_v30, %v1405_v9 }
 0x1f4   : > { %v1409_v32 = vpop.permute.xlu1 %1408  ;;  %v1492_v22 = vmul.f32 %v4592_v19, %v4514_v1  ;;  %v1493_v9 = vstv %s4579_s17  ;;  %s4851_s17 = sld [smem:[#allocation8 + $0x5d]] }
 0x1f5   : > { %v1397_v46 = vadd.f32 %v1395_v21, %v1358_v0  ;;  %v1398_v34 = vadd.f32 %v1396_v7, %v1359_v60  ;;  %v1407_v25 = vpop.permute.xlu0 %1406  ;;  %2025 = vrot.lane.b32.xlu1 %v2979_v31, %s2767_s1  ;;  %v1496_v7 = vstv %s4581_s9  ;;  %s4860_s9 = sld [smem:[#allocation8 + $0x2d]] }
 0x1f6   : > { %v1410_v58 = vsel %vm1403_vm13, %v1407_v25, %v1409_v32  ;;  %v1411_v50 = vsel %vm1403_vm13, %v1409_v32, %v1407_v25  ;;  %2023 = vrot.lane.b32.xlu0 %v2971_v27, %s2767_s1  ;;  %vm2027_vm13 = vcmp.lt.s32.totalorder %v3208_v23, 80 }
 0x1f7   : > { %v1419_v57 = vmul.f32 %v1418_v18, %v1410_v58  ;;  %v1420_v63 = vmul.f32 %v1418_v18, %v1411_v50 }
 0x1f8   : > { %v1441_v55 = vpop.permute.xlu1 %1440 }
 0x1f9   : > { %v1421_v3 = vadd.f32 %v1419_v57, %v1416_v53  ;;  %v1422_v36 = vadd.f32 %v1420_v63, %v1417_v6  ;;  %v1439_v37 = vpop.permute.xlu0 %1438  ;;  %2032 = vrot.lane.b32.xlu1 %v2973_v28, %s2767_s1 }
 0x1fa   : > { %v1443_v39 = vsel %vm1442_vm14, %v1439_v37, %v1441_v55  ;;  %v1444_v41 = vsel %vm1442_vm14, %v1441_v55, %v1439_v37  ;;  %2030 = vrot.lane.b32.xlu0 %v2967_v24, %s2767_s1  ;;  %s4879_s1 = sld [smem:[#allocation8 + $0x5e]] }
 0x1fb   : > { %v1434_v35 = vmul.f32 %v1427_v45, %v1421_v3  ;;  %v1435_v10 = vmul.f32 %v1431_v16, %v1422_v36  ;;  %v1455_v52 = vmul.f32 %v1454_v48, %v1443_v39  ;;  %v1456_v15 = vmul.f32 %v1454_v48, %v1444_v41 }
 0x1fc   : > { %v1448_v4 = vpop.permute.xlu1 %1447  ;;  %v1509_v45 = vrot.slane %v1492_v22, %v3181_v17  ;;  %v1531_v3 = vmul.f32 %v4427_v38, %v4514_v1  ;;  %v1532_v41 = vstv %s4604_s14  ;;  %s4914_s14 = sld [smem:[#allocation8 + $0x2e]] }
 0x1fd   : > { %v1436_v13 = vadd.f32 %v1434_v35, %v1397_v46  ;;  %v1437_v51 = vadd.f32 %v1435_v10, %v1398_v34  ;;  %v1446_v44 = vpop.permute.xlu0 %1445  ;;  %v1505_v46 = vrot.slane %v1492_v22, %v3171_v14  ;;  %2064 = vrot.lane.b32.xlu1 %v2979_v31, %s2768_s15  ;;  %v1535_v10 = vstv %s4606_s13  ;;  %s4916_s13 = sld [smem:[#allocation8 + $0x5f]] }
 0x1fe   : > { %v1449_v0 = vsel %vm1442_vm14, %v1446_v44, %v1448_v4  ;;  %v1450_v60 = vsel %vm1442_vm14, %v1448_v4, %v1446_v44  ;;  %2062 = vrot.lane.b32.xlu0 %v2971_v27, %s2768_s15  ;;  %vm2066_vm14 = vcmp.lt.s32.totalorder %v3208_v23, 79 }
 0x1ff   : > { %v1458_v49 = vmul.f32 %v1457_v40, %v1449_v0  ;;  %v1459_v2 = vmul.f32 %v1457_v40, %v1450_v60 }
 0x200   : > { %v1480_v11 = vpop.permute.xlu1 %1479 }
 0x201   : > { %v1460_v42 = vadd.f32 %v1458_v49, %v1455_v52  ;;  %v1461_v43 = vadd.f32 %v1459_v2, %v1456_v15  ;;  %v1478_v33 = vpop.permute.xlu0 %1477  ;;  %2071 = vrot.lane.b32.xlu1 %v2973_v28, %s2768_s15 }
 0x202   : > { %v1482_v8 = vsel %vm1481_vm15, %v1478_v33, %v1480_v11  ;;  %v1483_v59 = vsel %vm1481_vm15, %v1480_v11, %v1478_v33  ;;  %2069 = vrot.lane.b32.xlu0 %v2967_v24, %s2768_s15  ;;  %s4955_s15 = sld [smem:[#allocation8 + $0x2f]] }
 0x203   : > { %v1473_v54 = vmul.f32 %v1466_v62, %v1460_v42  ;;  %v1474_v5 = vmul.f32 %v1470_v26, %v1461_v43  ;;  %v1494_v58 = vmul.f32 %v1493_v9, %v1482_v8  ;;  %v1495_v50 = vmul.f32 %v1493_v9, %v1483_v59 }
 0x204   : > { %v1487_v21 = vpop.permute.xlu1 %1486  ;;  %v1548_v62 = vrot.slane %v1531_v3, %v3181_v17  ;;  %v1570_v42 = vmul.f32 %v4465_v29, %v4514_v1  ;;  %v1571_v59 = vstv %s4627_s3  ;;  %s4957_s3 = sld [smem:[#allocation8 + $0x60]] }
 0x205   : > { %v1475_v30 = vadd.f32 %v1473_v54, %v1436_v13  ;;  %v1476_v32 = vadd.f32 %v1474_v5, %v1437_v51  ;;  %v1485_v18 = vpop.permute.xlu0 %1484  ;;  %v1544_v13 = vrot.slane %v1531_v3, %v3171_v14  ;;  %2103 = vrot.lane.b32.xlu1 %v2979_v31, %s2769_s22  ;;  %v1574_v5 = vstv %s4629_s19  ;;  %s5126_s19 = sld [smem:[#allocation8 + $0x30]] }
 0x206   : > { %v1488_v34 = vsel %vm1481_vm15, %v1485_v18, %v1487_v21  ;;  %v1489_v25 = vsel %vm1481_vm15, %v1487_v21, %v1485_v18  ;;  %2101 = vrot.lane.b32.xlu0 %v2971_v27, %s2769_s22  ;;  %vm2105_vm15 = vcmp.lt.s32.totalorder %v3208_v23, 78 }
 0x207   : > { %v1497_v16 = vmul.f32 %v1496_v7, %v1488_v34  ;;  %v1498_v53 = vmul.f32 %v1496_v7, %v1489_v25 }
 0x208   : > { %v1519_v6 = vpop.permute.xlu1 %1518 }
 0x209   : > { %v1499_v57 = vadd.f32 %v1497_v16, %v1494_v58  ;;  %v1500_v63 = vadd.f32 %v1498_v53, %v1495_v50  ;;  %v1517_v55 = vpop.permute.xlu0 %1516  ;;  %2110 = vrot.lane.b32.xlu1 %v2973_v28, %s2769_s22 }
 0x20a   : > { %v1521_v36 = vsel %vm1520_vm0, %v1517_v55, %v1519_v6  ;;  %v1522_v37 = vsel %vm1520_vm0, %v1519_v6, %v1517_v55  ;;  %2108 = vrot.lane.b32.xlu0 %v2967_v24, %s2769_s22  ;;  %s5128_s22 = sld [smem:[#allocation8 + $0x61]] }
 0x20b   : > { %v1512_v47 = vmul.f32 %v1505_v46, %v1499_v57  ;;  %v1513_v39 = vmul.f32 %v1509_v45, %v1500_v63  ;;  %v1533_v0 = vmul.f32 %v1532_v41, %v1521_v36  ;;  %v1534_v60 = vmul.f32 %v1532_v41, %v1522_v37 }
 0x20c   : > { %v1526_v35 = vpop.permute.xlu1 %1525  ;;  %v1587_v46 = vrot.slane %v1570_v42, %v3181_v17  ;;  %v1609_v57 = vmul.f32 %v4490_v20, %v4514_v1  ;;  %v1613_v37 = vstv %s4652_s4  ;;  %s5608_s4 = sld [smem:[#allocation18_spill]] }
 0x20d   : > { %v1514_v48 = vadd.f32 %v1512_v47, %v1475_v30  ;;  %v1515_v4 = vadd.f32 %v1513_v39, %v1476_v32  ;;  %v1524_v40 = vpop.permute.xlu0 %1523  ;;  %v1583_v30 = vrot.slane %v1570_v42, %v3171_v14  ;;  %2142 = vrot.lane.b32.xlu1 %v2979_v31, %s2770_s12  ;;  %v1652_v42 = vstv %s4675_s6 }
 0x20e   : > { %v1527_v51 = vsel %vm1520_vm0, %v1524_v40, %v1526_v35  ;;  %v1528_v44 = vsel %vm1520_vm0, %v1526_v35, %v1524_v40  ;;  %2140 = vrot.lane.b32.xlu0 %v2971_v27, %s2770_s12  ;;  %v1610_v27 = vstv %s4650_s26  ;;  %v1622_v41 = vrot.slane %v1609_v57, %v3171_v14  ;;  %s5607_s26 = sld [smem:[#allocation24_spill]] }
 0x20f   : > { %v1536_v26 = vmul.f32 %v1535_v10, %v1527_v51  ;;  %v1537_v52 = vmul.f32 %v1535_v10, %v1528_v44  ;;  %v4684_v10 = vld [vmem:[#allocation6 + $0x5] ss:$8 sm:$0x3]  ;;  %vm2144_vm0 = vcmp.lt.s32.totalorder %v3208_v23, 77 }
 0x210   : > { %v1558_v15 = vpop.permute.xlu1 %1557 }
 0x211   : > { %v1538_v49 = vadd.f32 %v1536_v26, %v1533_v0  ;;  %v1539_v2 = vadd.f32 %v1537_v52, %v1534_v60  ;;  %v1556_v11 = vpop.permute.xlu0 %1555  ;;  %2149 = vrot.lane.b32.xlu1 %v2973_v28, %s2770_s12  ;;  %v1648_v60 = vmul.f32 %v4517_v12, %v4684_v10 }
 0x212   : > { %v1560_v43 = vsel %vm1559_vm1, %v1556_v11, %v1558_v15  ;;  %v1561_v33 = vsel %vm1559_vm1, %v1558_v15, %v1556_v11  ;;  %2147 = vrot.lane.b32.xlu0 %v2967_v24, %s2770_s12  ;;  %v1626_v24 = vrot.slane %v1609_v57, %v3181_v17  ;;  %v1691_v57 = vstv %s4696_s11  ;;  %s5609_s12 = sld [smem:[#allocation23_spill]]  ;;  %s2431_s6 = sshll.u32 %s5608_s4, 7 }
 0x213   : > { %v1551_v22 = vmul.f32 %v1544_v13, %v1538_v49  ;;  %v1552_v8 = vmul.f32 %v1548_v62, %v1539_v2  ;;  %v1572_v34 = vmul.f32 %v1571_v59, %v1560_v43  ;;  %v1573_v25 = vmul.f32 %v1571_v59, %v1561_v33 }
 0x214   : > { %v1565_v54 = vpop.permute.xlu1 %1564  ;;  %v1649_v2 = vstv %s4673_s16 }
 0x215   : > { %v1553_v9 = vadd.f32 %v1551_v22, %v1514_v48  ;;  %v1554_v21 = vadd.f32 %v1552_v8, %v1515_v4  ;;  %v1563_v7 = vpop.permute.xlu0 %1562  ;;  %v1661_v8 = vrot.slane %v1648_v60, %v3171_v14 }
 0x216   : > { %v1566_v32 = vsel %vm1559_vm1, %v1563_v7, %v1565_v54  ;;  %v1567_v18 = vsel %vm1559_vm1, %v1565_v54, %v1563_v7 }
 0x217   : > { %v1575_v45 = vmul.f32 %v1574_v5, %v1566_v32  ;;  %v1576_v58 = vmul.f32 %v1574_v5, %v1567_v18  ;;  %v1665_v5 = vrot.slane %v1648_v60, %v3181_v17  ;;  %v1730_v60 = vstv %s4715_s24 }
 0x218   : > { %v1597_v50 = vpop.permute.xlu1 %1596 }
 0x219   : > { %v1577_v16 = vadd.f32 %v1575_v45, %v1572_v34  ;;  %v1578_v53 = vadd.f32 %v1576_v58, %v1573_v25  ;;  %v1595_v6 = vpop.permute.xlu0 %1594  ;;  %v1687_v25 = vmul.f32 %v4542_v56, %v4684_v10 }
 0x21a   : > { %v1599_v31 = vsel %vm1598_vm2, %v1595_v6, %v1597_v50  ;;  %v1600_v63 = vsel %vm1598_vm2, %v1597_v50, %v1595_v6 }
 0x21b   : > { %v1590_v55 = vmul.f32 %v1583_v30, %v1577_v16  ;;  %v1591_v3 = vmul.f32 %v1587_v46, %v1578_v53  ;;  %v1611_v48 = vmul.f32 %v1610_v27, %v1599_v31  ;;  %v1612_v4 = vmul.f32 %v1610_v27, %v1600_v63 }
 0x21c   : > { %v1604_v36 = vpop.permute.xlu1 %1603  ;;  %v1688_v53 = vstv %s4694_s2  ;;  %s5611_s2 = sshll.u32 %s5609_s12, 3 }
 0x21d   : > { %v1592_v1 = vadd.f32 %v1590_v55, %v1553_v9  ;;  %v1593_v47 = vadd.f32 %v1591_v3, %v1554_v21  ;;  %v1602_v39 = vpop.permute.xlu0 %1601  ;;  %v1700_v3 = vrot.slane %v1687_v25, %v3171_v14  ;;  %s215_s11 = scalar_lea.vmem [#allocation9], %s5611_s2 }
 0x21e   : > { %v1605_v35 = vsel %vm1598_vm2, %v1602_v39, %v1604_v36  ;;  %v1606_v28 = vsel %vm1598_vm2, %v1604_v36, %v1602_v39 }
 0x21f   : > { %v1614_v40 = vmul.f32 %v1613_v37, %v1605_v35  ;;  %v1615_v13 = vmul.f32 %v1613_v37, %v1606_v28  ;;  %v1704_v37 = vrot.slane %v1687_v25, %v3181_v17  ;;  %v1769_v25 = vstv %s4734_s0  ;;  %s5613_s0 = sld [smem:[#allocation72_spill]] }
 0x220   : > { %v1636_v51 = vpop.permute.xlu1 %1635 }
 0x221   : > { %v1616_v44 = vadd.f32 %v1614_v40, %v1611_v48  ;;  %v1617_v62 = vadd.f32 %v1615_v13, %v1612_v4  ;;  %v1634_v0 = vpop.permute.xlu0 %1633  ;;  %v1726_v4 = vmul.f32 %v4567_v61, %v4684_v10 }
 0x222   : > { %v1638_v26 = vsel %vm1637_vm3, %v1634_v0, %v1636_v51  ;;  %v1639_v52 = vsel %vm1637_vm3, %v1636_v51, %v1634_v0 }
 0x223   : > { %v1629_v15 = vmul.f32 %v1622_v41, %v1616_v44  ;;  %v1630_v49 = vmul.f32 %v1626_v24, %v1617_v62  ;;  %v1650_v9 = vmul.f32 %v1649_v2, %v1638_v26  ;;  %v1651_v21 = vmul.f32 %v1649_v2, %v1639_v52 }
 0x224   : > { %v1643_v11 = vpop.permute.xlu1 %1642  ;;  %v1727_v62 = vstv %s4713_s27  ;;  %s2221_s27 = sshll.u32 %s215_s11, 4  ;;  %s5208_s27 = int_to_ptr.vmem [resolvable:$true] %s2221_s27 }
 0x225   : > { %v1631_v43 = vadd.f32 %v1629_v15, %v1592_v1  ;;  %v1632_v33 = vadd.f32 %v1630_v49, %v1593_v47  ;;  %v1641_v22 = vpop.permute.xlu0 %1640  ;;  %v1739_v49 = vrot.slane %v1726_v4, %v3171_v14 }
 0x226   : > { %v1644_v59 = vsel %vm1637_vm3, %v1641_v22, %v1643_v11  ;;  %v1645_v54 = vsel %vm1637_vm3, %v1643_v11, %v1641_v22 }
 0x227   : > { %v1653_v7 = vmul.f32 %v1652_v42, %v1644_v59  ;;  %v1654_v30 = vmul.f32 %v1652_v42, %v1645_v54  ;;  %v1743_v42 = vrot.slane %v1726_v4, %v3181_v17 }
 0x228   : > { %v1675_v32 = vpop.permute.xlu1 %1674 }
 0x229   : > { %v1655_v18 = vadd.f32 %v1653_v7, %v1650_v9  ;;  %v1656_v46 = vadd.f32 %v1654_v30, %v1651_v21  ;;  %v1673_v34 = vpop.permute.xlu0 %1672  ;;  %v1765_v30 = vmul.f32 %v4592_v19, %v4684_v10 }
 0x22a   : > { %v1677_v45 = vsel %vm1676_vm4, %v1673_v34, %v1675_v32  ;;  %v1678_v58 = vsel %vm1676_vm4, %v1675_v32, %v1673_v34 }
 0x22b   : > { %v1668_v50 = vmul.f32 %v1661_v8, %v1655_v18  ;;  %v1669_v16 = vmul.f32 %v1665_v5, %v1656_v46  ;;  %v1689_v1 = vmul.f32 %v1688_v53, %v1677_v45  ;;  %v1690_v47 = vmul.f32 %v1688_v53, %v1678_v58 }
 0x22c   : > { %v1682_v6 = vpop.permute.xlu1 %1681  ;;  %v1766_v46 = vstv %s4732_s29 }
 0x22d   : > { %v1670_v31 = vadd.f32 %v1668_v50, %v1631_v43  ;;  %v1671_v63 = vadd.f32 %v1669_v16, %v1632_v33  ;;  %v1680_v55 = vpop.permute.xlu0 %1679 }
 0x22e   : > { %v1683_v27 = vsel %vm1676_vm4, %v1680_v55, %v1682_v6  ;;  %v1684_v36 = vsel %vm1676_vm4, %v1682_v6, %v1680_v55  ;;  %v1778_v6 = vrot.slane %v1765_v30, %v3171_v14 }
 0x22f   : > { %v1692_v39 = vmul.f32 %v1691_v57, %v1683_v27  ;;  %v1693_v41 = vmul.f32 %v1691_v57, %v1684_v36  ;;  %v1782_v57 = vrot.slane %v1765_v30, %v3181_v17 }
 0x230   : > { %v1714_v35 = vpop.permute.xlu1 %1713 }
 0x231   : > { %v1694_v28 = vadd.f32 %v1692_v39, %v1689_v1  ;;  %v1695_v24 = vadd.f32 %v1693_v41, %v1690_v47  ;;  %v1712_v48 = vpop.permute.xlu0 %1711 }
 0x232   : > { %v1716_v40 = vsel %vm1715_vm5, %v1712_v48, %v1714_v35  ;;  %v1717_v13 = vsel %vm1715_vm5, %v1714_v35, %v1712_v48 }
 0x233   : > { %v1707_v51 = vmul.f32 %v1700_v3, %v1694_v28  ;;  %v1708_v44 = vmul.f32 %v1704_v37, %v1695_v24  ;;  %v1728_v43 = vmul.f32 %v1727_v62, %v1716_v40  ;;  %v1729_v33 = vmul.f32 %v1727_v62, %v1717_v13 }
 0x234   : > { %v1721_v0 = vpop.permute.xlu1 %1720 }
 0x235   : > { %v1709_v26 = vadd.f32 %v1707_v51, %v1670_v31  ;;  %v1710_v52 = vadd.f32 %v1708_v44, %v1671_v63  ;;  %v1719_v15 = vpop.permute.xlu0 %1718 }
 0x236   : > { %v1722_v2 = vsel %vm1715_vm5, %v1719_v15, %v1721_v0  ;;  %v1723_v11 = vsel %vm1715_vm5, %v1721_v0, %v1719_v15 }
 0x237   : > { %v1731_v22 = vmul.f32 %v1730_v60, %v1722_v2  ;;  %v1732_v8 = vmul.f32 %v1730_v60, %v1723_v11  ;;  %v4815_v11 = vmul.f32 %v4465_v29, %v4684_v10 }
 0x238   : > { %v1753_v59 = vpop.permute.xlu1 %1752 }
 0x239   : > { %v1733_v54 = vadd.f32 %v1731_v22, %v1728_v43  ;;  %v1734_v5 = vadd.f32 %v1732_v8, %v1729_v33  ;;  %v1751_v9 = vpop.permute.xlu0 %1750  ;;  %v1805_v33 = vstv %s4785_s25  ;;  %v1808_v22 = vstv %s4787_s30  ;;  %s5206_s25 = scalar_lea.hbm %s5613_s0, %s2431_s6  ;;  %s2207_s30 = scalar_lea.sflag [#allocation4], %s5609_s12 }
 0x23a   : > { %v1755_v21 = vsel %vm1754_vm6, %v1751_v9, %v1753_v59  ;;  %v1756_v7 = vsel %vm1754_vm6, %v1753_v59, %v1751_v9  ;;  %v1844_v59 = vstv %s4791_s18  ;;  %v1860_v9 = vrot.slane %v4815_v11, %v3181_v17  ;;  %s2642_s18 = scalar_lea.vmem %s5208_s27, 128 }
 0x23b   : > { %v1746_v32 = vmul.f32 %v1739_v49, %v1733_v54  ;;  %v1747_v18 = vmul.f32 %v1743_v42, %v1734_v5  ;;  %v1767_v31 = vmul.f32 %v1766_v46, %v1755_v21  ;;  %v1768_v63 = vmul.f32 %v1766_v46, %v1756_v7  ;;  %v4817_v42 = vld [vmem:[#allocation6 + $0x6] ss:$8 sm:$0x3]  ;;  %p2643_p9 = scmp.ne.s32.totalorder %s5208_s27, %s2642_s18 }
 0x23c   : > { %v1760_v34 = vpop.permute.xlu1 %1759  ;;  %v4805_v49 = vmul.f32 %v4427_v38, %v4684_v10  ;;  %v4825_v38 = vmul.f32 %v4490_v20, %v4684_v10  ;;  %v4839_v20 = vmul.f32 %v4517_v12, %v4817_v42  ;;  %v1847_v54 = vstv %s4793_s20  ;;  %s2771_s20 = smov [#allocation9]  }
 0x23d   : > { %v1748_v45 = vadd.f32 %v1746_v32, %v1709_v26  ;;  %v1749_v58 = vadd.f32 %v1747_v18, %v1710_v52  ;;  %v1758_v50 = vpop.permute.xlu0 %1757  ;;  %v1856_v5 = vrot.slane %v4815_v11, %v3171_v14  ;;  %v1883_v12 = vstv %s4797_s5  ;;  %p2644_p12 = pnand %p2643_p9, %p2893_p7  ;;  %s2646_s5 = sshll.u32 %s2771_s20, 4  ;;  %s2647_s5 = int_to_ptr.vmem [resolvable:$false] %s2646_s5 }
 0x23e   : > { %v1761_v16 = vsel %vm1754_vm6, %v1758_v50, %v1760_v34  ;;  %v1762_v53 = vsel %vm1754_vm6, %v1760_v34, %v1758_v50  ;;  %v1817_v29 = vrot.slane %v4805_v49, %v3171_v14  ;;  %v1821_v8 = vrot.slane %v4805_v49, %v3181_v17  ;;  %p2649_p1 = scmp.lt.s32.totalorder %s5208_s27, %s2647_s5 }
 0x23f   : > { %v1770_v55 = vmul.f32 %v1769_v25, %v1761_v16  ;;  %v1771_v3 = vmul.f32 %v1769_v25, %v1762_v53  ;;  %v1886_v7 = vstv %s4799_s7  ;;  %v1895_v30 = vrot.slane %v4825_v38, %v3171_v14  ;;  %p2645_p10 = pneg %p2644_p12  ;;  %s2648_s7 = scalar_lea.vmem %s2647_s5, 256 }
 0x240   : > { %v4757_v27 = vpop.permute.xlu1 %1791  ;;  %v1899_v32 = vrot.slane %v4825_v38, %v3181_v17  ;;  %v1922_v34 = vstv %s4801_s8  ;;  %v4869_v25 = vmul.f32 %v4542_v56, %v4817_v42  ;;  %v1938_v50 = vrot.slane %v4839_v20, %v3181_v17  ;;  %p2650_p6 = scmp.lt.s32.totalorder %s2648_s7, %s2642_s18 }
 0x241   : > { %v1772_v36 = vadd.f32 %v1770_v55, %v1767_v31  ;;  %v1773_v37 = vadd.f32 %v1771_v3, %v1768_v63  ;;  %v4759_v1 = vpop.permute.xlu0 %1789  ;;  %v1961_v16 = vstv %s4811_s28  ;;  %v4895_v63 = vmul.f32 %v4567_v61, %v4817_v42 }
 0x242   : > { %v1795_v56 = vsel %vm1793_vm7, %v4757_v27, %v4759_v1  ;;  %p2651_p8 = por %p2650_p6, %p2649_p1 }
 0x243   : > { %v1785_v47 = vmul.f32 %v1778_v6, %v1772_v36  ;;  %v1786_v39 = vmul.f32 %v1782_v57, %v1773_v37  ;;  %v1794_v6 = vsel %vm1793_vm7, %v4759_v1, %v4757_v27  ;;  %v1964_v57 = vstv %s4821_s23 }
 0x244   : > { %v1799_v41 = vpop.permute.xlu1 %1798  ;;  %v2000_v1 = vstv %s4830_s10  ;;  %v2016_v61 = vrot.slane %v4895_v63, %v3181_v17  ;;  %v2039_v37 = vstv %s4860_s9  ;;  %p2652_p13 = pnand %p2651_p8, %p2645_p10 }
 0x245   : > { %v4761_v35 = vadd.f32 %v1785_v47, %v1748_v45  ;;  %v4763_v28 = vadd.f32 %v1786_v39, %v1749_v58  ;;  %v1797_v24 = vpop.permute.xlu0 %1796  ;;  %v1925_v45 = vstv %s4807_s21  ;;  %v1934_v58 = vrot.slane %v4839_v20, %v3171_v14 }
 0x246   : > { %v1800_v18 = vsel %vm1793_vm7, %v1797_v24, %v1799_v41  ;;  %v1801_v46 = vsel %vm1793_vm7, %v1799_v41, %v1797_v24  ;;  %v4912_v47 = vmul.f32 %v4592_v19, %v4817_v42  ;;  %v1806_v39 = vmul.f32 %v1805_v33, %v1794_v6 }
 0x247   : > { %v1809_v55 = vmul.f32 %v1808_v22, %v1800_v18  ;;  %v1810_v3 = vmul.f32 %v1808_v22, %v1801_v46  ;;  %v1807_v41 = vmul.f32 %v1805_v33, %v1795_v56  ;;  %v2003_v18 = vstv %s4851_s17 }
 0x248   : > { %v4765_v48 = vpop.permute.xlu1 %1830  ;;  %v2012_v33 = vrot.slane %v4895_v63, %v3171_v14 }
 0x249   : > { %v4767_v4 = vpop.permute.xlu0 %1828  ;;  %v1811_v6 = vadd.f32 %v1809_v55, %v1806_v39  ;;  %v1812_v56 = vadd.f32 %v1810_v3, %v1807_v41  ;;  %v2565_v39 = vld [vmem:[#allocation6 + $0x13] ss:$8 sm:$0x3] }
 0x24a   : > { %v1833_v24 = vsel %vm1832_vm8, %v4767_v4, %v4765_v48  ;;  %v4953_v41 = vmul.f32 %v2565_v39, %v4817_v42 }
 0x24c   : > { %v4769_v40 = vpop.permute.xlu1 %1837 }
 0x24d   : > { %v4771_v13 = vpop.permute.xlu0 %1835 }
 0x24e   : > { %v1839_v36 = vsel %vm1832_vm8, %v4771_v13, %v4769_v40  ;;  %v1840_v27 = vsel %vm1832_vm8, %v4769_v40, %v4771_v13  ;;  %v1834_v40 = vsel %vm1832_vm8, %v4765_v48, %v4767_v4  ;;  %v1845_v48 = vmul.f32 %v1844_v59, %v1833_v24 }
 0x24f   : > { %v1848_v19 = vmul.f32 %v1847_v54, %v1839_v36  ;;  %v1849_v22 = vmul.f32 %v1847_v54, %v1840_v27  ;;  %v1846_v4 = vmul.f32 %v1844_v59, %v1834_v40  ;;  %v2042_v36 = vstv %s4879_s1 }
 0x250   : > { %v4773_v51 = vpop.permute.xlu1 %1869  ;;  %v2051_v27 = vrot.slane %v4912_v47, %v3171_v14 }
 0x251   : > { %v4775_v44 = vpop.permute.xlu0 %1867 }
 0x252   : > { %v1872_v24 = vsel %vm1871_vm9, %v4775_v44, %v4773_v51  ;;  %v1873_v40 = vsel %vm1871_vm9, %v4773_v51, %v4775_v44  ;;  %v1824_v44 = vmul.f32 %v1817_v29, %v1811_v6  ;;  %v2090_v6 = vrot.slane %v4953_v41, %v3171_v14 }
 0x254   : > { %v4777_v62 = vpop.permute.xlu1 %1876  ;;  %v1826_v11 = vadd.f32 %v1824_v44, %v4761_v35 }
 0x255   : > { %v4779_v0 = vpop.permute.xlu0 %1874 }
 0x256   : > { %v1878_v54 = vsel %vm1871_vm9, %v4779_v0, %v4777_v62  ;;  %v1879_v55 = vsel %vm1871_vm9, %v4777_v62, %v4779_v0  ;;  %v1850_v62 = vadd.f32 %v1848_v19, %v1845_v48  ;;  %v1851_v0 = vadd.f32 %v1849_v22, %v1846_v4 }
 0x257   : > { %v1887_v59 = vmul.f32 %v1886_v7, %v1878_v54  ;;  %v1888_v19 = vmul.f32 %v1886_v7, %v1879_v55  ;;  %v1825_v48 = vmul.f32 %v1821_v8, %v1812_v56  ;;  %v2078_v4 = vstv %s4914_s14 }
 0x258   : > { %v4781_v60 = vpop.permute.xlu1 %1908  ;;  %v2081_v7 = vstv %s4916_s13  ;;  %v1884_v54 = vmul.f32 %v1883_v12, %v1872_v24  ;;  %v1885_v55 = vmul.f32 %v1883_v12, %v1873_v40  ;;  %v2094_v56 = vrot.slane %v4953_v41, %v3181_v17 }
 0x259   : > { %v4783_v26 = vpop.permute.xlu0 %1906 }
 0x25a   : > { %v1889_v24 = vadd.f32 %v1887_v59, %v1884_v54  ;;  %v1890_v40 = vadd.f32 %v1888_v19, %v1885_v55 }
 0x25c   : > { %v4789_v52 = vpop.permute.xlu1 %1915  ;;  %v1902_v55 = vmul.f32 %v1895_v30, %v1889_v24 }
 0x25d   : > { %v4795_v15 = vpop.permute.xlu0 %1913 }
 0x25e   : > { %v1917_v22 = vsel %vm1910_vm10, %v4795_v15, %v4789_v52  ;;  %v1918_v51 = vsel %vm1910_vm10, %v4789_v52, %v4795_v15  ;;  %v1911_v52 = vsel %vm1910_vm10, %v4783_v26, %v4781_v60  ;;  %v1912_v15 = vsel %vm1910_vm10, %v4781_v60, %v4783_v26 }
 0x25f   : > { %v1926_v29 = vmul.f32 %v1925_v45, %v1917_v22  ;;  %v1927_v8 = vmul.f32 %v1925_v45, %v1918_v51  ;;  %v1863_v60 = vmul.f32 %v1856_v5, %v1850_v62  ;;  %v1864_v26 = vmul.f32 %v1860_v9, %v1851_v0 }
 0x260   : > { %v4809_v2 = vpop.permute.xlu1 %1947  ;;  %v1923_v45 = vmul.f32 %v1922_v34, %v1911_v52  ;;  %v1924_v22 = vmul.f32 %v1922_v34, %v1912_v15  ;;  %v1827_v9 = vadd.f32 %v1825_v48, %v4763_v28  ;;  %v2117_v62 = vstv %s4955_s15 }
 0x261   : > { %v4819_v43 = vpop.permute.xlu0 %1945  ;;  %v2120_v0 = vstv %s4957_s3 }
 0x262   : > { %v1928_v34 = vadd.f32 %v1926_v29, %v1923_v45  ;;  %v1929_v19 = vadd.f32 %v1927_v8, %v1924_v22  ;;  %v1950_v54 = vsel %vm1949_vm11, %v4819_v43, %v4809_v2  ;;  %v1951_v35 = vsel %vm1949_vm11, %v4809_v2, %v4819_v43  ;;  %v2567_v45 = vld [vmem:[#allocation6 + $0x15] ss:$8 sm:$0x3] }
 0x263   : > { %v1865_v2 = vadd.f32 %v1863_v60, %v1826_v11  ;;  %v1866_v43 = vadd.f32 %v1864_v26, %v1827_v9  ;;  %v1962_v52 = vmul.f32 %v1961_v16, %v1950_v54  ;;  %v1963_v15 = vmul.f32 %v1961_v16, %v1951_v35 }
 0x264   : > { %v4841_v10 = vpop.permute.xlu1 %1954  ;;  %v1941_v60 = vmul.f32 %v1934_v58, %v1928_v34  ;;  %v5109_v22 = vmul.f32 %v2567_v45, %v4817_v42  ;;  %v5604_v35 = vrot.slane %v4869_v25, %v3171_v14 }
 0x265   : > { %v4849_v21 = vpop.permute.xlu0 %1952 }
 0x266   : > { %v1956_v51 = vsel %vm1949_vm11, %v4849_v21, %v4841_v10  ;;  %v1957_v5 = vsel %vm1949_vm11, %v4841_v10, %v4849_v21  ;;  %v2168_v45 = vrot.slane %v5109_v22, %v3171_v14 }
 0x267   : > { %v1965_v10 = vmul.f32 %v1964_v57, %v1956_v51  ;;  %v1966_v21 = vmul.f32 %v1964_v57, %v1957_v5  ;;  %v1903_v57 = vmul.f32 %v1899_v32, %v1890_v40  ;;  %v2566_v40 = vld [vmem:[#allocation6 + $0x14] ss:$8 sm:$0x3]  ;;  %v1904_v51 = vadd.f32 %v1902_v55, %v1865_v2 }
 0x268   : > { %v4877_v53 = vpop.permute.xlu1 %1986 }
 0x269   : > { %v4891_v31 = vpop.permute.xlu0 %1984  ;;  %v1968_v26 = vadd.f32 %v1966_v21, %v1963_v15  ;;  %v1905_v5 = vadd.f32 %v1903_v57, %v1866_v43  ;;  %v5605_v21 = vrot.slane %v4869_v25, %v3181_v17 }
 0x26a   : > { %v1990_v30 = vsel %vm1988_vm12, %v4877_v53, %v4891_v31 }
 0x26c   : > { %v4926_v13 = vpop.permute.xlu1 %1993 }
 0x26d   : > { %v4929_v46 = vpop.permute.xlu0 %1991 }
 0x26e   : > { %v1995_v44 = vsel %vm1988_vm12, %v4929_v46, %v4926_v13  ;;  %v1996_v48 = vsel %vm1988_vm12, %v4926_v13, %v4929_v46  ;;  %v1989_v13 = vsel %vm1988_vm12, %v4891_v31, %v4877_v53  ;;  %v1942_v53 = vmul.f32 %v1938_v50, %v1929_v19 }
 0x26f   : > { %v2004_v32 = vmul.f32 %v2003_v18, %v1995_v44  ;;  %v2005_v46 = vmul.f32 %v2003_v18, %v1996_v48  ;;  %v1967_v31 = vadd.f32 %v1965_v10, %v1962_v52  ;;  %v2001_v24 = vmul.f32 %v2000_v1, %v1989_v13 }
 0x270   : > { %v4945_v3 = vpop.permute.xlu1 %2025  ;;  %v2002_v18 = vmul.f32 %v2000_v1, %v1990_v30  ;;  %v5106_v1 = vmul.f32 %v2566_v40, %v4817_v42  ;;  %v1943_v19 = vadd.f32 %v1941_v60, %v1904_v51  ;;  %v1944_v54 = vadd.f32 %v1942_v53, %v1905_v5 }
 0x271   : > { %v4968_v39 = vpop.permute.xlu0 %2023  ;;  %v2006_v11 = vadd.f32 %v2004_v32, %v2001_v24  ;;  %v1980_v10 = vmul.f32 %v5604_v35, %v1967_v31  ;;  %v1981_v44 = vmul.f32 %v5605_v21, %v1968_v26  ;;  %v2172_v51 = vrot.slane %v5109_v22, %v3181_v17 }
 0x272   : > { %v2029_v58 = vsel %vm2027_vm13, %v4945_v3, %v4968_v39  ;;  %v2007_v9 = vadd.f32 %v2005_v46, %v2002_v18 }
 0x273   : > { %v2019_v30 = vmul.f32 %v2012_v33, %v2006_v11  ;;  %v1983_v33 = vadd.f32 %v1981_v44, %v1944_v54 }
 0x274   : > { %v2033_v49 = vpop.permute.xlu1 %2032 }
 0x275   : > { %v2031_v12 = vpop.permute.xlu0 %2030 }
 0x276   : > { %v2034_v16 = vsel %vm2027_vm13, %v2031_v12, %v2033_v49  ;;  %v2035_v29 = vsel %vm2027_vm13, %v2033_v49, %v2031_v12  ;;  %v2028_v49 = vsel %vm2027_vm13, %v4968_v39, %v4945_v3 }
 0x277   : > { %v2043_v20 = vmul.f32 %v2042_v36, %v2034_v16  ;;  %v2044_v50 = vmul.f32 %v2042_v36, %v2035_v29  ;;  %v2040_v3 = vmul.f32 %v2039_v37, %v2028_v49  ;;  %v2041_v36 = vmul.f32 %v2039_v37, %v2029_v58 }
 0x278   : > { %v5031_v59 = vpop.permute.xlu1 %2064  ;;  %v1982_v29 = vadd.f32 %v1980_v10, %v1943_v19  ;;  %v2129_v49 = vrot.slane %v5106_v1, %v3171_v14 }
 0x279   : > { %v2063_v28 = vpop.permute.xlu0 %2062  ;;  %v2045_v37 = vadd.f32 %v2043_v20, %v2040_v3  ;;  %v2046_v48 = vadd.f32 %v2044_v50, %v2041_v36  ;;  %v2156_v50 = vstv %s5126_s19 }
 0x27a   : > { %v2067_v2 = vsel %vm2066_vm14, %v2063_v28, %v5031_v59  ;;  %v2068_v43 = vsel %vm2066_vm14, %v5031_v59, %v2063_v28  ;;  %v2020_v59 = vmul.f32 %v2016_v61, %v2007_v9  ;;  %v2021_v58 = vadd.f32 %v2019_v30, %v1982_v29 }
 0x27b   : > { %v2080_v32 = vmul.f32 %v2078_v4, %v2068_v43  ;;  %v2058_v60 = vmul.f32 %v2051_v27, %v2045_v37 }
 0x27c   : > { %v2072_v38 = vpop.permute.xlu1 %2071  ;;  %v2022_v20 = vadd.f32 %v2020_v59, %v1983_v33 }
 0x27d   : > { %v2070_v8 = vpop.permute.xlu0 %2069  ;;  %v2060_v5 = vadd.f32 %v2058_v60, %v2021_v58 }
 0x27e   : > { %v2073_v39 = vsel %vm2066_vm14, %v2070_v8, %v2072_v38  ;;  %v2074_v42 = vsel %vm2066_vm14, %v2072_v38, %v2070_v8  ;;  %v2079_v38 = vmul.f32 %v2078_v4, %v2067_v2  ;;  %v5606_v4 = vrot.slane %v4912_v47, %v3181_v17 }
 0x27f   : > { %v2082_v55 = vmul.f32 %v2081_v7, %v2073_v39  ;;  %v2083_v57 = vmul.f32 %v2081_v7, %v2074_v42 }
 0x280   : > { %v2104_v12 = vpop.permute.xlu1 %2103  ;;  %v2059_v53 = vmul.f32 %v5606_v4, %v2046_v48 }
 0x281   : > { %v2102_v34 = vpop.permute.xlu0 %2101  ;;  %v2084_v31 = vadd.f32 %v2082_v55, %v2079_v38  ;;  %v2085_v26 = vadd.f32 %v2083_v57, %v2080_v32  ;;  %v5612_v38 = vld [vmem:[#allocation25_spill] sm:$0xff] }
 0x282   : > { %v2106_v52 = vsel %vm2105_vm15, %v2102_v34, %v2104_v12  ;;  %v2107_v15 = vsel %vm2105_vm15, %v2104_v12, %v2102_v34  ;;  %v2159_v12 = vstv %s5128_s22  ;;  %v2061_v11 = vadd.f32 %v2059_v53, %v2022_v20 }
 0x283   : > { %v2118_v63 = vmul.f32 %v2117_v62, %v2106_v52  ;;  %v2119_v61 = vmul.f32 %v2117_v62, %v2107_v15  ;;  %v2133_v62 = vrot.slane %v5106_v1, %v3181_v17  ;;  %v2097_v1 = vmul.f32 %v2090_v6, %v2084_v31 }
 0x284   : > { %v2111_v25 = vpop.permute.xlu1 %2110  ;;  %v2098_v9 = vmul.f32 %v2094_v56, %v2085_v26 }
 0x285   : > { %v2109_v13 = vpop.permute.xlu0 %2108  ;;  %v2099_v10 = vadd.f32 %v2097_v1, %v2060_v5 }
 0x286   : > { %v2112_v28 = vsel %vm2105_vm15, %v2109_v13, %v2111_v25  ;;  %v2113_v7 = vsel %vm2105_vm15, %v2111_v25, %v2109_v13  ;;  %v2100_v21 = vadd.f32 %v2098_v9, %v2061_v11 }
 0x287   : > { %v2121_v46 = vmul.f32 %v2120_v0, %v2112_v28  ;;  %v2122_v16 = vmul.f32 %v2120_v0, %v2113_v7  ;;  %v2568_v28 = vld [vmem:[%s5607_s26] sm:$0xff] }
 0x288   : > { %v2143_v8 = vpop.permute.xlu1 %2142 }
 0x289   : > { %v2141_v0 = vpop.permute.xlu0 %2140  ;;  %v2123_v24 = vadd.f32 %v2121_v46, %v2118_v63  ;;  %v2124_v18 = vadd.f32 %v2122_v16, %v2119_v61 }
 0x28a   : > { %v2145_v27 = vsel %vm2144_vm0, %v2141_v0, %v2143_v8  ;;  %v2146_v47 = vsel %vm2144_vm0, %v2143_v8, %v2141_v0 }
 0x28b   : > { %v2136_v3 = vmul.f32 %v2129_v49, %v2123_v24  ;;  %v2137_v36 = vmul.f32 %v2133_v62, %v2124_v18  ;;  %v2157_v22 = vmul.f32 %v2156_v50, %v2145_v27  ;;  %v2158_v19 = vmul.f32 %v2156_v50, %v2146_v47 }
 0x28c   : > { %v2150_v40 = vpop.permute.xlu1 %2149 }
 0x28d   : > { %v2148_v34 = vpop.permute.xlu0 %2147  ;;  %v2138_v37 = vadd.f32 %v2136_v3, %v2099_v10  ;;  %v2139_v17 = vadd.f32 %v2137_v36, %v2100_v21 }
 0x28e   : > { %v2151_v39 = vsel %vm2144_vm0, %v2148_v34, %v2150_v40  ;;  %v2152_v42 = vsel %vm2144_vm0, %v2150_v40, %v2148_v34 }
 0x28f   : > { %v2160_v54 = vmul.f32 %v2159_v12, %v2151_v39  ;;  %v2161_v35 = vmul.f32 %v2159_v12, %v2152_v42 }
 0x291   : > { %v2162_v6 = vadd.f32 %v2160_v54, %v2157_v22  ;;  %v2163_v44 = vadd.f32 %v2161_v35, %v2158_v19 }
 0x293   : > { %v2175_v41 = vmul.f32 %v2168_v45, %v2162_v6  ;;  %v2176_v56 = vmul.f32 %v2172_v51, %v2163_v44 }
 0x295   : > { %v2177_v48 = vadd.f32 %v2175_v41, %v2138_v37  ;;  %v2178_v2 = vadd.f32 %v2176_v56, %v2139_v17 }
 0x297   : > { %v2423_v43 = vmul.f32 -1.442695, %v2177_v48  ;;  %v2424_v25 = vmul.f32 -1.442695, %v2178_v2 }
 0x299   : > { %2550 = vpow2.f32 %v2423_v43 }
 0x29a   : > { %2552 = vpow2.f32 %v2424_v25 }
 0x2a3   : > { %v2551_v23 = vpop.eup %2550 }
 0x2a4   : > { %v2553_v55 = vpop.eup %2552  ;;  %v2185_v57 = vadd.f32 1.0, %v2551_v23 }
 0x2a5   : > { %v2186_v52 = vadd.f32 1.0, %v2553_v55 }
 0x2a6   : > { %2554 = vrcp.f32 %v2185_v57 }
 0x2a7   : > { %2556 = vrcp.f32 %v2186_v52 }
 0x2b0   : > { %v2555_v15 = vpop.eup %2554 }
 0x2b1   : > { %v2557_v13 = vpop.eup %2556  ;;  %v2194_v30 = vrot.slane %v2555_v15, %v3171_v14 }
 0x2b2   : > { %v2198_v59 = vrot.slane %v2557_v13, %v3171_v14 }
 0x2b3   : > { %v2199_v7 = vmul.f32 %v2568_v28, %v2194_v30 }
 0x2b4   : > { %v2200_v32 = vmul.f32 %v2198_v59, %v5612_v38 }
 0x2b6   : > { %v2203_v46 = vcombine.low %v2199_v7, %v2200_v32 }
 0x2b8   : > { %2205 = vst [vmem:[%s215_s11] sm:$0xff] %v2203_v46 }
 0x2b9   : > { %2655 = shalt.err (!%p2652_p13)
}
 0x2ba   : > { %s2656_s8 = scalar_lea.hbm %s5206_s25, 128  ;;  %s2660_s23 = scalar_lea.hbm %s5613_s0, 256 }
 0x2bb   : > { %p2657_p4 = scmp.ne.s32.totalorder %s5206_s25, %s2656_s8  ;;  %p2661_p0 = scmp.lt.u32.totalorder %s5206_s25, %s5613_s0 }
 0x2bc   : > { %p2662_p3 = scmp.lt.u32.totalorder %s2660_s23, %s2656_s8  ;;  %p2664_p9 = scmp.lt.u32.totalorder %s2656_s8, %s5206_s25 }
 0x2bd   : > { %p2658_p2 = pnand %p2657_p4, %p2893_p7 }
 0x2be   : > { %p2663_p5 = por %p2662_p3, %p2661_p0 }
 0x2bf   : > { %p2659_p11 = pneg %p2658_p2 }
 0x2c0   : > { %p2665_p12 = por %p2664_p9, %p2663_p5 }
 0x2c2   : > { %p2666_p10 = pnand %p2665_p12, %p2659_p11 }
 0x2c4   : > { %2669 = shalt.err (!%p2666_p10)
}
 0x2c5   : > { %2442 = dma.vmem_to_hbm [thread:$0]  (%p2893_p7), %s5208_s27, 128, %s5206_s25, %s2207_s30  }
 0x2c6 PF: > { %s5614_s9 = sld [smem:[#allocation14_spill]]  ;;  %s5615_s1 = sld [smem:[#allocation19_spill]] }
 0x2c7   : > { %s5616_s14 = sld [smem:[#allocation17_spill]] }
 0x2cc   : > { %s2233_s13 = sand.u32 1, %s5614_s9   ;;  %p5617_p1 = scmp.ne.s32.totalorder %s5615_s1, 0 }
 0x2cd   : > { %p5618_p6 = scmp.ge.s32.totalorder %s5616_s14, 2  ;;  %s2234_s15 = scalar_lea.sflag [#allocation4], %s2233_s13 }
 0x2cf   : > { %p2456_p8 = pnand %p5618_p6, %p5617_p1 }
 0x2d1   : > { %2699 = dma.done.wait (!%p2456_p8), %s2234_s15, 128  }
 0x2d2   : > { %2701 = vsyncadd (!%p2456_p8), %s2234_s15, 4294967168  ;;  %s5619_s15 = sld [smem:[#allocation20_spill]]  ;;  %s5620_s12 = sld [smem:[#allocation15_spill]] }
 0x2d3   : > { %s5621_s13 = sld [smem:[#allocation16_spill]]  ;;  %s5622_s14 = sld [smem:[#allocation22_spill]] }
 0x2d8   : > { %p18_p13 = scmp.ge.s32.totalorder %s5619_s15, 4  }
 0x2da   :  { %20 = sbr.rel (!%p18_p13) target bundleno = 12 (0xc), region = 99 }
 0x2e1   :  { %2239 = vsyncpa [#allocation3], 1 }
 0x2e2   :  { %2241 = vsyncpa [#allocation3 + $0x1], 1 }
 0x2e3   :  { %2242 = vsyncpa [#allocation7], 1 }
 0x2e4   :  { %2243 = vsyncpa [#allocation4], 1 }
 0x2e5   :  { %2245 = vsyncpa [#allocation4 + $0x1], 1 }
 0x2e6   :  { %2246 = vsyncpa [#allocation5], 1 }
 0x2e7   :  { %2248 = vsyncpa [#allocation5 + $0x1], 1 }

</bundles_post_ra>
